<compile_context>
chip_gen: v5e
topology: v5e:2x2
jax: 0.10.0
libtpu: 0.0.40
codegen_flags: <defaults>
</compile_context>

<pallas_src>
import jax
import jax.numpy as jnp
from jax.experimental import pallas as pl
from jax.experimental.pallas import tpu as pltpu


# ---------------------------------------------------------------------------
# small helpers
# ---------------------------------------------------------------------------

def _round_up(x, m):
    return ((x + m - 1) // m) * m


def _row_tile(m, cap=512):
    """Large (capped) multiple-of-8 row tile, aiming for >=2 grid steps (megacore)."""
    return max(8, min(cap, _round_up((m + 1) // 2, 8)))


def _probe_buffered_support():
    """Check once whether pipeline_mode=pl.Buffered(1) lowers on this Pallas build."""
    def _copy(x_ref, o_ref):
        o_ref[...] = x_ref[...]
    try:
        spec = pl.BlockSpec((8, 128), lambda i: (0, 0),
                            pipeline_mode=pl.Buffered(buffer_count=1))
        fn = pl.pallas_call(
            _copy,
            out_shape=jax.ShapeDtypeStruct((8, 128), jnp.float32),
            grid=(1,),
            in_specs=[spec],
            out_specs=pl.BlockSpec((8, 128), lambda i: (0, 0)),
        )
        jax.block_until_ready(fn(jnp.zeros((8, 128), jnp.float32)))
        return True
    except Exception:
        return False


_BUFFERED_OK = _probe_buffered_support()


def _invariant_spec(shape):
    """BlockSpec for a grid-invariant operand (weights/biases): whole array, fetched once,
    single-buffered when supported (halves resident-weight VMEM)."""
    index_map = lambda *_: (0,) * len(shape)
    if _BUFFERED_OK:
        return pl.BlockSpec(shape, index_map,
                            pipeline_mode=pl.Buffered(buffer_count=1))
    return pl.BlockSpec(shape, index_map)


# ---------------------------------------------------------------------------
# fused attention block: QKV proj + flash MHA + out proj + residual + LayerNorm
# ---------------------------------------------------------------------------

def _fused_mha_block(xq, xk, mha, norm, nhead, *, eps=1e-5, tq_cap=128, tk_cap=1024):
    """out = LayerNorm(xq + MHA(query=xq, key=value=xk)).

    xq : (B, Pq, C) float32  (also the residual branch)
    xk : (B, Pk, C) float32 or bfloat16 (matmul-only operand)
    mha: per-head weight slabs wq/wk/wv (H,C,Dh), wo (H,Dh,C), biases (H,1,Dh)/(1,C)
    """
    B, Pq, C = xq.shape
    Pk = xk.shape[1]
    H = nhead
    Dh = C // H
    cdt = mha["wq"].dtype                       # matmul compute dtype (bf16)

    tq = min(tq_cap, _round_up(Pq, 8))
    tk = min(tk_cap, _round_up(Pk, 8))
    n_q = pl.cdiv(Pq, tq)
    n_k = pl.cdiv(Pk, tk)
    ragged_k = (Pk % tk) != 0

    def kernel(xq_ref, xk_ref, wq_ref, bq_ref, wk_ref, bk_ref, wv_ref, bv_ref,
               wo_ref, bo_ref, g_ref, be_ref, o_ref,
               q_s, m_s, l_s, pv_s, out_s):
        kt = pl.program_id(2)
        h = pl.program_id(3)
        last_k = pl.num_programs(2) - 1
        last_h = pl.num_programs(3) - 1

        # -- per (b, q-tile) init: zero the out-projection accumulator --
        @pl.when((kt == 0) & (h == 0))
        def _():
            out_s[...] = jnp.zeros_like(out_s)

        # -- per (b, q-tile, head) init: project this head's queries once, reset flash state --
        @pl.when(kt == 0)
        def _():
            xq_c = xq_ref[0].astype(cdt)                                    # (tq, C)
            q_s[h] = (jnp.dot(xq_c, wq_ref[h],
                              preferred_element_type=jnp.float32)
                      + bq_ref[h]).astype(q_s.dtype)                        # (tq, Dh)
            m_s[h] = jnp.full_like(m_s[h], -jnp.inf)
            l_s[h] = jnp.zeros_like(l_s[h])
            pv_s[h] = jnp.zeros_like(pv_s[h])

        # -- flash step for this (head, key tile): K/V projection fused; head selection is
        #    leading-axis block indexing on the weight slabs (no lane slicing / concat) --
        xk_c = xk_ref[0].astype(cdt)                                        # (tk, C)
        kh = (jnp.dot(xk_c, wk_ref[h], preferred_element_type=jnp.float32)
              + bk_ref[h]).astype(cdt)                                      # (tk, Dh)
        vh = (jnp.dot(xk_c, wv_ref[h], preferred_element_type=jnp.float32)
              + bv_ref[h]).astype(cdt)                                      # (tk, Dh)
        s = jax.lax.dot_general(q_s[h], kh, (((1,), (1,)), ((), ())),
                                preferred_element_type=jnp.float32)         # (tq, tk)
        if ragged_k:  # mask padded key columns of the ragged last Lk tile
            col = kt * tk + jax.lax.broadcasted_iota(jnp.int32, (1, tk), 1)
            s = jnp.where(col < Pk, s, -jnp.inf)
            row = kt * tk + jax.lax.broadcasted_iota(jnp.int32, (tk, 1), 0)
            vh = jnp.where(row < Pk, vh, jnp.zeros_like(vh))
        m_prev = m_s[h]
        m_new = jnp.maximum(m_prev, jnp.max(s, axis=-1, keepdims=True))
        alpha = jnp.exp(m_prev - m_new)
        p = jnp.exp(s - m_new)
        l_s[h] = alpha * l_s[h] + jnp.sum(p, axis=-1, keepdims=True)
        pv_s[h] = alpha * pv_s[h] + jnp.dot(p.astype(cdt), vh,
                                            preferred_element_type=jnp.float32)
        m_s[h] = m_new

        # -- per-head epilogue: fold this head straight into the out-projection accumulator --
        @pl.when(kt == last_k)
        def _():
            oh = (pv_s[h] / l_s[h]).astype(cdt)                             # (tq, Dh)
            out_s[...] += jnp.dot(oh, wo_ref[h],
                                  preferred_element_type=jnp.float32)       # (tq, C)

        # -- final epilogue: residual + bias + LayerNorm (one-pass statistics) --
        @pl.when((kt == last_k) & (h == last_h))
        def _():
            z = xq_ref[0] + out_s[...] + bo_ref[...]
            mu = jnp.mean(z, axis=-1, keepdims=True)
            var = jnp.mean(z * z, axis=-1, keepdims=True) - mu * mu
            o_ref[0] = ((z - mu) * jax.lax.rsqrt(var + eps) * g_ref[...]
                        + be_ref[...]).astype(o_ref.dtype)

    return pl.pallas_call(
        kernel,
        out_shape=jax.ShapeDtypeStruct((B, Pq, C), jnp.float32),
        grid=(B, n_q, n_k, H),
        in_specs=[
            pl.BlockSpec((1, tq, C), lambda b, qt, kt, h: (b, qt, 0)),
            pl.BlockSpec((1, tk, C), lambda b, qt, kt, h: (b, kt, 0)),
            _invariant_spec((H, C, Dh)),   # wq (q-scaling folded in)
            _invariant_spec((H, 1, Dh)),   # bq
            _invariant_spec((H, C, Dh)),   # wk
            _invariant_spec((H, 1, Dh)),   # bk
            _invariant_spec((H, C, Dh)),   # wv
            _invariant_spec((H, 1, Dh)),   # bv
            _invariant_spec((H, Dh, C)),   # wo (head-major rows of out_proj.weight.T)
            _invariant_spec((1, C)),       # b_out
            _invariant_spec((1, C)),       # LayerNorm gamma
            _invariant_spec((1, C)),       # LayerNorm beta
        ],
        out_specs=pl.BlockSpec((1, tq, C), lambda b, qt, kt, h: (b, qt, 0)),
        scratch_shapes=[
            pltpu.VMEM((H, tq, Dh), cdt),           # q_s  : per-head projected queries
            pltpu.VMEM((H, tq, 1), jnp.float32),    # m_s  : running max
            pltpu.VMEM((H, tq, 1), jnp.float32),    # l_s  : running denominator
            pltpu.VMEM((H, tq, Dh), jnp.float32),   # pv_s : running P@V accumulator
            pltpu.VMEM((tq, C), jnp.float32),       # out_s: out-projection accumulator
        ],
        compiler_params=pltpu.CompilerParams(
            dimension_semantics=("parallel", "parallel", "arbitrary", "arbitrary")),
    )(xq, xk, mha["wq"], mha["bq"], mha["wk"], mha["bk"], mha["wv"], mha["bv"],
      mha["wo"], mha["bo"], norm["weight"], norm["bias"])


# ---------------------------------------------------------------------------
# fused FFN block: linear1 + ReLU + linear2 + residual + LayerNorm
# ---------------------------------------------------------------------------

def _ffn_add_layernorm(x, w1_t, b1, w2_t, b2, gamma, beta, eps=1e-5):
    """out = LayerNorm(x + relu(x @ w1_t + b1) @ w2_t + b2); the hidden never touches HBM."""
    M, C = x.shape
    F = w1_t.shape[1]
    tm = _row_tile(M)
    cdt = w1_t.dtype

    def kernel(x_ref, w1_ref, b1_ref, w2_ref, b2_ref, g_ref, be_ref, o_ref):
        x32 = x_ref[...]
        hid = jnp.dot(x32.astype(cdt), w1_ref[...],
                      preferred_element_type=jnp.float32) + b1_ref[...]
        # TODO(synk): hidden kept in bf16 for the second MXU matmul (torch keeps f32)
        hid = jnp.maximum(hid, 0.0).astype(cdt)
        y = jnp.dot(hid, w2_ref[...], preferred_element_type=jnp.float32) + b2_ref[...]
        z = x32 + y
        mu = jnp.mean(z, axis=-1, keepdims=True)
        var = jnp.mean(z * z, axis=-1, keepdims=True) - mu * mu
        o_ref[...] = ((z - mu) * jax.lax.rsqrt(var + eps) * g_ref[...]
                      + be_ref[...]).astype(o_ref.dtype)

    return pl.pallas_call(
        kernel,
        out_shape=jax.ShapeDtypeStruct((M, C), jnp.float32),
        grid=(pl.cdiv(M, tm),),
        in_specs=[
            pl.BlockSpec((tm, C), lambda i: (i, 0)),
            _invariant_spec((C, F)),
            _invariant_spec((1, F)),
            _invariant_spec((F, C)),
            _invariant_spec((1, C)),
            _invariant_spec((1, C)),
            _invariant_spec((1, C)),
        ],
        out_specs=pl.BlockSpec((tm, C), lambda i: (i, 0)),
        compiler_params=pltpu.CompilerParams(dimension_semantics=("parallel",)),
    )(x, w1_t, b1, w2_t, b2, gamma, beta)


# ---------------------------------------------------------------------------
# TransformerDecoderLayer forward
# ---------------------------------------------------------------------------

def transformer_decoder_layer_forward(query_bcp, key_bcp, params, nhead):
    """query_bcp: (B, C, Pq), key_bcp: (B, C, Pk) -> (B, C, Pq)."""
    B, C, Pq = query_bcp.shape
    assert C % nhead == 0, "d_model must be divisible by nhead"
    cdt = params["self_attn"]["wq"].dtype

    # Boundary transposes NCP -> token-major NPC (the only layout ops outside kernels).
    # The key tensor is matmul-only, so its compute-dtype cast fuses with the transpose.
    q = jnp.transpose(query_bcp, (0, 2, 1)).astype(jnp.float32)   # (B, Pq, C)
    k = jnp.transpose(key_bcp, (0, 2, 1)).astype(cdt)             # (B, Pk, C)

    # self-attention block (QKV proj + MHA + out-proj + residual + norm1), one kernel
    q = _fused_mha_block(q, q, params["self_attn"], params["norm1"], nhead)
    # cross-attention block (norm2), same fused kernel with keys/values from the key tokens
    q = _fused_mha_block(q, k, params["cross_attn"], params["norm2"], nhead)
    # FFN block (linear1 + ReLU + linear2 + residual + norm3), one kernel
    q = _ffn_add_layernorm(q.reshape(B * Pq, C),
                           params["linear1"]["w_t"], params["linear1"]["b"],
                           params["linear2"]["w_t"], params["linear2"]["b"],
                           params["norm3"]["weight"], params["norm3"]["bias"])

    return jnp.transpose(q.reshape(B, Pq, C), (0, 2, 1))           # (B, C, Pq)


# ---------------------------------------------------------------------------
# Parameter init (torch shapes) and one-time kernel-layout preparation
# ---------------------------------------------------------------------------

def _xavier_uniform(key, shape):
    fan_out, fan_in = shape
    a = (6.0 / (fan_in + fan_out)) ** 0.5
    return jax.random.uniform(key, shape, jnp.float32, -a, a)


def init_params(key, d_model, nhead, dim_ff):
    """Raw parameters in the torch module's shapes/conventions (non-zero biases for testing)."""
    ks = jax.random.split(key, 18)

    def mha(k0, k1, k2, k3):
        return {"in_proj_weight": _xavier_uniform(k0, (3 * d_model, d_model)),
                "in_proj_bias": 0.02 * jax.random.normal(k1, (3 * d_model,), jnp.float32),
                "out_proj_weight": _xavier_uniform(k2, (d_model, d_model)),
                "out_proj_bias": 0.02 * jax.random.normal(k3, (d_model,), jnp.float32)}

    def ln(k0, k1):
        return {"weight": 1.0 + 0.05 * jax.random.normal(k0, (d_model,), jnp.float32),
                "bias": 0.02 * jax.random.normal(k1, (d_model,), jnp.float32)}

    return {"self_attn": mha(ks[0], ks[1], ks[2], ks[3]),
            "cross_attn": mha(ks[4], ks[5], ks[6], ks[7]),
            "linear1": {"weight": _xavier_uniform(ks[8], (dim_ff, d_model)),
                        "bias": 0.02 * jax.random.normal(ks[9], (dim_ff,), jnp.float32)},
            "linear2": {"weight": _xavier_uniform(ks[10], (d_model, dim_ff)),
                        "bias": 0.02 * jax.random.normal(ks[11], (d_model,), jnp.float32)},
            "norm1": ln(ks[12], ks[13]), "norm2": ln(ks[14], ks[15]),
            "norm3": ln(ks[16], ks[17])}


def prepare_params(raw, d_model, nhead, compute_dtype=jnp.bfloat16):
    """One-time prep to kernel layout:
       * per-head weight slabs  wq/wk/wv: (H, C, Dh), wout: (H, Dh, C)  in compute_dtype
       * head-major biases (H, 1, Dh) f32; 1/sqrt(Dh) query scaling folded into wq/bq
       * FFN weights pre-transposed to (in, out) layout; biases / LayerNorm params (1, N) f32.
    d_model=128 in the ctransfusion config is already lane-dense.
    TODO(synk): pad the channel dim to a multiple of 128 here for other d_model values."""
    C, H = d_model, nhead
    Dh = C // H
    scaling = float(Dh) ** (-0.5)

    def head_cols(w_rows, scale=1.0):
        # rows of torch in_proj_weight (C_out, C_in) -> per-head slabs (H, C_in, Dh)
        w_t = w_rows.T * scale                                     # (C_in, C_out)
        return jnp.transpose(w_t.reshape(C, H, Dh), (1, 0, 2)).astype(compute_dtype)

    def head_bias(b_rows, scale=1.0):
        return (b_rows * scale).reshape(H, 1, Dh).astype(jnp.float32)

    def prep_mha(m):
        w_in, b_in = m["in_proj_weight"], m["in_proj_bias"]
        return {
            "wq": head_cols(w_in[:C], scaling), "bq": head_bias(b_in[:C], scaling),
            "wk": head_cols(w_in[C:2 * C]),     "bk": head_bias(b_in[C:2 * C]),
            "wv": head_cols(w_in[2 * C:]),      "bv": head_bias(b_in[2 * C:]),
            # out = concat_h(attn_h) @ Wout^T + b == sum_h attn_h @ (Wout^T)[hDh:(h+1)Dh, :]
            "wo": m["out_proj_weight"].T.reshape(H, Dh, C).astype(compute_dtype),
            "bo": m["out_proj_bias"].reshape(1, C).astype(jnp.float32),
        }

    def prep_ln(n):
        return {"weight": n["weight"].reshape(1, C).astype(jnp.float32),
                "bias": n["bias"].reshape(1, C).astype(jnp.float32)}

    return {"self_attn": prep_mha(raw["self_attn"]),
            "cross_attn": prep_mha(raw["cross_attn"]),
            "linear1": {"w_t": raw["linear1"]["weight"].T.astype(compute_dtype),
                        "b": raw["linear1"]["bias"].reshape(1, -1).astype(jnp.float32)},
            "linear2": {"w_t": raw["linear2"]["weight"].T.astype(compute_dtype),
                        "b": raw["linear2"]["bias"].reshape(1, -1).astype(jnp.float32)},
            "norm1": prep_ln(raw["norm1"]),
            "norm2": prep_ln(raw["norm2"]),
            "norm3": prep_ln(raw["norm3"])}


# ---------------------------------------------------------------------------
# pure-JAX reference (f32) mirroring the torch module, for a loose parity check
# ---------------------------------------------------------------------------

def _reference_forward(query_bcp, key_bcp, raw, nhead):
    C = query_bcp.shape[1]
    H = nhead
    Dh = C // H
    scaling = float(Dh) ** (-0.5)

    def mha(xq, xk, m):
        W, b = m["in_proj_weight"], m["in_proj_bias"]
        q = (xq @ W[:C].T + b[:C]) * scaling
        k = xk @ W[C:2 * C].T + b[C:2 * C]
        v = xk @ W[2 * C:].T + b[2 * C:]
        B, Lq, _ = q.shape
        Lk = k.shape[1]
        qh = q.reshape(B, Lq, H, Dh).transpose(0, 2, 1, 3)
        kh = k.reshape(B, Lk, H, Dh).transpose(0, 2, 1, 3)
        vh = v.reshape(B, Lk, H, Dh).transpose(0, 2, 1, 3)
        p = jax.nn.softmax(jnp.einsum("bhqd,bhkd->bhqk", qh, kh), axis=-1)
        o = jnp.einsum("bhqk,bhkd->bhqd", p, vh).transpose(0, 2, 1, 3).reshape(B, Lq, C)
        return o @ m["out_proj_weight"].T + m["out_proj_bias"]

    def ln(x, n):
        mu = x.mean(-1, keepdims=True)
        var = ((x - mu) ** 2).mean(-1, keepdims=True)
        return (x - mu) / jnp.sqrt(var + 1e-5) * n["weight"] + n["bias"]

    q = jnp.transpose(query_bcp, (0, 2, 1))
    k = jnp.transpose(key_bcp, (0, 2, 1))
    q = ln(q + mha(q, q, raw["self_attn"]), raw["norm1"])
    q = ln(q + mha(q, k, raw["cross_attn"]), raw["norm2"])
    hid = jnp.maximum(q @ raw["linear1"]["weight"].T + raw["linear1"]["bias"], 0.0)
    q = ln(q + hid @ raw["linear2"]["weight"].T + raw["linear2"]["bias"], raw["norm3"])
    return jnp.transpose(q, (0, 2, 1))


if __name__ == "__main__":
    B, C, Pq, Pk = 2, 128, 32, 128            # d_model=128 / nhead=8 matches ctransfusion
    nhead, dim_ff = 8, 256

    root = jax.random.PRNGKey(0)
    k_q, k_k, k_p = jax.random.split(root, 3)
    query = jax.random.normal(k_q, (B, C, Pq), jnp.float32)   # torch layout (B, C, Pq)
    key_t = jax.random.normal(k_k, (B, C, Pk), jnp.float32)   # torch layout (B, C, Pk)

    raw = init_params(k_p, C, nhead, dim_ff)
    params = prepare_params(raw, C, nhead, compute_dtype=jnp.bfloat16)

    fwd = jax.jit(transformer_decoder_layer_forward, static_argnames=("nhead",))
    out = jax.block_until_ready(fwd(query, key_t, params, nhead=nhead))
    assert out.shape == (B, C, Pq)
    assert bool(jnp.all(jnp.isfinite(out)))

    # loose parity check vs the f32 reference (kernels use bf16 matmul operands, f32 accumulate)
    ref = _reference_forward(query, key_t, raw, nhead)
    assert float(jnp.max(jnp.abs(out - ref))) < 0.3

    print("KERNEL_OK")
</pallas_src>

<mosaic_0001>
module attributes {stable_mosaic.version = 11 : i64} {
  func.func @_copy(%arg0: i32, %arg1: memref<8x128xf32, #tpu.memory_space<vmem>>, %arg2: memref<8x128xf32, #tpu.memory_space<vmem>>) attributes {dimension_semantics = [#tpu.dimension_semantics<arbitrary>], iteration_bounds = array<i64: 1>, scalar_prefetch = 0 : i64, scratch_operands = 0 : i64, tpu.core_type = #tpu.core_type<tc>, window_params = [{pipeline_mode = #tpu.pipeline_mode<synchronous>, transform_indices = @transform_0, window_bounds = array<i64: 8, 128>}, {pipeline_mode = #tpu.pipeline_mode<synchronous>, transform_indices = @transform_1, window_bounds = array<i64: 8, 128>}]} {
    %c0 = arith.constant 0 : index
    %c0_0 = arith.constant 0 : index
    %0 = vector.load %arg1[%c0, %c0_0] : memref<8x128xf32, #tpu.memory_space<vmem>>, vector<8x128xf32>
    %c0_1 = arith.constant 0 : index
    %c0_2 = arith.constant 0 : index
    %1 = vector.load %arg2[%c0_1, %c0_2] : memref<8x128xf32, #tpu.memory_space<vmem>>, vector<8x128xf32>
    tpu.vector_store %arg2[%c0_1, %c0_2], %0 {strides = array<i32>} : memref<8x128xf32, #tpu.memory_space<vmem>>, vector<8x128xf32>,
    return
  }
  func.func @transform_0(%arg0: i32) -> (i32, i32) {
    %c0_i32 = arith.constant 0 : i32
    %c0_i32_0 = arith.constant 0 : i32
    %c0_i32_1 = arith.constant 0 : i32
    return %c0_i32, %c0_i32_0 : i32, i32
  }
  func.func @transform_1(%arg0: i32) -> (i32, i32) {
    %c0_i32 = arith.constant 0 : i32
    %c0_i32_0 = arith.constant 0 : i32
    %c0_i32_1 = arith.constant 0 : i32
    return %c0_i32, %c0_i32_0 : i32, i32
  }
}

module attributes {stable_mosaic.version = 11 : i64} {
  func.func @kernel(%arg0: i32, %arg1: i32, %arg2: i32, %arg3: i32, %arg4: memref<1x32x128xf32, #tpu.memory_space<vmem>>, %arg5: memref<1x32x128xf32, #tpu.memory_space<vmem>>, %arg6: memref<8x128x16xbf16, #tpu.memory_space<vmem>>, %arg7: memref<8x1x16xf32, #tpu.memory_space<vmem>>, %arg8: memref<8x128x16xbf16, #tpu.memory_space<vmem>>, %arg9: memref<8x1x16xf32, #tpu.memory_space<vmem>>, %arg10: memref<8x128x16xbf16, #tpu.memory_space<vmem>>, %arg11: memref<8x1x16xf32, #tpu.memory_space<vmem>>, %arg12: memref<8x16x128xbf16, #tpu.memory_space<vmem>>, %arg13: memref<1x128xf32, #tpu.memory_space<vmem>>, %arg14: memref<1x128xf32, #tpu.memory_space<vmem>>, %arg15: memref<1x128xf32, #tpu.memory_space<vmem>>, %arg16: memref<1x32x128xf32, #tpu.memory_space<vmem>>, %arg17: memref<8x32x16xbf16, #tpu.memory_space<vmem>>, %arg18: memref<8x32x1xf32, #tpu.memory_space<vmem>>, %arg19: memref<8x32x1xf32, #tpu.memory_space<vmem>>, %arg20: memref<8x32x16xf32, #tpu.memory_space<vmem>>, %arg21: memref<32x128xf32, #tpu.memory_space<vmem>>) attributes {dimension_semantics = [#tpu.dimension_semantics<parallel>, #tpu.dimension_semantics<parallel>, #tpu.dimension_semantics<arbitrary>, #tpu.dimension_semantics<arbitrary>], iteration_bounds = array<i64: 2, 1, 1, 8>, scalar_prefetch = 0 : i64, scratch_operands = 5 : i64, tpu.core_type = #tpu.core_type<tc>, window_params = [{transform_indices = @transform_0, window_bounds = array<i64: 1, 32, 128>}, {transform_indices = @transform_1, window_bounds = array<i64: 1, 32, 128>}, {pipeline_mode = #tpu.pipeline_mode<synchronous>, transform_indices = @transform_2, window_bounds = array<i64: 8, 128, 16>}, {pipeline_mode = #tpu.pipeline_mode<synchronous>, transform_indices = @transform_3, window_bounds = array<i64: 8, 1, 16>}, {pipeline_mode = #tpu.pipeline_mode<synchronous>, transform_indices = @transform_4, window_bounds = array<i64: 8, 128, 16>}, {pipeline_mode = #tpu.pipeline_mode<synchronous>, transform_indices = @transform_5, window_bounds = array<i64: 8, 1, 16>}, {pipeline_mode = #tpu.pipeline_mode<synchronous>, transform_indices = @transform_6, window_bounds = array<i64: 8, 128, 16>}, {pipeline_mode = #tpu.pipeline_mode<synchronous>, transform_indices = @transform_7, window_bounds = array<i64: 8, 1, 16>}, {pipeline_mode = #tpu.pipeline_mode<synchronous>, transform_indices = @transform_8, window_bounds = array<i64: 8, 16, 128>}, {pipeline_mode = #tpu.pipeline_mode<synchronous>, transform_indices = @transform_9, window_bounds = array<i64: 1, 128>}, {pipeline_mode = #tpu.pipeline_mode<synchronous>, transform_indices = @transform_10, window_bounds = array<i64: 1, 128>}, {pipeline_mode = #tpu.pipeline_mode<synchronous>, transform_indices = @transform_11, window_bounds = array<i64: 1, 128>}, {transform_indices = @transform_12, window_bounds = array<i64: 1, 32, 128>}]} {
    %c0_i32 = arith.constant 0 : i32
    %0 = arith.cmpi eq, %arg2, %c0_i32 : i32
    %c0_i32_0 = arith.constant 0 : i32
    %1 = arith.cmpi eq, %arg3, %c0_i32_0 : i32
    %2 = arith.andi %0, %1 : i1
    %3 = arith.extui %2 : i1 to i32
    %c0_i32_1 = arith.constant 0 : i32
    %4 = arith.cmpi ne, %3, %c0_i32_1 : i32
    scf.if %4 {
      %cst_37 = arith.constant 0.000000e+00 : f32
      %81 = vector.broadcast %cst_37 : f32 to vector<32x128xf32>
      %c0_38 = arith.constant 0 : index
      %c0_39 = arith.constant 0 : index
      %82 = vector.load %arg21[%c0_38, %c0_39] : memref<32x128xf32, #tpu.memory_space<vmem>>, vector<32x128xf32>
      tpu.vector_store %arg21[%c0_38, %c0_39], %81 {strides = array<i32>} : memref<32x128xf32, #tpu.memory_space<vmem>>, vector<32x128xf32>,
    } else {
    }
    %c0_i32_2 = arith.constant 0 : i32
    %5 = arith.cmpi eq, %arg2, %c0_i32_2 : i32
    %6 = arith.extui %5 : i1 to i32
    %c0_i32_3 = arith.constant 0 : i32
    %7 = arith.cmpi ne, %6, %c0_i32_3 : i32
    scf.if %7 {
      %c0_37 = arith.constant 0 : index
      %c0_38 = arith.constant 0 : index
      %c0_39 = arith.constant 0 : index
      %81 = vector.load %arg4[%c0_37, %c0_38, %c0_39] : memref<1x32x128xf32, #tpu.memory_space<vmem>>, vector<1x32x128xf32>
      %82 = vector.shape_cast %81 : vector<1x32x128xf32> to vector<32x128xf32>
      %83 = arith.truncf %82 : vector<32x128xf32> to vector<32x128xbf16>
      %84 = arith.index_cast %arg3 : i32 to index
      %c0_40 = arith.constant 0 : index
      %c0_41 = arith.constant 0 : index
      %85 = vector.load %arg6[%84, %c0_40, %c0_41] : memref<8x128x16xbf16, #tpu.memory_space<vmem>>, vector<1x128x16xbf16>
      %86 = vector.shape_cast %85 : vector<1x128x16xbf16> to vector<128x16xbf16>
      %cst_42 = arith.constant dense<0.000000e+00> : vector<32x16xf32>
      %87 = tpu.matmul %83, %86, %cst_42 {dimension_numbers = #tpu.dot_dimension_numbers<[1], [0], [0], [1], [0, 0, 1, 1], [], []>} : vector<32x128xbf16>, vector<128x16xbf16>, vector<32x16xf32> -> vector<32x16xf32>
      %88 = arith.index_cast %arg3 : i32 to index
      %c0_43 = arith.constant 0 : index
      %c0_44 = arith.constant 0 : index
      %89 = vector.load %arg7[%88, %c0_43, %c0_44] : memref<8x1x16xf32, #tpu.memory_space<vmem>>, vector<1x1x16xf32>
      %90 = vector.shape_cast %89 : vector<1x1x16xf32> to vector<1x16xf32>
      %91 = vector.broadcast %90 : vector<1x16xf32> to vector<32x16xf32>
      %92 = arith.addf %87, %91 : vector<32x16xf32>
      %93 = arith.truncf %92 : vector<32x16xf32> to vector<32x16xbf16>
      %94 = arith.index_cast %arg3 : i32 to index
      %c0_45 = arith.constant 0 : index
      %c0_46 = arith.constant 0 : index
      %95 = vector.load %arg17[%94, %c0_45, %c0_46] : memref<8x32x16xbf16, #tpu.memory_space<vmem>>, vector<1x32x16xbf16>
      %96 = vector.shape_cast %95 : vector<1x32x16xbf16> to vector<32x16xbf16>
      %97 = vector.shape_cast %93 : vector<32x16xbf16> to vector<1x32x16xbf16>
      tpu.vector_store %arg17[%94, %c0_45, %c0_46], %97 {strides = array<i32>} : memref<8x32x16xbf16, #tpu.memory_space<vmem>>, vector<1x32x16xbf16>,
      %cst_47 = arith.constant 0xFF800000 : f32
      %98 = vector.broadcast %cst_47 : f32 to vector<32x1xf32>
      %99 = arith.index_cast %arg3 : i32 to index
      %c0_48 = arith.constant 0 : index
      %c0_49 = arith.constant 0 : index
      %100 = vector.load %arg18[%99, %c0_48, %c0_49] : memref<8x32x1xf32, #tpu.memory_space<vmem>>, vector<1x32x1xf32>
      %101 = vector.shape_cast %100 : vector<1x32x1xf32> to vector<32x1xf32>
      %102 = vector.shape_cast %98 : vector<32x1xf32> to vector<1x32x1xf32>
      tpu.vector_store %arg18[%99, %c0_48, %c0_49], %102 {strides = array<i32>} : memref<8x32x1xf32, #tpu.memory_space<vmem>>, vector<1x32x1xf32>,
      %cst_50 = arith.constant 0.000000e+00 : f32
      %103 = vector.broadcast %cst_50 : f32 to vector<32x1xf32>
      %104 = arith.index_cast %arg3 : i32 to index
      %c0_51 = arith.constant 0 : index
      %c0_52 = arith.constant 0 : index
      %105 = vector.load %arg19[%104, %c0_51, %c0_52] : memref<8x32x1xf32, #tpu.memory_space<vmem>>, vector<1x32x1xf32>
      %106 = vector.shape_cast %105 : vector<1x32x1xf32> to vector<32x1xf32>
      %107 = vector.shape_cast %103 : vector<32x1xf32> to vector<1x32x1xf32>
      tpu.vector_store %arg19[%104, %c0_51, %c0_52], %107 {strides = array<i32>} : memref<8x32x1xf32, #tpu.memory_space<vmem>>, vector<1x32x1xf32>,
      %cst_53 = arith.constant 0.000000e+00 : f32
      %108 = vector.broadcast %cst_53 : f32 to vector<32x16xf32>
      %109 = arith.index_cast %arg3 : i32 to index
      %c0_54 = arith.constant 0 : index
      %c0_55 = arith.constant 0 : index
      %110 = vector.load %arg20[%109, %c0_54, %c0_55] : memref<8x32x16xf32, #tpu.memory_space<vmem>>, vector<1x32x16xf32>
      %111 = vector.shape_cast %110 : vector<1x32x16xf32> to vector<32x16xf32>
      %112 = vector.shape_cast %108 : vector<32x16xf32> to vector<1x32x16xf32>
      tpu.vector_store %arg20[%109, %c0_54, %c0_55], %112 {strides = array<i32>} : memref<8x32x16xf32, #tpu.memory_space<vmem>>, vector<1x32x16xf32>,
    } else {
    }
    %c0 = arith.constant 0 : index
    %c0_4 = arith.constant 0 : index
    %c0_5 = arith.constant 0 : index
    %8 = vector.load %arg5[%c0, %c0_4, %c0_5] : memref<1x32x128xf32, #tpu.memory_space<vmem>>, vector<1x32x128xf32>
    %9 = vector.shape_cast %8 : vector<1x32x128xf32> to vector<32x128xf32>
    %10 = arith.truncf %9 : vector<32x128xf32> to vector<32x128xbf16>
    %11 = arith.index_cast %arg3 : i32 to index
    %c0_6 = arith.constant 0 : index
    %c0_7 = arith.constant 0 : index
    %12 = vector.load %arg8[%11, %c0_6, %c0_7] : memref<8x128x16xbf16, #tpu.memory_space<vmem>>, vector<1x128x16xbf16>
    %13 = vector.shape_cast %12 : vector<1x128x16xbf16> to vector<128x16xbf16>
    %cst = arith.constant dense<0.000000e+00> : vector<32x16xf32>
    %14 = tpu.matmul %10, %13, %cst {dimension_numbers = #tpu.dot_dimension_numbers<[1], [0], [0], [1], [0, 0, 1, 1], [], []>} : vector<32x128xbf16>, vector<128x16xbf16>, vector<32x16xf32> -> vector<32x16xf32>
    %15 = arith.index_cast %arg3 : i32 to index
    %c0_8 = arith.constant 0 : index
    %c0_9 = arith.constant 0 : index
    %16 = vector.load %arg9[%15, %c0_8, %c0_9] : memref<8x1x16xf32, #tpu.memory_space<vmem>>, vector<1x1x16xf32>
    %17 = vector.shape_cast %16 : vector<1x1x16xf32> to vector<1x16xf32>
    %18 = vector.broadcast %17 : vector<1x16xf32> to vector<32x16xf32>
    %19 = arith.addf %14, %18 : vector<32x16xf32>
    %20 = arith.truncf %19 : vector<32x16xf32> to vector<32x16xbf16>
    %21 = arith.index_cast %arg3 : i32 to index
    %c0_10 = arith.constant 0 : index
    %c0_11 = arith.constant 0 : index
    %22 = vector.load %arg10[%21, %c0_10, %c0_11] : memref<8x128x16xbf16, #tpu.memory_space<vmem>>, vector<1x128x16xbf16>
    %23 = vector.shape_cast %22 : vector<1x128x16xbf16> to vector<128x16xbf16>
    %cst_12 = arith.constant dense<0.000000e+00> : vector<32x16xf32>
    %24 = tpu.matmul %10, %23, %cst_12 {dimension_numbers = #tpu.dot_dimension_numbers<[1], [0], [0], [1], [0, 0, 1, 1], [], []>} : vector<32x128xbf16>, vector<128x16xbf16>, vector<32x16xf32> -> vector<32x16xf32>
    %25 = arith.index_cast %arg3 : i32 to index
    %c0_13 = arith.constant 0 : index
    %c0_14 = arith.constant 0 : index
    %26 = vector.load %arg11[%25, %c0_13, %c0_14] : memref<8x1x16xf32, #tpu.memory_space<vmem>>, vector<1x1x16xf32>
    %27 = vector.shape_cast %26 : vector<1x1x16xf32> to vector<1x16xf32>
    %28 = vector.broadcast %27 : vector<1x16xf32> to vector<32x16xf32>
    %29 = arith.addf %24, %28 : vector<32x16xf32>
    %30 = arith.truncf %29 : vector<32x16xf32> to vector<32x16xbf16>
    %31 = arith.index_cast %arg3 : i32 to index
    %c0_15 = arith.constant 0 : index
    %c0_16 = arith.constant 0 : index
    %32 = vector.load %arg17[%31, %c0_15, %c0_16] : memref<8x32x16xbf16, #tpu.memory_space<vmem>>, vector<1x32x16xbf16>
    %33 = vector.shape_cast %32 : vector<1x32x16xbf16> to vector<32x16xbf16>
    %cst_17 = arith.constant dense<0.000000e+00> : vector<32x32xf32>
    %34 = tpu.matmul %33, %20, %cst_17 {dimension_numbers = #tpu.dot_dimension_numbers<[1], [1], [0], [0], [0, 0, 1, 0], [], []>} : vector<32x16xbf16>, vector<32x16xbf16>, vector<32x32xf32> -> vector<32x32xf32>
    %35 = arith.index_cast %arg3 : i32 to index
    %c0_18 = arith.constant 0 : index
    %c0_19 = arith.constant 0 : index
    %36 = vector.load %arg18[%35, %c0_18, %c0_19] : memref<8x32x1xf32, #tpu.memory_space<vmem>>, vector<1x32x1xf32>
    %37 = vector.shape_cast %36 : vector<1x32x1xf32> to vector<32x1xf32>
    %cst_20 = arith.constant dense<0xFF800000> : vector<32xf32>
    %38 = vector.multi_reduction <maximumf>, %34, %cst_20 [1] : vector<32x32xf32> to vector<32xf32>
    %39 = vector.shape_cast %38 : vector<32xf32> to vector<32x1xf32>
    %40 = arith.maximumf %37, %39 : vector<32x1xf32>
    %41 = arith.subf %37, %40 : vector<32x1xf32>
    %42 = math.exp %41 : vector<32x1xf32>
    %43 = vector.broadcast %40 : vector<32x1xf32> to vector<32x32xf32>
    %44 = arith.subf %34, %43 : vector<32x32xf32>
    %45 = math.exp %44 : vector<32x32xf32>
    %46 = arith.index_cast %arg3 : i32 to index
    %c0_21 = arith.constant 0 : index
    %c0_22 = arith.constant 0 : index
    %47 = vector.load %arg19[%46, %c0_21, %c0_22] : memref<8x32x1xf32, #tpu.memory_space<vmem>>, vector<1x32x1xf32>
    %48 = vector.shape_cast %47 : vector<1x32x1xf32> to vector<32x1xf32>
    %49 = arith.mulf %42, %48 : vector<32x1xf32>
    %cst_23 = arith.constant dense<0.000000e+00> : vector<32xf32>
    %50 = vector.multi_reduction <add>, %45, %cst_23 [1] : vector<32x32xf32> to vector<32xf32>
    %51 = vector.shape_cast %50 : vector<32xf32> to vector<32x1xf32>
    %52 = arith.addf %49, %51 : vector<32x1xf32>
    %53 = arith.index_cast %arg3 : i32 to index
    %c0_24 = arith.constant 0 : index
    %c0_25 = arith.constant 0 : index
    %54 = vector.load %arg19[%53, %c0_24, %c0_25] : memref<8x32x1xf32, #tpu.memory_space<vmem>>, vector<1x32x1xf32>
    %55 = vector.shape_cast %54 : vector<1x32x1xf32> to vector<32x1xf32>
    %56 = vector.shape_cast %52 : vector<32x1xf32> to vector<1x32x1xf32>
    tpu.vector_store %arg19[%53, %c0_24, %c0_25], %56 {strides = array<i32>} : memref<8x32x1xf32, #tpu.memory_space<vmem>>, vector<1x32x1xf32>,
    %57 = arith.index_cast %arg3 : i32 to index
    %c0_26 = arith.constant 0 : index
    %c0_27 = arith.constant 0 : index
    %58 = vector.load %arg20[%57, %c0_26, %c0_27] : memref<8x32x16xf32, #tpu.memory_space<vmem>>, vector<1x32x16xf32>
    %59 = vector.shape_cast %58 : vector<1x32x16xf32> to vector<32x16xf32>
    %60 = vector.broadcast %42 : vector<32x1xf32> to vector<32x16xf32>
    %61 = arith.mulf %60, %59 : vector<32x16xf32>
    %62 = arith.truncf %45 : vector<32x32xf32> to vector<32x32xbf16>
    %cst_28 = arith.constant dense<0.000000e+00> : vector<32x16xf32>
    %63 = tpu.matmul %62, %30, %cst_28 {dimension_numbers = #tpu.dot_dimension_numbers<[1], [0], [0], [1], [0, 0, 1, 1], [], []>} : vector<32x32xbf16>, vector<32x16xbf16>, vector<32x16xf32> -> vector<32x16xf32>
    %64 = arith.addf %61, %63 : vector<32x16xf32>
    %65 = arith.index_cast %arg3 : i32 to index
    %c0_29 = arith.constant 0 : index
    %c0_30 = arith.constant 0 : index
    %66 = vector.load %arg20[%65, %c0_29, %c0_30] : memref<8x32x16xf32, #tpu.memory_space<vmem>>, vector<1x32x16xf32>
    %67 = vector.shape_cast %66 : vector<1x32x16xf32> to vector<32x16xf32>
    %68 = vector.shape_cast %64 : vector<32x16xf32> to vector<1x32x16xf32>
    tpu.vector_store %arg20[%65, %c0_29, %c0_30], %68 {strides = array<i32>} : memref<8x32x16xf32, #tpu.memory_space<vmem>>, vector<1x32x16xf32>,
    %69 = arith.index_cast %arg3 : i32 to index
    %c0_31 = arith.constant 0 : index
    %c0_32 = arith.constant 0 : index
    %70 = vector.load %arg18[%69, %c0_31, %c0_32] : memref<8x32x1xf32, #tpu.memory_space<vmem>>, vector<1x32x1xf32>
    %71 = vector.shape_cast %70 : vector<1x32x1xf32> to vector<32x1xf32>
    %72 = vector.shape_cast %40 : vector<32x1xf32> to vector<1x32x1xf32>
    tpu.vector_store %arg18[%69, %c0_31, %c0_32], %72 {strides = array<i32>} : memref<8x32x1xf32, #tpu.memory_space<vmem>>, vector<1x32x1xf32>,
    %c0_i32_33 = arith.constant 0 : i32
    %73 = arith.cmpi eq, %arg2, %c0_i32_33 : i32
    %74 = arith.extui %73 : i1 to i32
    %c0_i32_34 = arith.constant 0 : i32
    %75 = arith.cmpi ne, %74, %c0_i32_34 : i32
    scf.if %75 {
      %81 = arith.index_cast %arg3 : i32 to index
      %c0_37 = arith.constant 0 : index
      %c0_38 = arith.constant 0 : index
      %82 = vector.load %arg20[%81, %c0_37, %c0_38] : memref<8x32x16xf32, #tpu.memory_space<vmem>>, vector<1x32x16xf32>
      %83 = vector.shape_cast %82 : vector<1x32x16xf32> to vector<32x16xf32>
      %84 = arith.index_cast %arg3 : i32 to index
      %c0_39 = arith.constant 0 : index
      %c0_40 = arith.constant 0 : index
      %85 = vector.load %arg19[%84, %c0_39, %c0_40] : memref<8x32x1xf32, #tpu.memory_space<vmem>>, vector<1x32x1xf32>
      %86 = vector.shape_cast %85 : vector<1x32x1xf32> to vector<32x1xf32>
      %87 = vector.broadcast %86 : vector<32x1xf32> to vector<32x16xf32>
      %88 = arith.divf %83, %87 : vector<32x16xf32>
      %89 = arith.truncf %88 : vector<32x16xf32> to vector<32x16xbf16>
      %c0_41 = arith.constant 0 : index
      %c0_42 = arith.constant 0 : index
      %90 = vector.load %arg21[%c0_41, %c0_42] : memref<32x128xf32, #tpu.memory_space<vmem>>, vector<32x128xf32>
      %91 = arith.index_cast %arg3 : i32 to index
      %c0_43 = arith.constant 0 : index
      %c0_44 = arith.constant 0 : index
      %92 = vector.load %arg12[%91, %c0_43, %c0_44] : memref<8x16x128xbf16, #tpu.memory_space<vmem>>, vector<1x16x128xbf16>
      %93 = vector.shape_cast %92 : vector<1x16x128xbf16> to vector<16x128xbf16>
      %cst_45 = arith.constant dense<0.000000e+00> : vector<32x128xf32>
      %94 = tpu.matmul %89, %93, %cst_45 {dimension_numbers = #tpu.dot_dimension_numbers<[1], [0], [0], [1], [0, 0, 1, 1], [], []>} : vector<32x16xbf16>, vector<16x128xbf16>, vector<32x128xf32> -> vector<32x128xf32>
      %95 = arith.addf %90, %94 : vector<32x128xf32>
      %c0_46 = arith.constant 0 : index
      %c0_47 = arith.constant 0 : index
      %96 = vector.load %arg21[%c0_46, %c0_47] : memref<32x128xf32, #tpu.memory_space<vmem>>, vector<32x128xf32>
      tpu.vector_store %arg21[%c0_46, %c0_47], %95 {strides = array<i32>} : memref<32x128xf32, #tpu.memory_space<vmem>>, vector<32x128xf32>,
    } else {
    }
    %c0_i32_35 = arith.constant 0 : i32
    %76 = arith.cmpi eq, %arg2, %c0_i32_35 : i32
    %c7_i32 = arith.constant 7 : i32
    %77 = arith.cmpi eq, %arg3, %c7_i32 : i32
    %78 = arith.andi %76, %77 : i1
    %79 = arith.extui %78 : i1 to i32
    %c0_i32_36 = arith.constant 0 : i32
    %80 = arith.cmpi ne, %79, %c0_i32_36 : i32
    scf.if %80 {
      %c0_37 = arith.constant 0 : index
      %c0_38 = arith.constant 0 : index
      %c0_39 = arith.constant 0 : index
      %81 = vector.load %arg4[%c0_37, %c0_38, %c0_39] : memref<1x32x128xf32, #tpu.memory_space<vmem>>, vector<1x32x128xf32>
      %82 = vector.shape_cast %81 : vector<1x32x128xf32> to vector<32x128xf32>
      %c0_40 = arith.constant 0 : index
      %c0_41 = arith.constant 0 : index
      %83 = vector.load %arg21[%c0_40, %c0_41] : memref<32x128xf32, #tpu.memory_space<vmem>>, vector<32x128xf32>
      %84 = arith.addf %82, %83 : vector<32x128xf32>
      %c0_42 = arith.constant 0 : index
      %c0_43 = arith.constant 0 : index
      %85 = vector.load %arg13[%c0_42, %c0_43] : memref<1x128xf32, #tpu.memory_space<vmem>>, vector<1x128xf32>
      %86 = vector.broadcast %85 : vector<1x128xf32> to vector<32x128xf32>
      %87 = arith.addf %84, %86 : vector<32x128xf32>
      %cst_44 = arith.constant dense<0.000000e+00> : vector<32xf32>
      %88 = vector.multi_reduction <add>, %87, %cst_44 [1] : vector<32x128xf32> to vector<32xf32>
      %89 = vector.shape_cast %88 : vector<32xf32> to vector<32x1xf32>
      %cst_45 = arith.constant 1.280000e+02 : f32
      %90 = vector.broadcast %cst_45 : f32 to vector<32x1xf32>
      %91 = arith.divf %89, %90 : vector<32x1xf32>
      %92 = arith.mulf %87, %87 : vector<32x128xf32>
      %cst_46 = arith.constant dense<0.000000e+00> : vector<32xf32>
      %93 = vector.multi_reduction <add>, %92, %cst_46 [1] : vector<32x128xf32> to vector<32xf32>
      %94 = vector.shape_cast %93 : vector<32xf32> to vector<32x1xf32>
      %cst_47 = arith.constant 1.280000e+02 : f32
      %95 = vector.broadcast %cst_47 : f32 to vector<32x1xf32>
      %96 = arith.divf %94, %95 : vector<32x1xf32>
      %97 = arith.mulf %91, %91 : vector<32x1xf32>
      %98 = arith.subf %96, %97 : vector<32x1xf32>
      %99 = vector.broadcast %91 : vector<32x1xf32> to vector<32x128xf32>
      %100 = arith.subf %87, %99 : vector<32x128xf32>
      %cst_48 = arith.constant 9.99999974E-6 : f32
      %101 = vector.broadcast %cst_48 : f32 to vector<32x1xf32>
      %102 = arith.addf %98, %101 : vector<32x1xf32>
      %103 = math.rsqrt %102 : vector<32x1xf32>
      %104 = vector.broadcast %103 : vector<32x1xf32> to vector<32x128xf32>
      %105 = arith.mulf %100, %104 : vector<32x128xf32>
      %c0_49 = arith.constant 0 : index
      %c0_50 = arith.constant 0 : index
      %106 = vector.load %arg14[%c0_49, %c0_50] : memref<1x128xf32, #tpu.memory_space<vmem>>, vector<1x128xf32>
      %107 = vector.broadcast %106 : vector<1x128xf32> to vector<32x128xf32>
      %108 = arith.mulf %105, %107 : vector<32x128xf32>
      %c0_51 = arith.constant 0 : index
      %c0_52 = arith.constant 0 : index
      %109 = vector.load %arg15[%c0_51, %c0_52] : memref<1x128xf32, #tpu.memory_space<vmem>>, vector<1x128xf32>
      %110 = vector.broadcast %109 : vector<1x128xf32> to vector<32x128xf32>
      %111 = arith.addf %108, %110 : vector<32x128xf32>
      %c0_53 = arith.constant 0 : index
      %c0_54 = arith.constant 0 : index
      %c0_55 = arith.constant 0 : index
      %112 = vector.load %arg16[%c0_53, %c0_54, %c0_55] : memref<1x32x128xf32, #tpu.memory_space<vmem>>, vector<1x32x128xf32>
      %113 = vector.shape_cast %112 : vector<1x32x128xf32> to vector<32x128xf32>
      %114 = vector.shape_cast %111 : vector<32x128xf32> to vector<1x32x128xf32>
      tpu.vector_store %arg16[%c0_53, %c0_54, %c0_55], %114 {strides = array<i32>} : memref<1x32x128xf32, #tpu.memory_space<vmem>>, vector<1x32x128xf32>,
    } else {
    }
    return
  }
  func.func @transform_0(%arg0: i32, %arg1: i32, %arg2: i32, %arg3: i32) -> (i32, i32, i32) {
    %c0_i32 = arith.constant 0 : i32
    %c0_i32_0 = arith.constant 0 : i32
    return %arg0, %arg1, %c0_i32 : i32, i32, i32
  }
  func.func @transform_1(%arg0: i32, %arg1: i32, %arg2: i32, %arg3: i32) -> (i32, i32, i32) {
    %c0_i32 = arith.constant 0 : i32
    %c0_i32_0 = arith.constant 0 : i32
    return %arg0, %arg2, %c0_i32 : i32, i32, i32
  }
  func.func @transform_2(%arg0: i32, %arg1: i32, %arg2: i32, %arg3: i32) -> (i32, i32, i32) {
    %c0_i32 = arith.constant 0 : i32
    %c0_i32_0 = arith.constant 0 : i32
    %c0_i32_1 = arith.constant 0 : i32
    %c0_i32_2 = arith.constant 0 : i32
    return %c0_i32, %c0_i32_0, %c0_i32_1 : i32, i32, i32
  }
  func.func @transform_3(%arg0: i32, %arg1: i32, %arg2: i32, %arg3: i32) -> (i32, i32, i32) {
    %c0_i32 = arith.constant 0 : i32
    %c0_i32_0 = arith.constant 0 : i32
    %c0_i32_1 = arith.constant 0 : i32
    %c0_i32_2 = arith.constant 0 : i32
    return %c0_i32, %c0_i32_0, %c0_i32_1 : i32, i32, i32
  }
  func.func @transform_4(%arg0: i32, %arg1: i32, %arg2: i32, %arg3: i32) -> (i32, i32, i32) {
    %c0_i32 = arith.constant 0 : i32
    %c0_i32_0 = arith.constant 0 : i32
    %c0_i32_1 = arith.constant 0 : i32
    %c0_i32_2 = arith.constant 0 : i32
    return %c0_i32, %c0_i32_0, %c0_i32_1 : i32, i32, i32
  }
  func.func @transform_5(%arg0: i32, %arg1: i32, %arg2: i32, %arg3: i32) -> (i32, i32, i32) {
    %c0_i32 = arith.constant 0 : i32
    %c0_i32_0 = arith.constant 0 : i32
    %c0_i32_1 = arith.constant 0 : i32
    %c0_i32_2 = arith.constant 0 : i32
    return %c0_i32, %c0_i32_0, %c0_i32_1 : i32, i32, i32
  }
  func.func @transform_6(%arg0: i32, %arg1: i32, %arg2: i32, %arg3: i32) -> (i32, i32, i32) {
    %c0_i32 = arith.constant 0 : i32
    %c0_i32_0 = arith.constant 0 : i32
    %c0_i32_1 = arith.constant 0 : i32
    %c0_i32_2 = arith.constant 0 : i32
    return %c0_i32, %c0_i32_0, %c0_i32_1 : i32, i32, i32
  }
  func.func @transform_7(%arg0: i32, %arg1: i32, %arg2: i32, %arg3: i32) -> (i32, i32, i32) {
    %c0_i32 = arith.constant 0 : i32
    %c0_i32_0 = arith.constant 0 : i32
    %c0_i32_1 = arith.constant 0 : i32
    %c0_i32_2 = arith.constant 0 : i32
    return %c0_i32, %c0_i32_0, %c0_i32_1 : i32, i32, i32
  }
  func.func @transform_8(%arg0: i32, %arg1: i32, %arg2: i32, %arg3: i32) -> (i32, i32, i32) {
    %c0_i32 = arith.constant 0 : i32
    %c0_i32_0 = arith.constant 0 : i32
    %c0_i32_1 = arith.constant 0 : i32
    %c0_i32_2 = arith.constant 0 : i32
    return %c0_i32, %c0_i32_0, %c0_i32_1 : i32, i32, i32
  }
  func.func @transform_9(%arg0: i32, %arg1: i32, %arg2: i32, %arg3: i32) -> (i32, i32) {
    %c0_i32 = arith.constant 0 : i32
    %c0_i32_0 = arith.constant 0 : i32
    %c0_i32_1 = arith.constant 0 : i32
    return %c0_i32, %c0_i32_0 : i32, i32
  }
  func.func @transform_10(%arg0: i32, %arg1: i32, %arg2: i32, %arg3: i32) -> (i32, i32) {
    %c0_i32 = arith.constant 0 : i32
    %c0_i32_0 = arith.constant 0 : i32
    %c0_i32_1 = arith.constant 0 : i32
    return %c0_i32, %c0_i32_0 : i32, i32
  }
  func.func @transform_11(%arg0: i32, %arg1: i32, %arg2: i32, %arg3: i32) -> (i32, i32) {
    %c0_i32 = arith.constant 0 : i32
    %c0_i32_0 = arith.constant 0 : i32
    %c0_i32_1 = arith.constant 0 : i32
    return %c0_i32, %c0_i32_0 : i32, i32
  }
  func.func @transform_12(%arg0: i32, %arg1: i32, %arg2: i32, %arg3: i32) -> (i32, i32, i32) {
    %c0_i32 = arith.constant 0 : i32
    %c0_i32_0 = arith.constant 0 : i32
    return %arg0, %arg1, %c0_i32 : i32, i32, i32
  }
}

module attributes {stable_mosaic.version = 11 : i64} {
  func.func @kernel(%arg0: i32, %arg1: i32, %arg2: i32, %arg3: i32, %arg4: memref<1x32x128xf32, #tpu.memory_space<vmem>>, %arg5: memref<1x128x128xbf16, #tpu.memory_space<vmem>>, %arg6: memref<8x128x16xbf16, #tpu.memory_space<vmem>>, %arg7: memref<8x1x16xf32, #tpu.memory_space<vmem>>, %arg8: memref<8x128x16xbf16, #tpu.memory_space<vmem>>, %arg9: memref<8x1x16xf32, #tpu.memory_space<vmem>>, %arg10: memref<8x128x16xbf16, #tpu.memory_space<vmem>>, %arg11: memref<8x1x16xf32, #tpu.memory_space<vmem>>, %arg12: memref<8x16x128xbf16, #tpu.memory_space<vmem>>, %arg13: memref<1x128xf32, #tpu.memory_space<vmem>>, %arg14: memref<1x128xf32, #tpu.memory_space<vmem>>, %arg15: memref<1x128xf32, #tpu.memory_space<vmem>>, %arg16: memref<1x32x128xf32, #tpu.memory_space<vmem>>, %arg17: memref<8x32x16xbf16, #tpu.memory_space<vmem>>, %arg18: memref<8x32x1xf32, #tpu.memory_space<vmem>>, %arg19: memref<8x32x1xf32, #tpu.memory_space<vmem>>, %arg20: memref<8x32x16xf32, #tpu.memory_space<vmem>>, %arg21: memref<32x128xf32, #tpu.memory_space<vmem>>) attributes {dimension_semantics = [#tpu.dimension_semantics<parallel>, #tpu.dimension_semantics<parallel>, #tpu.dimension_semantics<arbitrary>, #tpu.dimension_semantics<arbitrary>], iteration_bounds = array<i64: 2, 1, 1, 8>, scalar_prefetch = 0 : i64, scratch_operands = 5 : i64, tpu.core_type = #tpu.core_type<tc>, window_params = [{transform_indices = @transform_0, window_bounds = array<i64: 1, 32, 128>}, {transform_indices = @transform_1, window_bounds = array<i64: 1, 128, 128>}, {pipeline_mode = #tpu.pipeline_mode<synchronous>, transform_indices = @transform_2, window_bounds = array<i64: 8, 128, 16>}, {pipeline_mode = #tpu.pipeline_mode<synchronous>, transform_indices = @transform_3, window_bounds = array<i64: 8, 1, 16>}, {pipeline_mode = #tpu.pipeline_mode<synchronous>, transform_indices = @transform_4, window_bounds = array<i64: 8, 128, 16>}, {pipeline_mode = #tpu.pipeline_mode<synchronous>, transform_indices = @transform_5, window_bounds = array<i64: 8, 1, 16>}, {pipeline_mode = #tpu.pipeline_mode<synchronous>, transform_indices = @transform_6, window_bounds = array<i64: 8, 128, 16>}, {pipeline_mode = #tpu.pipeline_mode<synchronous>, transform_indices = @transform_7, window_bounds = array<i64: 8, 1, 16>}, {pipeline_mode = #tpu.pipeline_mode<synchronous>, transform_indices = @transform_8, window_bounds = array<i64: 8, 16, 128>}, {pipeline_mode = #tpu.pipeline_mode<synchronous>, transform_indices = @transform_9, window_bounds = array<i64: 1, 128>}, {pipeline_mode = #tpu.pipeline_mode<synchronous>, transform_indices = @transform_10, window_bounds = array<i64: 1, 128>}, {pipeline_mode = #tpu.pipeline_mode<synchronous>, transform_indices = @transform_11, window_bounds = array<i64: 1, 128>}, {transform_indices = @transform_12, window_bounds = array<i64: 1, 32, 128>}]} {
    %c0_i32 = arith.constant 0 : i32
    %0 = arith.cmpi eq, %arg2, %c0_i32 : i32
    %c0_i32_0 = arith.constant 0 : i32
    %1 = arith.cmpi eq, %arg3, %c0_i32_0 : i32
    %2 = arith.andi %0, %1 : i1
    %3 = arith.extui %2 : i1 to i32
    %c0_i32_1 = arith.constant 0 : i32
    %4 = arith.cmpi ne, %3, %c0_i32_1 : i32
    scf.if %4 {
      %cst_37 = arith.constant 0.000000e+00 : f32
      %80 = vector.broadcast %cst_37 : f32 to vector<32x128xf32>
      %c0_38 = arith.constant 0 : index
      %c0_39 = arith.constant 0 : index
      %81 = vector.load %arg21[%c0_38, %c0_39] : memref<32x128xf32, #tpu.memory_space<vmem>>, vector<32x128xf32>
      tpu.vector_store %arg21[%c0_38, %c0_39], %80 {strides = array<i32>} : memref<32x128xf32, #tpu.memory_space<vmem>>, vector<32x128xf32>,
    } else {
    }
    %c0_i32_2 = arith.constant 0 : i32
    %5 = arith.cmpi eq, %arg2, %c0_i32_2 : i32
    %6 = arith.extui %5 : i1 to i32
    %c0_i32_3 = arith.constant 0 : i32
    %7 = arith.cmpi ne, %6, %c0_i32_3 : i32
    scf.if %7 {
      %c0_37 = arith.constant 0 : index
      %c0_38 = arith.constant 0 : index
      %c0_39 = arith.constant 0 : index
      %80 = vector.load %arg4[%c0_37, %c0_38, %c0_39] : memref<1x32x128xf32, #tpu.memory_space<vmem>>, vector<1x32x128xf32>
      %81 = vector.shape_cast %80 : vector<1x32x128xf32> to vector<32x128xf32>
      %82 = arith.truncf %81 : vector<32x128xf32> to vector<32x128xbf16>
      %83 = arith.index_cast %arg3 : i32 to index
      %c0_40 = arith.constant 0 : index
      %c0_41 = arith.constant 0 : index
      %84 = vector.load %arg6[%83, %c0_40, %c0_41] : memref<8x128x16xbf16, #tpu.memory_space<vmem>>, vector<1x128x16xbf16>
      %85 = vector.shape_cast %84 : vector<1x128x16xbf16> to vector<128x16xbf16>
      %cst_42 = arith.constant dense<0.000000e+00> : vector<32x16xf32>
      %86 = tpu.matmul %82, %85, %cst_42 {dimension_numbers = #tpu.dot_dimension_numbers<[1], [0], [0], [1], [0, 0, 1, 1], [], []>} : vector<32x128xbf16>, vector<128x16xbf16>, vector<32x16xf32> -> vector<32x16xf32>
      %87 = arith.index_cast %arg3 : i32 to index
      %c0_43 = arith.constant 0 : index
      %c0_44 = arith.constant 0 : index
      %88 = vector.load %arg7[%87, %c0_43, %c0_44] : memref<8x1x16xf32, #tpu.memory_space<vmem>>, vector<1x1x16xf32>
      %89 = vector.shape_cast %88 : vector<1x1x16xf32> to vector<1x16xf32>
      %90 = vector.broadcast %89 : vector<1x16xf32> to vector<32x16xf32>
      %91 = arith.addf %86, %90 : vector<32x16xf32>
      %92 = arith.truncf %91 : vector<32x16xf32> to vector<32x16xbf16>
      %93 = arith.index_cast %arg3 : i32 to index
      %c0_45 = arith.constant 0 : index
      %c0_46 = arith.constant 0 : index
      %94 = vector.load %arg17[%93, %c0_45, %c0_46] : memref<8x32x16xbf16, #tpu.memory_space<vmem>>, vector<1x32x16xbf16>
      %95 = vector.shape_cast %94 : vector<1x32x16xbf16> to vector<32x16xbf16>
      %96 = vector.shape_cast %92 : vector<32x16xbf16> to vector<1x32x16xbf16>
      tpu.vector_store %arg17[%93, %c0_45, %c0_46], %96 {strides = array<i32>} : memref<8x32x16xbf16, #tpu.memory_space<vmem>>, vector<1x32x16xbf16>,
      %cst_47 = arith.constant 0xFF800000 : f32
      %97 = vector.broadcast %cst_47 : f32 to vector<32x1xf32>
      %98 = arith.index_cast %arg3 : i32 to index
      %c0_48 = arith.constant 0 : index
      %c0_49 = arith.constant 0 : index
      %99 = vector.load %arg18[%98, %c0_48, %c0_49] : memref<8x32x1xf32, #tpu.memory_space<vmem>>, vector<1x32x1xf32>
      %100 = vector.shape_cast %99 : vector<1x32x1xf32> to vector<32x1xf32>
      %101 = vector.shape_cast %97 : vector<32x1xf32> to vector<1x32x1xf32>
      tpu.vector_store %arg18[%98, %c0_48, %c0_49], %101 {strides = array<i32>} : memref<8x32x1xf32, #tpu.memory_space<vmem>>, vector<1x32x1xf32>,
      %cst_50 = arith.constant 0.000000e+00 : f32
      %102 = vector.broadcast %cst_50 : f32 to vector<32x1xf32>
      %103 = arith.index_cast %arg3 : i32 to index
      %c0_51 = arith.constant 0 : index
      %c0_52 = arith.constant 0 : index
      %104 = vector.load %arg19[%103, %c0_51, %c0_52] : memref<8x32x1xf32, #tpu.memory_space<vmem>>, vector<1x32x1xf32>
      %105 = vector.shape_cast %104 : vector<1x32x1xf32> to vector<32x1xf32>
      %106 = vector.shape_cast %102 : vector<32x1xf32> to vector<1x32x1xf32>
      tpu.vector_store %arg19[%103, %c0_51, %c0_52], %106 {strides = array<i32>} : memref<8x32x1xf32, #tpu.memory_space<vmem>>, vector<1x32x1xf32>,
      %cst_53 = arith.constant 0.000000e+00 : f32
      %107 = vector.broadcast %cst_53 : f32 to vector<32x16xf32>
      %108 = arith.index_cast %arg3 : i32 to index
      %c0_54 = arith.constant 0 : index
      %c0_55 = arith.constant 0 : index
      %109 = vector.load %arg20[%108, %c0_54, %c0_55] : memref<8x32x16xf32, #tpu.memory_space<vmem>>, vector<1x32x16xf32>
      %110 = vector.shape_cast %109 : vector<1x32x16xf32> to vector<32x16xf32>
      %111 = vector.shape_cast %107 : vector<32x16xf32> to vector<1x32x16xf32>
      tpu.vector_store %arg20[%108, %c0_54, %c0_55], %111 {strides = array<i32>} : memref<8x32x16xf32, #tpu.memory_space<vmem>>, vector<1x32x16xf32>,
    } else {
    }
    %c0 = arith.constant 0 : index
    %c0_4 = arith.constant 0 : index
    %c0_5 = arith.constant 0 : index
    %8 = vector.load %arg5[%c0, %c0_4, %c0_5] : memref<1x128x128xbf16, #tpu.memory_space<vmem>>, vector<1x128x128xbf16>
    %9 = vector.shape_cast %8 : vector<1x128x128xbf16> to vector<128x128xbf16>
    %10 = arith.index_cast %arg3 : i32 to index
    %c0_6 = arith.constant 0 : index
    %c0_7 = arith.constant 0 : index
    %11 = vector.load %arg8[%10, %c0_6, %c0_7] : memref<8x128x16xbf16, #tpu.memory_space<vmem>>, vector<1x128x16xbf16>
    %12 = vector.shape_cast %11 : vector<1x128x16xbf16> to vector<128x16xbf16>
    %cst = arith.constant dense<0.000000e+00> : vector<128x16xf32>
    %13 = tpu.matmul %9, %12, %cst {dimension_numbers = #tpu.dot_dimension_numbers<[1], [0], [0], [1], [0, 0, 1, 1], [], []>} : vector<128x128xbf16>, vector<128x16xbf16>, vector<128x16xf32> -> vector<128x16xf32>
    %14 = arith.index_cast %arg3 : i32 to index
    %c0_8 = arith.constant 0 : index
    %c0_9 = arith.constant 0 : index
    %15 = vector.load %arg9[%14, %c0_8, %c0_9] : memref<8x1x16xf32, #tpu.memory_space<vmem>>, vector<1x1x16xf32>
    %16 = vector.shape_cast %15 : vector<1x1x16xf32> to vector<1x16xf32>
    %17 = vector.broadcast %16 : vector<1x16xf32> to vector<128x16xf32>
    %18 = arith.addf %13, %17 : vector<128x16xf32>
    %19 = arith.truncf %18 : vector<128x16xf32> to vector<128x16xbf16>
    %20 = arith.index_cast %arg3 : i32 to index
    %c0_10 = arith.constant 0 : index
    %c0_11 = arith.constant 0 : index
    %21 = vector.load %arg10[%20, %c0_10, %c0_11] : memref<8x128x16xbf16, #tpu.memory_space<vmem>>, vector<1x128x16xbf16>
    %22 = vector.shape_cast %21 : vector<1x128x16xbf16> to vector<128x16xbf16>
    %cst_12 = arith.constant dense<0.000000e+00> : vector<128x16xf32>
    %23 = tpu.matmul %9, %22, %cst_12 {dimension_numbers = #tpu.dot_dimension_numbers<[1], [0], [0], [1], [0, 0, 1, 1], [], []>} : vector<128x128xbf16>, vector<128x16xbf16>, vector<128x16xf32> -> vector<128x16xf32>
    %24 = arith.index_cast %arg3 : i32 to index
    %c0_13 = arith.constant 0 : index
    %c0_14 = arith.constant 0 : index
    %25 = vector.load %arg11[%24, %c0_13, %c0_14] : memref<8x1x16xf32, #tpu.memory_space<vmem>>, vector<1x1x16xf32>
    %26 = vector.shape_cast %25 : vector<1x1x16xf32> to vector<1x16xf32>
    %27 = vector.broadcast %26 : vector<1x16xf32> to vector<128x16xf32>
    %28 = arith.addf %23, %27 : vector<128x16xf32>
    %29 = arith.truncf %28 : vector<128x16xf32> to vector<128x16xbf16>
    %30 = arith.index_cast %arg3 : i32 to index
    %c0_15 = arith.constant 0 : index
    %c0_16 = arith.constant 0 : index
    %31 = vector.load %arg17[%30, %c0_15, %c0_16] : memref<8x32x16xbf16, #tpu.memory_space<vmem>>, vector<1x32x16xbf16>
    %32 = vector.shape_cast %31 : vector<1x32x16xbf16> to vector<32x16xbf16>
    %cst_17 = arith.constant dense<0.000000e+00> : vector<32x128xf32>
    %33 = tpu.matmul %32, %19, %cst_17 {dimension_numbers = #tpu.dot_dimension_numbers<[1], [1], [0], [0], [0, 0, 1, 0], [], []>} : vector<32x16xbf16>, vector<128x16xbf16>, vector<32x128xf32> -> vector<32x128xf32>
    %34 = arith.index_cast %arg3 : i32 to index
    %c0_18 = arith.constant 0 : index
    %c0_19 = arith.constant 0 : index
    %35 = vector.load %arg18[%34, %c0_18, %c0_19] : memref<8x32x1xf32, #tpu.memory_space<vmem>>, vector<1x32x1xf32>
    %36 = vector.shape_cast %35 : vector<1x32x1xf32> to vector<32x1xf32>
    %cst_20 = arith.constant dense<0xFF800000> : vector<32xf32>
    %37 = vector.multi_reduction <maximumf>, %33, %cst_20 [1] : vector<32x128xf32> to vector<32xf32>
    %38 = vector.shape_cast %37 : vector<32xf32> to vector<32x1xf32>
    %39 = arith.maximumf %36, %38 : vector<32x1xf32>
    %40 = arith.subf %36, %39 : vector<32x1xf32>
    %41 = math.exp %40 : vector<32x1xf32>
    %42 = vector.broadcast %39 : vector<32x1xf32> to vector<32x128xf32>
    %43 = arith.subf %33, %42 : vector<32x128xf32>
    %44 = math.exp %43 : vector<32x128xf32>
    %45 = arith.index_cast %arg3 : i32 to index
    %c0_21 = arith.constant 0 : index
    %c0_22 = arith.constant 0 : index
    %46 = vector.load %arg19[%45, %c0_21, %c0_22] : memref<8x32x1xf32, #tpu.memory_space<vmem>>, vector<1x32x1xf32>
    %47 = vector.shape_cast %46 : vector<1x32x1xf32> to vector<32x1xf32>
    %48 = arith.mulf %41, %47 : vector<32x1xf32>
    %cst_23 = arith.constant dense<0.000000e+00> : vector<32xf32>
    %49 = vector.multi_reduction <add>, %44, %cst_23 [1] : vector<32x128xf32> to vector<32xf32>
    %50 = vector.shape_cast %49 : vector<32xf32> to vector<32x1xf32>
    %51 = arith.addf %48, %50 : vector<32x1xf32>
    %52 = arith.index_cast %arg3 : i32 to index
    %c0_24 = arith.constant 0 : index
    %c0_25 = arith.constant 0 : index
    %53 = vector.load %arg19[%52, %c0_24, %c0_25] : memref<8x32x1xf32, #tpu.memory_space<vmem>>, vector<1x32x1xf32>
    %54 = vector.shape_cast %53 : vector<1x32x1xf32> to vector<32x1xf32>
    %55 = vector.shape_cast %51 : vector<32x1xf32> to vector<1x32x1xf32>
    tpu.vector_store %arg19[%52, %c0_24, %c0_25], %55 {strides = array<i32>} : memref<8x32x1xf32, #tpu.memory_space<vmem>>, vector<1x32x1xf32>,
    %56 = arith.index_cast %arg3 : i32 to index
    %c0_26 = arith.constant 0 : index
    %c0_27 = arith.constant 0 : index
    %57 = vector.load %arg20[%56, %c0_26, %c0_27] : memref<8x32x16xf32, #tpu.memory_space<vmem>>, vector<1x32x16xf32>
    %58 = vector.shape_cast %57 : vector<1x32x16xf32> to vector<32x16xf32>
    %59 = vector.broadcast %41 : vector<32x1xf32> to vector<32x16xf32>
    %60 = arith.mulf %59, %58 : vector<32x16xf32>
    %61 = arith.truncf %44 : vector<32x128xf32> to vector<32x128xbf16>
    %cst_28 = arith.constant dense<0.000000e+00> : vector<32x16xf32>
    %62 = tpu.matmul %61, %29, %cst_28 {dimension_numbers = #tpu.dot_dimension_numbers<[1], [0], [0], [1], [0, 0, 1, 1], [], []>} : vector<32x128xbf16>, vector<128x16xbf16>, vector<32x16xf32> -> vector<32x16xf32>
    %63 = arith.addf %60, %62 : vector<32x16xf32>
    %64 = arith.index_cast %arg3 : i32 to index
    %c0_29 = arith.constant 0 : index
    %c0_30 = arith.constant 0 : index
    %65 = vector.load %arg20[%64, %c0_29, %c0_30] : memref<8x32x16xf32, #tpu.memory_space<vmem>>, vector<1x32x16xf32>
    %66 = vector.shape_cast %65 : vector<1x32x16xf32> to vector<32x16xf32>
    %67 = vector.shape_cast %63 : vector<32x16xf32> to vector<1x32x16xf32>
    tpu.vector_store %arg20[%64, %c0_29, %c0_30], %67 {strides = array<i32>} : memref<8x32x16xf32, #tpu.memory_space<vmem>>, vector<1x32x16xf32>,
    %68 = arith.index_cast %arg3 : i32 to index
    %c0_31 = arith.constant 0 : index
    %c0_32 = arith.constant 0 : index
    %69 = vector.load %arg18[%68, %c0_31, %c0_32] : memref<8x32x1xf32, #tpu.memory_space<vmem>>, vector<1x32x1xf32>
    %70 = vector.shape_cast %69 : vector<1x32x1xf32> to vector<32x1xf32>
    %71 = vector.shape_cast %39 : vector<32x1xf32> to vector<1x32x1xf32>
    tpu.vector_store %arg18[%68, %c0_31, %c0_32], %71 {strides = array<i32>} : memref<8x32x1xf32, #tpu.memory_space<vmem>>, vector<1x32x1xf32>,
    %c0_i32_33 = arith.constant 0 : i32
    %72 = arith.cmpi eq, %arg2, %c0_i32_33 : i32
    %73 = arith.extui %72 : i1 to i32
    %c0_i32_34 = arith.constant 0 : i32
    %74 = arith.cmpi ne, %73, %c0_i32_34 : i32
    scf.if %74 {
      %80 = arith.index_cast %arg3 : i32 to index
      %c0_37 = arith.constant 0 : index
      %c0_38 = arith.constant 0 : index
      %81 = vector.load %arg20[%80, %c0_37, %c0_38] : memref<8x32x16xf32, #tpu.memory_space<vmem>>, vector<1x32x16xf32>
      %82 = vector.shape_cast %81 : vector<1x32x16xf32> to vector<32x16xf32>
      %83 = arith.index_cast %arg3 : i32 to index
      %c0_39 = arith.constant 0 : index
      %c0_40 = arith.constant 0 : index
      %84 = vector.load %arg19[%83, %c0_39, %c0_40] : memref<8x32x1xf32, #tpu.memory_space<vmem>>, vector<1x32x1xf32>
      %85 = vector.shape_cast %84 : vector<1x32x1xf32> to vector<32x1xf32>
      %86 = vector.broadcast %85 : vector<32x1xf32> to vector<32x16xf32>
      %87 = arith.divf %82, %86 : vector<32x16xf32>
      %88 = arith.truncf %87 : vector<32x16xf32> to vector<32x16xbf16>
      %c0_41 = arith.constant 0 : index
      %c0_42 = arith.constant 0 : index
      %89 = vector.load %arg21[%c0_41, %c0_42] : memref<32x128xf32, #tpu.memory_space<vmem>>, vector<32x128xf32>
      %90 = arith.index_cast %arg3 : i32 to index
      %c0_43 = arith.constant 0 : index
      %c0_44 = arith.constant 0 : index
      %91 = vector.load %arg12[%90, %c0_43, %c0_44] : memref<8x16x128xbf16, #tpu.memory_space<vmem>>, vector<1x16x128xbf16>
      %92 = vector.shape_cast %91 : vector<1x16x128xbf16> to vector<16x128xbf16>
      %cst_45 = arith.constant dense<0.000000e+00> : vector<32x128xf32>
      %93 = tpu.matmul %88, %92, %cst_45 {dimension_numbers = #tpu.dot_dimension_numbers<[1], [0], [0], [1], [0, 0, 1, 1], [], []>} : vector<32x16xbf16>, vector<16x128xbf16>, vector<32x128xf32> -> vector<32x128xf32>
      %94 = arith.addf %89, %93 : vector<32x128xf32>
      %c0_46 = arith.constant 0 : index
      %c0_47 = arith.constant 0 : index
      %95 = vector.load %arg21[%c0_46, %c0_47] : memref<32x128xf32, #tpu.memory_space<vmem>>, vector<32x128xf32>
      tpu.vector_store %arg21[%c0_46, %c0_47], %94 {strides = array<i32>} : memref<32x128xf32, #tpu.memory_space<vmem>>, vector<32x128xf32>,
    } else {
    }
    %c0_i32_35 = arith.constant 0 : i32
    %75 = arith.cmpi eq, %arg2, %c0_i32_35 : i32
    %c7_i32 = arith.constant 7 : i32
    %76 = arith.cmpi eq, %arg3, %c7_i32 : i32
    %77 = arith.andi %75, %76 : i1
    %78 = arith.extui %77 : i1 to i32
    %c0_i32_36 = arith.constant 0 : i32
    %79 = arith.cmpi ne, %78, %c0_i32_36 : i32
    scf.if %79 {
      %c0_37 = arith.constant 0 : index
      %c0_38 = arith.constant 0 : index
      %c0_39 = arith.constant 0 : index
      %80 = vector.load %arg4[%c0_37, %c0_38, %c0_39] : memref<1x32x128xf32, #tpu.memory_space<vmem>>, vector<1x32x128xf32>
      %81 = vector.shape_cast %80 : vector<1x32x128xf32> to vector<32x128xf32>
      %c0_40 = arith.constant 0 : index
      %c0_41 = arith.constant 0 : index
      %82 = vector.load %arg21[%c0_40, %c0_41] : memref<32x128xf32, #tpu.memory_space<vmem>>, vector<32x128xf32>
      %83 = arith.addf %81, %82 : vector<32x128xf32>
      %c0_42 = arith.constant 0 : index
      %c0_43 = arith.constant 0 : index
      %84 = vector.load %arg13[%c0_42, %c0_43] : memref<1x128xf32, #tpu.memory_space<vmem>>, vector<1x128xf32>
      %85 = vector.broadcast %84 : vector<1x128xf32> to vector<32x128xf32>
      %86 = arith.addf %83, %85 : vector<32x128xf32>
      %cst_44 = arith.constant dense<0.000000e+00> : vector<32xf32>
      %87 = vector.multi_reduction <add>, %86, %cst_44 [1] : vector<32x128xf32> to vector<32xf32>
      %88 = vector.shape_cast %87 : vector<32xf32> to vector<32x1xf32>
      %cst_45 = arith.constant 1.280000e+02 : f32
      %89 = vector.broadcast %cst_45 : f32 to vector<32x1xf32>
      %90 = arith.divf %88, %89 : vector<32x1xf32>
      %91 = arith.mulf %86, %86 : vector<32x128xf32>
      %cst_46 = arith.constant dense<0.000000e+00> : vector<32xf32>
      %92 = vector.multi_reduction <add>, %91, %cst_46 [1] : vector<32x128xf32> to vector<32xf32>
      %93 = vector.shape_cast %92 : vector<32xf32> to vector<32x1xf32>
      %cst_47 = arith.constant 1.280000e+02 : f32
      %94 = vector.broadcast %cst_47 : f32 to vector<32x1xf32>
      %95 = arith.divf %93, %94 : vector<32x1xf32>
      %96 = arith.mulf %90, %90 : vector<32x1xf32>
      %97 = arith.subf %95, %96 : vector<32x1xf32>
      %98 = vector.broadcast %90 : vector<32x1xf32> to vector<32x128xf32>
      %99 = arith.subf %86, %98 : vector<32x128xf32>
      %cst_48 = arith.constant 9.99999974E-6 : f32
      %100 = vector.broadcast %cst_48 : f32 to vector<32x1xf32>
      %101 = arith.addf %97, %100 : vector<32x1xf32>
      %102 = math.rsqrt %101 : vector<32x1xf32>
      %103 = vector.broadcast %102 : vector<32x1xf32> to vector<32x128xf32>
      %104 = arith.mulf %99, %103 : vector<32x128xf32>
      %c0_49 = arith.constant 0 : index
      %c0_50 = arith.constant 0 : index
      %105 = vector.load %arg14[%c0_49, %c0_50] : memref<1x128xf32, #tpu.memory_space<vmem>>, vector<1x128xf32>
      %106 = vector.broadcast %105 : vector<1x128xf32> to vector<32x128xf32>
      %107 = arith.mulf %104, %106 : vector<32x128xf32>
      %c0_51 = arith.constant 0 : index
      %c0_52 = arith.constant 0 : index
      %108 = vector.load %arg15[%c0_51, %c0_52] : memref<1x128xf32, #tpu.memory_space<vmem>>, vector<1x128xf32>
      %109 = vector.broadcast %108 : vector<1x128xf32> to vector<32x128xf32>
      %110 = arith.addf %107, %109 : vector<32x128xf32>
      %c0_53 = arith.constant 0 : index
      %c0_54 = arith.constant 0 : index
      %c0_55 = arith.constant 0 : index
      %111 = vector.load %arg16[%c0_53, %c0_54, %c0_55] : memref<1x32x128xf32, #tpu.memory_space<vmem>>, vector<1x32x128xf32>
      %112 = vector.shape_cast %111 : vector<1x32x128xf32> to vector<32x128xf32>
      %113 = vector.shape_cast %110 : vector<32x128xf32> to vector<1x32x128xf32>
      tpu.vector_store %arg16[%c0_53, %c0_54, %c0_55], %113 {strides = array<i32>} : memref<1x32x128xf32, #tpu.memory_space<vmem>>, vector<1x32x128xf32>,
    } else {
    }
    return
  }
  func.func @transform_0(%arg0: i32, %arg1: i32, %arg2: i32, %arg3: i32) -> (i32, i32, i32) {
    %c0_i32 = arith.constant 0 : i32
    %c0_i32_0 = arith.constant 0 : i32
    return %arg0, %arg1, %c0_i32 : i32, i32, i32
  }
  func.func @transform_1(%arg0: i32, %arg1: i32, %arg2: i32, %arg3: i32) -> (i32, i32, i32) {
    %c0_i32 = arith.constant 0 : i32
    %c0_i32_0 = arith.constant 0 : i32
    return %arg0, %arg2, %c0_i32 : i32, i32, i32
  }
  func.func @transform_2(%arg0: i32, %arg1: i32, %arg2: i32, %arg3: i32) -> (i32, i32, i32) {
    %c0_i32 = arith.constant 0 : i32
    %c0_i32_0 = arith.constant 0 : i32
    %c0_i32_1 = arith.constant 0 : i32
    %c0_i32_2 = arith.constant 0 : i32
    return %c0_i32, %c0_i32_0, %c0_i32_1 : i32, i32, i32
  }
  func.func @transform_3(%arg0: i32, %arg1: i32, %arg2: i32, %arg3: i32) -> (i32, i32, i32) {
    %c0_i32 = arith.constant 0 : i32
    %c0_i32_0 = arith.constant 0 : i32
    %c0_i32_1 = arith.constant 0 : i32
    %c0_i32_2 = arith.constant 0 : i32
    return %c0_i32, %c0_i32_0, %c0_i32_1 : i32, i32, i32
  }
  func.func @transform_4(%arg0: i32, %arg1: i32, %arg2: i32, %arg3: i32) -> (i32, i32, i32) {
    %c0_i32 = arith.constant 0 : i32
    %c0_i32_0 = arith.constant 0 : i32
    %c0_i32_1 = arith.constant 0 : i32
    %c0_i32_2 = arith.constant 0 : i32
    return %c0_i32, %c0_i32_0, %c0_i32_1 : i32, i32, i32
  }
  func.func @transform_5(%arg0: i32, %arg1: i32, %arg2: i32, %arg3: i32) -> (i32, i32, i32) {
    %c0_i32 = arith.constant 0 : i32
    %c0_i32_0 = arith.constant 0 : i32
    %c0_i32_1 = arith.constant 0 : i32
    %c0_i32_2 = arith.constant 0 : i32
    return %c0_i32, %c0_i32_0, %c0_i32_1 : i32, i32, i32
  }
  func.func @transform_6(%arg0: i32, %arg1: i32, %arg2: i32, %arg3: i32) -> (i32, i32, i32) {
    %c0_i32 = arith.constant 0 : i32
    %c0_i32_0 = arith.constant 0 : i32
    %c0_i32_1 = arith.constant 0 : i32
    %c0_i32_2 = arith.constant 0 : i32
    return %c0_i32, %c0_i32_0, %c0_i32_1 : i32, i32, i32
  }
  func.func @transform_7(%arg0: i32, %arg1: i32, %arg2: i32, %arg3: i32) -> (i32, i32, i32) {
    %c0_i32 = arith.constant 0 : i32
    %c0_i32_0 = arith.constant 0 : i32
    %c0_i32_1 = arith.constant 0 : i32
    %c0_i32_2 = arith.constant 0 : i32
    return %c0_i32, %c0_i32_0, %c0_i32_1 : i32, i32, i32
  }
  func.func @transform_8(%arg0: i32, %arg1: i32, %arg2: i32, %arg3: i32) -> (i32, i32, i32) {
    %c0_i32 = arith.constant 0 : i32
    %c0_i32_0 = arith.constant 0 : i32
    %c0_i32_1 = arith.constant 0 : i32
    %c0_i32_2 = arith.constant 0 : i32
    return %c0_i32, %c0_i32_0, %c0_i32_1 : i32, i32, i32
  }
  func.func @transform_9(%arg0: i32, %arg1: i32, %arg2: i32, %arg3: i32) -> (i32, i32) {
    %c0_i32 = arith.constant 0 : i32
    %c0_i32_0 = arith.constant 0 : i32
    %c0_i32_1 = arith.constant 0 : i32
    return %c0_i32, %c0_i32_0 : i32, i32
  }
  func.func @transform_10(%arg0: i32, %arg1: i32, %arg2: i32, %arg3: i32) -> (i32, i32) {
    %c0_i32 = arith.constant 0 : i32
    %c0_i32_0 = arith.constant 0 : i32
    %c0_i32_1 = arith.constant 0 : i32
    return %c0_i32, %c0_i32_0 : i32, i32
  }
  func.func @transform_11(%arg0: i32, %arg1: i32, %arg2: i32, %arg3: i32) -> (i32, i32) {
    %c0_i32 = arith.constant 0 : i32
    %c0_i32_0 = arith.constant 0 : i32
    %c0_i32_1 = arith.constant 0 : i32
    return %c0_i32, %c0_i32_0 : i32, i32
  }
  func.func @transform_12(%arg0: i32, %arg1: i32, %arg2: i32, %arg3: i32) -> (i32, i32, i32) {
    %c0_i32 = arith.constant 0 : i32
    %c0_i32_0 = arith.constant 0 : i32
    return %arg0, %arg1, %c0_i32 : i32, i32, i32
  }
}

module attributes {stable_mosaic.version = 11 : i64} {
  func.func @kernel(%arg0: i32, %arg1: memref<32x128xf32, #tpu.memory_space<vmem>>, %arg2: memref<128x256xbf16, #tpu.memory_space<vmem>>, %arg3: memref<1x256xf32, #tpu.memory_space<vmem>>, %arg4: memref<256x128xbf16, #tpu.memory_space<vmem>>, %arg5: memref<1x128xf32, #tpu.memory_space<vmem>>, %arg6: memref<1x128xf32, #tpu.memory_space<vmem>>, %arg7: memref<1x128xf32, #tpu.memory_space<vmem>>, %arg8: memref<32x128xf32, #tpu.memory_space<vmem>>) attributes {dimension_semantics = [#tpu.dimension_semantics<parallel>], iteration_bounds = array<i64: 2>, scalar_prefetch = 0 : i64, scratch_operands = 0 : i64, tpu.core_type = #tpu.core_type<tc>, window_params = [{transform_indices = @transform_0, window_bounds = array<i64: 32, 128>}, {pipeline_mode = #tpu.pipeline_mode<synchronous>, transform_indices = @transform_1, window_bounds = array<i64: 128, 256>}, {pipeline_mode = #tpu.pipeline_mode<synchronous>, transform_indices = @transform_2, window_bounds = array<i64: 1, 256>}, {pipeline_mode = #tpu.pipeline_mode<synchronous>, transform_indices = @transform_3, window_bounds = array<i64: 256, 128>}, {pipeline_mode = #tpu.pipeline_mode<synchronous>, transform_indices = @transform_4, window_bounds = array<i64: 1, 128>}, {pipeline_mode = #tpu.pipeline_mode<synchronous>, transform_indices = @transform_5, window_bounds = array<i64: 1, 128>}, {pipeline_mode = #tpu.pipeline_mode<synchronous>, transform_indices = @transform_6, window_bounds = array<i64: 1, 128>}, {transform_indices = @transform_7, window_bounds = array<i64: 32, 128>}]} {
    %c0 = arith.constant 0 : index
    %c0_0 = arith.constant 0 : index
    %0 = vector.load %arg1[%c0, %c0_0] : memref<32x128xf32, #tpu.memory_space<vmem>>, vector<32x128xf32>
    %1 = arith.truncf %0 : vector<32x128xf32> to vector<32x128xbf16>
    %c0_1 = arith.constant 0 : index
    %c0_2 = arith.constant 0 : index
    %2 = vector.load %arg2[%c0_1, %c0_2] : memref<128x256xbf16, #tpu.memory_space<vmem>>, vector<128x256xbf16>
    %cst = arith.constant dense<0.000000e+00> : vector<32x256xf32>
    %3 = tpu.matmul %1, %2, %cst {dimension_numbers = #tpu.dot_dimension_numbers<[1], [0], [0], [1], [0, 0, 1, 1], [], []>} : vector<32x128xbf16>, vector<128x256xbf16>, vector<32x256xf32> -> vector<32x256xf32>
    %c0_3 = arith.constant 0 : index
    %c0_4 = arith.constant 0 : index
    %4 = vector.load %arg3[%c0_3, %c0_4] : memref<1x256xf32, #tpu.memory_space<vmem>>, vector<1x256xf32>
    %5 = vector.broadcast %4 : vector<1x256xf32> to vector<32x256xf32>
    %6 = arith.addf %3, %5 : vector<32x256xf32>
    %cst_5 = arith.constant 0.000000e+00 : f32
    %7 = vector.broadcast %cst_5 : f32 to vector<32x256xf32>
    %8 = arith.maximumf %6, %7 : vector<32x256xf32>
    %9 = arith.truncf %8 : vector<32x256xf32> to vector<32x256xbf16>
    %c0_6 = arith.constant 0 : index
    %c0_7 = arith.constant 0 : index
    %10 = vector.load %arg4[%c0_6, %c0_7] : memref<256x128xbf16, #tpu.memory_space<vmem>>, vector<256x128xbf16>
    %cst_8 = arith.constant dense<0.000000e+00> : vector<32x128xf32>
    %11 = tpu.matmul %9, %10, %cst_8 {dimension_numbers = #tpu.dot_dimension_numbers<[1], [0], [0], [1], [0, 0, 1, 1], [], []>} : vector<32x256xbf16>, vector<256x128xbf16>, vector<32x128xf32> -> vector<32x128xf32>
    %c0_9 = arith.constant 0 : index
    %c0_10 = arith.constant 0 : index
    %12 = vector.load %arg5[%c0_9, %c0_10] : memref<1x128xf32, #tpu.memory_space<vmem>>, vector<1x128xf32>
    %13 = vector.broadcast %12 : vector<1x128xf32> to vector<32x128xf32>
    %14 = arith.addf %11, %13 : vector<32x128xf32>
    %15 = arith.addf %0, %14 : vector<32x128xf32>
    %cst_11 = arith.constant dense<0.000000e+00> : vector<32xf32>
    %16 = vector.multi_reduction <add>, %15, %cst_11 [1] : vector<32x128xf32> to vector<32xf32>
    %17 = vector.shape_cast %16 : vector<32xf32> to vector<32x1xf32>
    %cst_12 = arith.constant 1.280000e+02 : f32
    %18 = vector.broadcast %cst_12 : f32 to vector<32x1xf32>
    %19 = arith.divf %17, %18 : vector<32x1xf32>
    %20 = arith.mulf %15, %15 : vector<32x128xf32>
    %cst_13 = arith.constant dense<0.000000e+00> : vector<32xf32>
    %21 = vector.multi_reduction <add>, %20, %cst_13 [1] : vector<32x128xf32> to vector<32xf32>
    %22 = vector.shape_cast %21 : vector<32xf32> to vector<32x1xf32>
    %cst_14 = arith.constant 1.280000e+02 : f32
    %23 = vector.broadcast %cst_14 : f32 to vector<32x1xf32>
    %24 = arith.divf %22, %23 : vector<32x1xf32>
    %25 = arith.mulf %19, %19 : vector<32x1xf32>
    %26 = arith.subf %24, %25 : vector<32x1xf32>
    %27 = vector.broadcast %19 : vector<32x1xf32> to vector<32x128xf32>
    %28 = arith.subf %15, %27 : vector<32x128xf32>
    %cst_15 = arith.constant 9.99999974E-6 : f32
    %29 = vector.broadcast %cst_15 : f32 to vector<32x1xf32>
    %30 = arith.addf %26, %29 : vector<32x1xf32>
    %31 = math.rsqrt %30 : vector<32x1xf32>
    %32 = vector.broadcast %31 : vector<32x1xf32> to vector<32x128xf32>
    %33 = arith.mulf %28, %32 : vector<32x128xf32>
    %c0_16 = arith.constant 0 : index
    %c0_17 = arith.constant 0 : index
    %34 = vector.load %arg6[%c0_16, %c0_17] : memref<1x128xf32, #tpu.memory_space<vmem>>, vector<1x128xf32>
    %35 = vector.broadcast %34 : vector<1x128xf32> to vector<32x128xf32>
    %36 = arith.mulf %33, %35 : vector<32x128xf32>
    %c0_18 = arith.constant 0 : index
    %c0_19 = arith.constant 0 : index
    %37 = vector.load %arg7[%c0_18, %c0_19] : memref<1x128xf32, #tpu.memory_space<vmem>>, vector<1x128xf32>
    %38 = vector.broadcast %37 : vector<1x128xf32> to vector<32x128xf32>
    %39 = arith.addf %36, %38 : vector<32x128xf32>
    %c0_20 = arith.constant 0 : index
    %c0_21 = arith.constant 0 : index
    %40 = vector.load %arg8[%c0_20, %c0_21] : memref<32x128xf32, #tpu.memory_space<vmem>>, vector<32x128xf32>
    tpu.vector_store %arg8[%c0_20, %c0_21], %39 {strides = array<i32>} : memref<32x128xf32, #tpu.memory_space<vmem>>, vector<32x128xf32>,
    return
  }
  func.func @transform_0(%arg0: i32) -> (i32, i32) {
    %c0_i32 = arith.constant 0 : i32
    %c0_i32_0 = arith.constant 0 : i32
    return %arg0, %c0_i32 : i32, i32
  }
  func.func @transform_1(%arg0: i32) -> (i32, i32) {
    %c0_i32 = arith.constant 0 : i32
    %c0_i32_0 = arith.constant 0 : i32
    %c0_i32_1 = arith.constant 0 : i32
    return %c0_i32, %c0_i32_0 : i32, i32
  }
  func.func @transform_2(%arg0: i32) -> (i32, i32) {
    %c0_i32 = arith.constant 0 : i32
    %c0_i32_0 = arith.constant 0 : i32
    %c0_i32_1 = arith.constant 0 : i32
    return %c0_i32, %c0_i32_0 : i32, i32
  }
  func.func @transform_3(%arg0: i32) -> (i32, i32) {
    %c0_i32 = arith.constant 0 : i32
    %c0_i32_0 = arith.constant 0 : i32
    %c0_i32_1 = arith.constant 0 : i32
    return %c0_i32, %c0_i32_0 : i32, i32
  }
  func.func @transform_4(%arg0: i32) -> (i32, i32) {
    %c0_i32 = arith.constant 0 : i32
    %c0_i32_0 = arith.constant 0 : i32
    %c0_i32_1 = arith.constant 0 : i32
    return %c0_i32, %c0_i32_0 : i32, i32
  }
  func.func @transform_5(%arg0: i32) -> (i32, i32) {
    %c0_i32 = arith.constant 0 : i32
    %c0_i32_0 = arith.constant 0 : i32
    %c0_i32_1 = arith.constant 0 : i32
    return %c0_i32, %c0_i32_0 : i32, i32
  }
  func.func @transform_6(%arg0: i32) -> (i32, i32) {
    %c0_i32 = arith.constant 0 : i32
    %c0_i32_0 = arith.constant 0 : i32
    %c0_i32_1 = arith.constant 0 : i32
    return %c0_i32, %c0_i32_0 : i32, i32
  }
  func.func @transform_7(%arg0: i32) -> (i32, i32) {
    %c0_i32 = arith.constant 0 : i32
    %c0_i32_0 = arith.constant 0 : i32
    return %arg0, %c0_i32 : i32, i32
  }
}

</mosaic_0001>

<bundles_post_ra>
// kernel: tpu_custom_call.1
= control target key start
LH: loop header
LB: loop body
LE: loop exit
PB: predicated region body
PF: predicated region fallthrough
CT: control target
= control target key end

     0   :  { %6 = vsyncpa [#allocation3], 0  ;;  %s114_s0 = inlined_call_operand.hbm [shape: f32[8,128], index: 0, kind: input, shape index: {}]   ;;  %s115_s1 = inlined_call_operand.hbm [shape: f32[8,128], index: 1, kind: output, shape index: {}]  }
   0x1   :  { %7 = vsyncpa [#allocation4], 0  ;;  %s13_s8 = sshll.u32 %s114_s0, 4  ;;  %s96_s9 = smov [#allocation2]   ;;  %s14_s8 = int_to_ptr.hbm [resolvable:$true] %s13_s8 }
   0x2   :  { %s15_s10 = sshll.u32 %s96_s9, 4  ;;  %s16_s10 = int_to_ptr.vmem [resolvable:$true] %s15_s10 }
   0x3   :  { %18 = dma.hbm_to_vmem [thread:$0]  %s14_s8, 128, %s16_s10, [#allocation3]  }
   0x4   :  { %92 = dma.done.wait [#allocation3], 128  }
   0x5   :  { %93 = vsyncadd [#allocation3], 4294967168  ;;  %s97_s11 = smov [#allocation5]   ;;  %s32_s15 = sshll.u32 %s115_s1, 4  ;;  %v23_v0 = vld [vmem:[#allocation2] sm:$0xff]  ;;  %s33_s15 = int_to_ptr.hbm [resolvable:$true] %s32_s15 }
   0x6   :  { %s30_s12 = sshll.u32 %s97_s11, 4  ;;  %24 = vst [vmem:[#allocation5] sm:$0xff] %v23_v0  ;;  %s31_s12 = int_to_ptr.vmem [resolvable:$true] %s30_s12 }
   0x7   :  { %35 = dma.vmem_to_hbm [thread:$0]  %s31_s12, 128, %s33_s15, [#allocation4]  }
   0x8   :  { %94 = dma.done.wait [#allocation4], 128  }
   0x9   :  { %95 = vsyncadd [#allocation4], 4294967168 }
   0xa   :  { %40 = vsyncpa [#allocation3], 1 }
   0xb   :  { %41 = vsyncpa [#allocation4], 1 }

// kernel: transformer_decoder_layer_forward.4
= control target key start
LH: loop header
LB: loop body
LE: loop exit
PB: predicated region body
PF: predicated region fallthrough
CT: control target
= control target key end

     0   :  { %s2020_s21 = smov 0   ;;  %s2022_s22 = smov 0   ;;  %s2413_s0 = inlined_call_operand.vmem [shape: f32[2,32,128], index: 0, kind: input, shape index: {}]   ;;  %s2414_s1 = inlined_call_operand.vmem [shape: bf16[2,128,128], index: 1, kind: input, shape index: {}]   ;;  %s2415_s2 = inlined_call_operand.vmem [shape: bf16[8,128,16], index: 2, kind: input, shape index: {}]   ;;  %s2416_s3 = inlined_call_operand.vmem [shape: f32[8,1,16], index: 3, kind: input, shape index: {}]   ;;  %s2417_s4 = inlined_call_operand.vmem [shape: bf16[8,128,16], index: 4, kind: input, shape index: {}]   ;;  %s2418_s5 = inlined_call_operand.vmem [shape: f32[8,1,16], index: 5, kind: input, shape index: {}]   ;;  %s2419_s6 = inlined_call_operand.vmem [shape: bf16[8,128,16], index: 6, kind: input, shape index: {}]   ;;  %s2420_s7 = inlined_call_operand.vmem [shape: f32[8,1,16], index: 7, kind: input, shape index: {}]   ;;  %s2421_s8 = inlined_call_operand.vmem [shape: bf16[8,16,128], index: 8, kind: input, shape index: {}]   ;;  %s2422_s9 = inlined_call_operand.vmem [shape: f32[1,128], index: 9, kind: input, shape index: {}]   ;;  %s2423_s10 = inlined_call_operand.vmem [shape: f32[1,128], index: 10, kind: input, shape index: {}]   ;;  %s2424_s11 = inlined_call_operand.vmem [shape: f32[1,128], index: 11, kind: input, shape index: {}]   ;;  %s2425_s12 = inlined_call_operand.vmem [shape: f32[2,32,128], index: 12, kind: output, shape index: {}]  }
   0x1   :  { %s2024_s23 = smov 0   ;;  %s2026_s24 = smov 0  }
   0x2   :  { %s2028_s25 = smov 0  }
   0x3 LB: > { %s37_s26 = sadd.s32 1, %s1940_s23  ;;  %s48_s27 = sadd.s32 1, %s1944_s24  ;;  %s1948_s25 = sphi %s2028_s25, %s22_s25   ;;  %s1944_s24 = sphi %s2026_s24, %s2429_s24   ;;  %s1940_s23 = sphi %s2024_s23, %s2428_s23   ;;  %s1936_s22 = sphi %s2022_s22, %s2427_s22   ;;  %s1932_s21 = sphi %s2020_s21, %s2426_s21  }
   0x4   : > { %p38_p0 = scmp.ge.s32.totalorder %s37_s26, 8  ;;  %p1608_p1 = scmp.ge.s32.totalorder %s1948_s25, 1 }
   0x5   : > { %p414_p2 = scmp.lt.s32.totalorder %s1948_s25, 17 }
   0x6   : > { %s2431_s26 = smov (%p38_p0, %s37_s26), 0  ;;  %s2433_s27 = smov (!%p38_p0, %s48_s27), %s1944_s24 }
   0x7   : > { %p415_p3 = pnand %p1608_p1, %p414_p2  ;;  %p50_p4 = scmp.ge.s32.totalorder %s2433_s27, 2 }
   0x8   : > { %p474_p5 = scmp.lt.s32.totalorder (!%p415_p3), %s1936_s22, 1  ;;  %p505_p6 = scmp.eq.s32.totalorder (!%p415_p3), %s1932_s21, 0 }
   0x9   : > { %s2435_s27 = smov (%p50_p4, %s2433_s27), 0  ;;  %418 = sbr.rel (%p415_p3) target bundleno = 1325 (0x52d), region = 68 }
   0xe   : > { %s2437_s22 = smov (!%p474_p5, %s1936_s22), 1  ;;  %509 = sbr.rel (!%p505_p6) target bundleno = 19 (0x13), region = 72  ;;  %v1950_v0 = vmov (%p505_p6), 0.0  }
   0xf   : > { %s1776_s28 = sshll.u32 %s2437_s22, 5  ;;  %s1777_s29 = sshll.u32 %s2437_s22, 6  ;;  %510 = vst [vmem:[#allocation6 + $0x10] sm:$0xff] (%p505_p6), %v1950_v0 }
  0x10   : > { %s2056_s14 = scalar_lea.vmem %s2413_s0, %s1776_s28  ;;  %s2061_s17 = scalar_lea.vmem %s2414_s1, %s1777_s29  ;;  %511 = vst [vmem:[#allocation6] sm:$0xff] (%p505_p6), %v1950_v0 }
  0x11   : > { %s2066_s20 = scalar_lea.vmem %s2425_s12, %s1776_s28  ;;  %512 = vst [vmem:[#allocation6 + $0x18] sm:$0xff] (%p505_p6), %v1950_v0 }
  0x12   : > { %513 = vst [vmem:[#allocation6 + $0x8] sm:$0xff] (%p505_p6), %v1950_v0 }
  0x13 PF: > { %s2069_s22 = sshll.u32 %s1932_s21, 6  ;;  %s679_s16 = scalar_lea.vmem %s2418_s5, %s1932_s21  ;;  %v2080_v9 = vld [vmem:[%s2061_s17] sm:$0xff]  ;;  %v2084_v10 = vld [vmem:[%s2061_s17 + $0x8] sm:$0xff]  ;;  %v2088_v11 = vld [vmem:[%s2061_s17 + $0x10] sm:$0xff]  ;;  %vm639_vm0 = vcmask 130048   ;;  %vm621_vm1 = vcmask 125952  }
  0x14   : > { %s662_s13 = scalar_lea.vmem %s2417_s4, %s2069_s22  ;;  %v2092_v12 = vld [vmem:[%s2061_s17 + $0x18] sm:$0xff]  ;;  %v2096_v13 = vld [vmem:[%s2061_s17 + $0x20] sm:$0xff]  ;;  %v2100_v14 = vld [vmem:[%s2061_s17 + $0x28] sm:$0xff]  ;;  %s525_s30 = scalar_lea.vmem %s2415_s2, %s2069_s22  ;;  %vm628_vm2 = vcmask 7168  }
  0x15   : > { %v1806_v1 = vld [vmem:[%s662_s13 + $0x38] sm:$0xff]  ;;  %v1805_v2 = vld [vmem:[%s662_s13 + $0x30] sm:$0xff]  ;;  %v1804_v3 = vld [vmem:[%s662_s13 + $0x28] sm:$0xff]  ;;  %s542_s15 = scalar_lea.vmem %s2416_s3, %s1932_s21  ;;  %s1652_s28 = sshll.u32 %s1932_s21, 5 }
  0x16   : > { %780 = vmatpush.bf16.msra.mxu1 %v1806_v1  ;;  %v1803_v4 = vld [vmem:[%s662_s13 + $0x20] sm:$0xff]  ;;  %v1802_v5 = vld [vmem:[%s662_s13 + $0x18] sm:$0xff]  ;;  %v1801_v6 = vld [vmem:[%s662_s13 + $0x10] sm:$0xff]  ;;  %p1323_p7 = scmp.eq.s32.totalorder %s1932_s21, 7 }
  0x17   : > { %v1800_v7 = vld [vmem:[%s662_s13 + $0x8] sm:$0xff]  ;;  %v1799_v8 = vld [vmem:[%s662_s13] sm:$0xff]  ;;  %v2108_v15 = vld [vmem:[%s2061_s17 + $0x30] sm:$0xff]  ;;  %s855_s13 = scalar_lea.vmem %s2420_s7, %s1932_s21 }
  0x18   : > { %v1788_v16 = vld [vmem:[%s525_s30 + $0x38] sm:$0xff]  ;;  %v1787_v17 = vld [vmem:[%s525_s30 + $0x30] sm:$0xff]  ;;  %v1786_v18 = vld [vmem:[%s525_s30 + $0x28] sm:$0xff] }
  0x19   : > { %595 = vmatpush.bf16.msra.mxu0 %v1788_v16  ;;  %v1785_v19 = vld [vmem:[%s525_s30 + $0x20] sm:$0xff]  ;;  %v2112_v20 = vld [vmem:[%s2061_s17 + $0x38] sm:$0xff]  ;;  %v1783_v22 = vld [vmem:[%s525_s30 + $0x10] sm:$0xff]  ;;  %s838_s17 = scalar_lea.vmem %s2419_s6, %s2069_s22 }
  0x1a   : > { %781 = vmatpush.bf16.msra.mxu1 %v1805_v2  ;;  %v1784_v21 = vld [vmem:[%s525_s30 + $0x18] sm:$0xff]  ;;  %v1782_v23 = vld [vmem:[%s525_s30 + $0x8] sm:$0xff]  ;;  %v1781_v24 = vld [vmem:[%s525_s30] sm:$0xff] }
  0x1b   : > { %v517_v25 = vld [vmem:[%s2056_s14] sm:$0xff]  ;;  %v518_v26 = vld [vmem:[%s2056_s14 + $0x8] sm:$0xff]  ;;  %v519_v34 = vld [vmem:[%s2056_s14 + $0x10] sm:$0xff] }
  0x1c   : > { %v521_v28 = vpack.c.bf16 %v518_v26, %v517_v25  ;;  %v1870_v29 = vld [vmem:[%s679_s16] ss:$0 sm:$0xff]  ;;  %v520_v35 = vld [vmem:[%s2056_s14 + $0x18] sm:$0xff]  ;;  %s1789_s16 = sshll.u32 %s1932_s21, 4 }
  0x1d   : > { %596 = vmatpush.bf16.msra.mxu0 %v1787_v17  ;;  %v522_v37 = vpack.c.bf16 %v520_v35, %v519_v34  ;;  %v1871_v2 = vld [vmem:[%s542_s15] ss:$0 sm:$0xff]  ;;  %s2142_s18 = scalar_lea.vmem [#allocation2], %s1789_s16  ;;  %s2202_s15 = scalar_lea.vmem [#allocation3], %s1652_s28 }
  0x1e   : > { %782 = vmatpush.bf16.msra.mxu1 %v1804_v3  ;;  %s2214_s16 = scalar_lea.vmem [#allocation4], %s1652_s28 }
  0x21   : > { %597 = vmatpush.bf16.msra.mxu0 %v1786_v18 }
  0x22   : > { %783 = vmatpush.bf16.msra.mxu1 %v1803_v4 }
  0x25   : > { %598 = vmatpush.bf16.msra.mxu0 %v1785_v19 }
  0x26   : > { %784 = vmatpush.bf16.msra.mxu1 %v1802_v5 }
  0x29   : > { %599 = vmatpush.bf16.msra.mxu0 %v1784_v21 }
  0x2a   : > { %785 = vmatpush.bf16.msra.mxu1 %v1801_v6 }
  0x2d   : > { %600 = vmatpush.bf16.msra.mxu0 %v1783_v22 }
  0x2e   : > { %786 = vmatpush.bf16.msra.mxu1 %v1800_v7 }
  0x31   : > { %601 = vmatpush.bf16.msra.mxu0 %v1782_v23 }
  0x32   : > { %787 = vmatpush.bf16.msra.mxu1 %v1799_v8 }
  0x35   : > { %788 = vmatmul.bf16.vlgmr.msra.gmra.mxu1 %v2080_v9  ;;  %602 = vmatpush.bf16.msra.mxu0 %v1781_v24 }
  0x38   : > { %603 = vmatmul.bf16.vlgmr.msra.gmra.mxu0 %v521_v28 }
  0x45   : > { %793 = vmatmul.bf16.gmra.mxu1 %v2084_v10 }
  0x48   : > { %608 = vmatmul.bf16.gmra.mxu0 %v522_v37 }
  0x55   : > { %798 = vmatmul.bf16.gmra.mxu1 %v2088_v11 }
  0x65   : > { %803 = vmatmul.bf16.gmra.mxu1 %v2092_v12 }
  0x75   : > { %808 = vmatmul.bf16.gmra.mxu1 %v2096_v13 }
  0x85   : > { %813 = vmatmul.bf16.gmra.mxu1 %v2100_v14 }
  0x95   : > { %818 = vmatmul.bf16.gmra.mxu1 %v2108_v15 }
  0xa5   : > { %823 = vmatmul.bf16.gmra.mxu1 %v2112_v20 }
  0xb2   : > { %v789_v27 = vpop.f32.mrf.mxu1 }
  0xb3   : > { %v2122_v31 = vadd.f32 %v1870_v29, %v789_v27 }
  0xb5   : > { %v604_v6 = vpop.f32.mrf.mxu0 }
  0xb6   : > { %v605_v7 = vadd.f32 %v1871_v2, %v604_v6 }
  0xb8   : > { %v614_v16 = vpack.c.bf16 %v605_v7, %v605_v7 }
  0xba   : > { %v791_v30 = vpop.f32.mrf.mxu1  ;;  %622 = vst.msk [vmem:[%s2142_s18] sm:$0xf] %vm621_vm1, %v614_v16 }
  0xbb   : > { %v2124_v32 = vadd.f32 %v1870_v29, %v791_v30 }
  0xbd   : > { %v829_v33 = vpack.c.bf16 %v2124_v32, %v2122_v31  ;;  %v606_v21 = vpop.f32.mrf.mxu0 }
  0xbe   : > { %v607_v22 = vadd.f32 %v1871_v2, %v606_v21 }
  0xc0   : > { %v615_v24 = vpack.c.bf16 %v607_v22, %v607_v22 }
  0xc2   : > { %v794_v36 = vpop.f32.mrf.mxu1  ;;  %623 = vst.msk [vmem:[%s2142_s18 + $0x4] sm:$0xf] %vm621_vm1, %v615_v24 }
  0xc3   : > { %v2134_v39 = vadd.f32 %v1870_v29, %v794_v36 }
  0xc5   : > { %v609_v26 = vpop.f32.mrf.mxu0 }
  0xc6   : > { %v610_v27 = vadd.f32 %v1871_v2, %v609_v26 }
  0xc8   : > { %v616_v28 = vpack.c.bf16 %v610_v27, %v610_v27 }
  0xca   : > { %v796_v38 = vpop.f32.mrf.mxu1  ;;  %624 = vst.msk [vmem:[%s2142_s18 + $0x8] sm:$0xf] %vm621_vm1, %v616_v28 }
  0xcb   : > { %v2136_v40 = vadd.f32 %v1870_v29, %v796_v38 }
  0xcd   : > { %v830_v41 = vpack.c.bf16 %v2136_v40, %v2134_v39  ;;  %v1811_v39 = vld [vmem:[%s838_s17 + $0x18] sm:$0xff]  ;;  %v1810_v40 = vld [vmem:[%s838_s17 + $0x10] sm:$0xff] }
  0xcf   : > { %v993_v38 = vsel %vm639_vm0, %v830_v41, 0  ;;  %v1809_v41 = vld [vmem:[%s838_s17 + $0x8] sm:$0xff] }
  0xd2   : > { %v799_v42 = vpop.f32.mrf.mxu1 }
  0xd3   : > { %v800_v44 = vadd.f32 %v1870_v29, %v799_v42  ;;  %v1815_v42 = vld [vmem:[%s838_s17 + $0x38] sm:$0xff] }
  0xd4   : > { %908 = vmatpush.bf16.msra.mxu2 %v1815_v42 }
  0xda   : > { %v801_v43 = vpop.f32.mrf.mxu1 }
  0xdb   : > { %v802_v45 = vadd.f32 %v1870_v29, %v801_v43  ;;  %v1814_v43 = vld [vmem:[%s838_s17 + $0x30] sm:$0xff] }
  0xdc   : > { %909 = vmatpush.bf16.msra.mxu2 %v1814_v43 }
  0xdd   : > { %v831_v46 = vpack.c.bf16 %v802_v45, %v800_v44  ;;  %v1813_v44 = vld [vmem:[%s838_s17 + $0x28] sm:$0xff]  ;;  %v990_v45 = vsel %vm639_vm0, %v829_v33, 0 }
  0xdf   : > { %v996_v37 = vsel %vm639_vm0, %v831_v46, 0  ;;  %v1812_v46 = vld [vmem:[%s838_s17 + $0x20] sm:$0xff] }
  0xe0   : > { %910 = vmatpush.bf16.msra.mxu2 %v1813_v44 }
  0xe2   : > { %v804_v47 = vpop.f32.mrf.mxu1 }
  0xe3   : > { %v805_v49 = vadd.f32 %v1870_v29, %v804_v47  ;;  %v1817_v47 = vld [vmem:[%s2142_s18] sm:$0xff] }
  0xe4   : > { %911 = vmatpush.bf16.msra.mxu2 %v1812_v46 }
  0xe8   : > { %912 = vmatpush.bf16.msra.mxu2 %v1811_v39 }
  0xea   : > { %v806_v48 = vpop.f32.mrf.mxu1 }
  0xeb   : > { %v807_v50 = vadd.f32 %v1870_v29, %v806_v48  ;;  %v1808_v48 = vld [vmem:[%s838_s17] sm:$0xff]  ;;  %s1819_s17 = sshll.u32 %s1932_s21, 3 }
  0xec   : > { %913 = vmatpush.bf16.msra.mxu2 %v1810_v40 }
  0xed   : > { %v832_v51 = vpack.c.bf16 %v807_v50, %v805_v49 }
  0xef   : > { %v999_v36 = vsel %vm639_vm0, %v832_v51, 0 }
  0xf0   : > { %914 = vmatpush.bf16.msra.mxu2 %v1809_v41 }
  0xf2   : > { %v809_v52 = vpop.f32.mrf.mxu1 }
  0xf3   : > { %v810_v54 = vadd.f32 %v1870_v29, %v809_v52  ;;  %v1952_v52 = vmov 0  }
  0xf4   : > { %915 = vmatpush.bf16.msra.mxu2 %v1808_v48  ;;  %1867 = vset.pattern.permute.xlu2 %v1952_v52 }
  0xf5   : > { %1868 = vset.pattern.permute.xlu0 %v1952_v52  ;;  %1869 = vset.pattern.permute.xlu1 %v1952_v52 }
  0xf7   : > { %916 = vmatmul.bf16.vlgmr.msra.gmra.mxu2 %v2080_v9 }
  0xfa   : > { %v811_v53 = vpop.f32.mrf.mxu1 }
  0xfb   : > { %v812_v55 = vadd.f32 %v1870_v29, %v811_v53 }
  0xfd   : > { %v833_v56 = vpack.c.bf16 %v812_v55, %v810_v54  ;;  %v1953_v54 = vmov 0.0  }
  0xfe   : > { %634 = vst.msk [vmem:[%s2214_s16] sm:$0xff] %vm628_vm2, %v1953_v54 }
  0xff   : > { %v1002_v30 = vsel %vm639_vm0, %v833_v56, 0  ;;  %635 = vst.msk [vmem:[%s2214_s16 + $0x8] sm:$0xff] %vm628_vm2, %v1953_v54 }
 0x100   : > { %636 = vst.msk [vmem:[%s2214_s16 + $0x10] sm:$0xff] %vm628_vm2, %v1953_v54 }
 0x101   : > { %637 = vst.msk [vmem:[%s2214_s16 + $0x18] sm:$0xff] %vm628_vm2, %v1953_v54 }
 0x102   : > { %v814_v57 = vpop.f32.mrf.mxu1 }
 0x103   : > { %v815_v19 = vadd.f32 %v1870_v29, %v814_v57 }
 0x107   : > { %921 = vmatmul.bf16.gmra.mxu2 %v2084_v10 }
 0x10a   : > { %v816_v58 = vpop.f32.mrf.mxu1 }
 0x10b   : > { %v817_v17 = vadd.f32 %v1870_v29, %v816_v58 }
 0x10d   : > { %v834_v23 = vpack.c.bf16 %v817_v17, %v815_v19 }
 0x10f   : > { %v1005_v25 = vsel %vm639_vm0, %v834_v23, 0 }
 0x112   : > { %v819_v59 = vpop.f32.mrf.mxu1 }
 0x113   : > { %v820_v5 = vadd.f32 %v1870_v29, %v819_v59 }
 0x117   : > { %926 = vmatmul.bf16.gmra.mxu2 %v2088_v11 }
 0x11a   : > { %v821_v60 = vpop.f32.mrf.mxu1 }
 0x11b   : > { %v822_v3 = vadd.f32 %v1870_v29, %v821_v60 }
 0x11d   : > { %v835_v8 = vpack.c.bf16 %v822_v3, %v820_v5 }
 0x11f   : > { %v1008_v18 = vsel %vm639_vm0, %v835_v8, 0 }
 0x122   : > { %v824_v61 = vpop.f32.mrf.mxu1 }
 0x123   : > { %v825_v63 = vadd.f32 %v1870_v29, %v824_v61 }
 0x127   : > { %931 = vmatmul.bf16.gmra.mxu2 %v2092_v12 }
 0x12a   : > { %v826_v62 = vpop.f32.mrf.mxu1 }
 0x12b   : > { %v827_v0 = vadd.f32 %v1870_v29, %v826_v62  ;;  %v611_v29 = vpop.f32.mrf.mxu0 }
 0x12c   : > { %v612_v34 = vadd.f32 %v1871_v2, %v611_v29 }
 0x12d   : > { %v836_v1 = vpack.c.bf16 %v827_v0, %v825_v63  ;;  %v1872_v63 = vld [vmem:[%s855_s13] ss:$0 sm:$0xff]  ;;  %s1281_s13 = scalar_lea.vmem %s2421_s8, %s1819_s17 }
 0x12e   : > { %v617_v35 = vpack.c.bf16 %v612_v34, %v612_v34 }
 0x12f   : > { %v1011_v4 = vsel %vm639_vm0, %v836_v1, 0 }
 0x130   : > { %1013 = vmatpush.bf16.xpose.msra.mxu3 %v1011_v4  ;;  %625 = vst.msk [vmem:[%s2142_s18 + $0xc] sm:$0xf] %vm621_vm1, %v617_v35 }
 0x137   : > { %v1818_v49 = vld [vmem:[%s2142_s18 + $0x8] sm:$0xff]  ;;  %936 = vmatmul.bf16.gmra.mxu2 %v2096_v13  ;;  %s2224_s18 = scalar_lea.vmem [#allocation5], %s1652_s28 }
 0x138   : > { %1014 = vmatpush.bf16.xpose.msra.mxu3 %v1008_v18  ;;  %640 = vst.msk [vmem:[%s2224_s18] sm:$0xff] %vm639_vm0, %v1953_v54 }
 0x139   : > { %641 = vst.msk [vmem:[%s2224_s18 + $0x8] sm:$0xff] %vm639_vm0, %v1953_v54 }
 0x13a   : > { %642 = vst.msk [vmem:[%s2224_s18 + $0x10] sm:$0xff] %vm639_vm0, %v1953_v54 }
 0x13b   : > { %643 = vst.msk [vmem:[%s2224_s18 + $0x18] sm:$0xff] %vm639_vm0, %v1953_v54 }
 0x140   : > { %1015 = vmatpush.bf16.xpose.msra.mxu3 %v1005_v25 }
 0x147   : > { %941 = vmatmul.bf16.gmra.mxu2 %v2100_v14 }
 0x148   : > { %1016 = vmatpush.bf16.xpose.msra.mxu3 %v1002_v30 }
 0x150   : > { %1017 = vmatpush.bf16.xpose.msra.mxu3 %v999_v36 }
 0x157   : > { %946 = vmatmul.bf16.gmra.mxu2 %v2108_v15 }
 0x158   : > { %1018 = vmatpush.bf16.xpose.msra.mxu3 %v996_v37 }
 0x160   : > { %1019 = vmatpush.bf16.xpose.msra.mxu3 %v993_v38 }
 0x167   : > { %951 = vmatmul.bf16.gmra.mxu2 %v2112_v20  ;;  %v1951_v20 = vmov -inf  }
 0x168   : > { %1020 = vmatpush.bf16.xpose.msra.mxu3 %v990_v45  ;;  %629 = vst.msk [vmem:[%s2202_s15] sm:$0xff] %vm628_vm2, %v1951_v20 }
 0x169   : > { %630 = vst.msk [vmem:[%s2202_s15 + $0x8] sm:$0xff] %vm628_vm2, %v1951_v20 }
 0x16a   : > { %631 = vst.msk [vmem:[%s2202_s15 + $0x10] sm:$0xff] %vm628_vm2, %v1951_v20 }
 0x16b   : > { %632 = vst.msk [vmem:[%s2202_s15 + $0x18] sm:$0xff] %vm628_vm2, %v1951_v20 }
 0x16f   : > { %1762 = vmatmul.msk.bf16.vlgmr.msra.gmra.mxu3 %vm639_vm0, %v1817_v47  ;;  %v2235_v58 = vld [vmem:[%s2202_s15] sm:$0xff] }
 0x170   : > { %v2252_v0 = vld [vmem:[%s2202_s15 + $0x8] sm:$0xff] }
 0x171   : > { %v2264_v17 = vld [vmem:[%s2202_s15 + $0x10] sm:$0xff] }
 0x172   : > { %v2278_v30 = vld [vmem:[%s2202_s15 + $0x18] sm:$0xff] }
 0x17a   : > { %v2194_v11 = vpop.f32.mrf.mxu2 }
 0x17b   : > { %v918_v26 = vadd.f32 %v1872_v63, %v2194_v11 }
 0x17f   : > { %1763 = vmatmul.msk.bf16.gmra.mxu3 %vm639_vm0, %v1818_v49 }
 0x182   : > { %v2199_v13 = vpop.f32.mrf.mxu2 }
 0x183   : > { %v920_v27 = vadd.f32 %v1872_v63, %v2199_v13 }
 0x185   : > { %v957_v34 = vpack.c.bf16 %v920_v27, %v918_v26 }
 0x18a   : > { %v922_v14 = vpop.f32.mrf.mxu2 }
 0x18b   : > { %v923_v18 = vadd.f32 %v1872_v63, %v922_v14 }
 0x192   : > { %v924_v15 = vpop.f32.mrf.mxu2 }
 0x193   : > { %v925_v19 = vadd.f32 %v1872_v63, %v924_v15 }
 0x195   : > { %v958_v28 = vpack.c.bf16 %v925_v19, %v923_v18  ;;  %v1097_v18 = vld [vmem:[%s2214_s16 + $0x10] sm:$0xff] }
 0x19a   : > { %v927_v32 = vpop.f32.mrf.mxu2 }
 0x19b   : > { %v928_v7 = vadd.f32 %v1872_v63, %v927_v32 }
 0x1a2   : > { %v929_v33 = vpop.f32.mrf.mxu2 }
 0x1a3   : > { %v930_v8 = vadd.f32 %v1872_v63, %v929_v33 }
 0x1a5   : > { %v959_v22 = vpack.c.bf16 %v930_v8, %v928_v7  ;;  %v1096_v7 = vld [vmem:[%s2214_s16 + $0x8] sm:$0xff] }
 0x1aa   : > { %v932_v50 = vpop.f32.mrf.mxu2 }
 0x1ab   : > { %v933_v1 = vadd.f32 %v1872_v63, %v932_v50 }
 0x1b2   : > { %v934_v51 = vpop.f32.mrf.mxu2 }
 0x1b3   : > { %v935_v2 = vadd.f32 %v1872_v63, %v934_v51 }
 0x1b5   : > { %v960_v16 = vpack.c.bf16 %v935_v2, %v933_v1 }
 0x1ba   : > { %v2212_v53 = vpop.f32.mrf.mxu2 }
 0x1bb   : > { %v938_v40 = vadd.f32 %v1872_v63, %v2212_v53 }
 0x1c2   : > { %v939_v55 = vpop.f32.mrf.mxu2 }
 0x1c3   : > { %v940_v41 = vadd.f32 %v1872_v63, %v939_v55 }
 0x1c5   : > { %v961_v49 = vpack.c.bf16 %v940_v41, %v938_v40 }
 0x1ca   : > { %v942_v56 = vpop.f32.mrf.mxu2 }
 0x1cb   : > { %v943_v46 = vadd.f32 %v1872_v63, %v942_v56 }
 0x1d2   : > { %v944_v57 = vpop.f32.mrf.mxu2 }
 0x1d3   : > { %v945_v47 = vadd.f32 %v1872_v63, %v944_v57 }
 0x1d5   : > { %v962_v48 = vpack.c.bf16 %v945_v47, %v943_v46 }
 0x1da   : > { %v947_v62 = vpop.f32.mrf.mxu2 }
 0x1db   : > { %v948_v42 = vadd.f32 %v1872_v63, %v947_v62 }
 0x1e2   : > { %v949_v6 = vpop.f32.mrf.mxu2 }
 0x1e3   : > { %v950_v43 = vadd.f32 %v1872_v63, %v949_v6 }
 0x1e5   : > { %v963_v39 = vpack.c.bf16 %v950_v43, %v948_v42 }
 0x1ea   : > { %v952_v25 = vpop.f32.mrf.mxu2 }
 0x1eb   : > { %v953_v36 = vadd.f32 %v1872_v63, %v952_v25 }
 0x1f2   : > { %v2185_v9 = vpop.f32.mrf.mxu3  ;;  %v954_v38 = vpop.f32.mrf.mxu2 }
 0x1f3   : > { %1038 = vmax.xlane.f32.xlu0 %v2185_v9  ;;  %v955_v44 = vadd.f32 %v1872_v63, %v954_v38  ;;  %v1095_v63 = vld [vmem:[%s2214_s16] sm:$0xff]  ;;  %v1122_v38 = vld [vmem:[%s2224_s18 + $0x8] sm:$0xff] }
 0x1f5   : > { %v964_v45 = vpack.c.bf16 %v955_v44, %v953_v36  ;;  %v1820_v44 = vld [vmem:[%s1281_s13] sm:$0xff] }
 0x1f7   : > { %1151 = vmatpush.bf16.msrb.mxu0 %v964_v45 }
 0x1fa   : > { %v2188_v31 = vpop.f32.mrf.mxu3 }
 0x1fb   : > { %1040 = vmax.xlane.f32.xlu0 %v2188_v31  ;;  %1152 = vmatpush.bf16.msrb.mxu0 %v963_v39 }
 0x1ff   : > { %1153 = vmatpush.bf16.msrb.mxu0 %v962_v48 }
 0x202   : > { %v2191_v10 = vpop.f32.mrf.mxu3 }
 0x203   : > { %1042 = vmax.xlane.f32.xlu1 %v2191_v10  ;;  %1154 = vmatpush.bf16.msrb.mxu0 %v961_v49  ;;  %v1123_v49 = vld [vmem:[%s2224_s18 + $0x10] sm:$0xff] }
 0x207   : > { %1155 = vmatpush.bf16.msrb.mxu0 %v960_v16 }
 0x20a   : > { %v2196_v12 = vpop.f32.mrf.mxu3 }
 0x20b   : > { %1044 = vmax.xlane.f32.xlu1 %v2196_v12  ;;  %1156 = vmatpush.bf16.msrb.mxu0 %v959_v22 }
 0x20f   : > { %1157 = vmatpush.bf16.msrb.mxu0 %v958_v28 }
 0x213   : > { %1158 = vmatpush.bf16.msrb.mxu0 %v957_v34 }
 0x217   : > { %1303 = vmatpush.bf16.msra.mxu0 %v1820_v44 }
 0x266   : > { %v1039_v59 = vpop.xlane.xlu0 %1038 }
 0x267   : > { %v2238_v60 = vmax.f32 %v2235_v58, %v1039_v59 }
 0x269   : > { %v1050_v61 = vsub.f32 %v2235_v58, %v2238_v60  ;;  %1178 = vst.msk [vmem:[%s2202_s15] sm:$0xff] %vm628_vm2, %v2238_v60  ;;  %1064 = vperm.xlu2 %1867, %v2238_v60  }
 0x26e   : > { %v1041_v3 = vpop.xlane.xlu0 %1040 }
 0x26f   : > { %v2255_v4 = vmax.f32 %v2252_v0, %v1041_v3 }
 0x271   : > { %v1051_v5 = vsub.f32 %v2252_v0, %v2255_v4  ;;  %1179 = vst.msk [vmem:[%s2202_s15 + $0x8] sm:$0xff] %vm628_vm2, %v2255_v4  ;;  %1069 = vperm.xlu2 %1867, %v2255_v4  }
 0x276   : > { %v1043_v21 = vpop.xlane.xlu1 %1042 }
 0x277   : > { %v2267_v23 = vmax.f32 %v2264_v17, %v1043_v21 }
 0x279   : > { %v1052_v24 = vsub.f32 %v2264_v17, %v2267_v23  ;;  %1180 = vst.msk [vmem:[%s2202_s15 + $0x10] sm:$0xff] %vm628_vm2, %v2267_v23  ;;  %1074 = vperm.xlu0 %1868, %v2267_v23   ;;  %v1098_v23 = vld [vmem:[%s2214_s16 + $0x18] sm:$0xff] }
 0x27b   : > { %v1058_v0 = vmul.f32 1.442695, %v1052_v24 }
 0x27e   : > { %v1045_v29 = vpop.xlane.xlu1 %1044 }
 0x27f   : > { %v2281_v35 = vmax.f32 %v2278_v30, %v1045_v29  ;;  %v1121_v29 = vld [vmem:[%s2224_s18] sm:$0xff] }
 0x281   : > { %v1053_v37 = vsub.f32 %v2278_v30, %v2281_v35  ;;  %1181 = vst.msk [vmem:[%s2202_s15 + $0x18] sm:$0xff] %vm628_vm2, %v2281_v35  ;;  %1079 = vperm.xlu1 %1869, %v2281_v35  }
 0x283   : > { %v1060_v16 = vmul.f32 1.442695, %v1053_v37 }
 0x2c3   : > { %v1065_v11 = vpop.permute.xlu2 %1064 }
 0x2c4   : > { %v1082_v13 = vsub.f32 %v2185_v9, %v1065_v11 }
 0x2c6   : > { %v1086_v14 = vmul.f32 1.442695, %v1082_v13 }
 0x2c8   : > { %1873 = vpow2.f32 %v1086_v14 }
 0x2cb   : > { %v1070_v15 = vpop.permute.xlu2 %1069 }
 0x2cc   : > { %v1083_v20 = vsub.f32 %v2188_v31, %v1070_v15 }
 0x2ce   : > { %v1874_v32 = vpop.eup %1873  ;;  %v1088_v33 = vmul.f32 1.442695, %v1083_v20 }
 0x2cf   : > { %1103 = vadd.xlane.f32.xlu2 %v1874_v32 }
 0x2d0   : > { %1875 = vpow2.f32 %v1088_v33 }
 0x2d6   : > { %v1876_v50 = vpop.eup %1875 }
 0x2d7   : > { %1105 = vadd.xlane.f32.xlu1 %v1876_v50  ;;  %v1149_v51 = vpack.c.bf16 %v1876_v50, %v1874_v32 }
 0x2d9   : > { %1159 = vmatmul.bf16.vlgmr.msrb.gmra.mxu0 %v1149_v51 }
 0x2eb   : > { %v1075_v52 = vpop.permute.xlu0 %1074 }
 0x2ec   : > { %v1084_v53 = vsub.f32 %v2191_v10, %v1075_v52  ;;  %v1054_v10 = vmul.f32 1.442695, %v1050_v61 }
 0x2ee   : > { %v1090_v54 = vmul.f32 1.442695, %v1084_v53 }
 0x2f0   : > { %1877 = vpow2.f32 %v1090_v54 }
 0x2f3   : > { %v1080_v9 = vpop.permute.xlu1 %1079 }
 0x2f4   : > { %v1085_v55 = vsub.f32 %v2196_v12, %v1080_v9  ;;  %v1056_v12 = vmul.f32 1.442695, %v1051_v5 }
 0x2f6   : > { %v1878_v56 = vpop.eup %1877  ;;  %v1092_v57 = vmul.f32 1.442695, %v1085_v55 }
 0x2f7   : > { %1107 = vadd.xlane.f32.xlu0 %v1878_v56 }
 0x2f8   : > { %1879 = vpow2.f32 %v1092_v57 }
 0x2f9   : > { %1881 = vpow2.f32 %v1054_v10 }
 0x2fa   : > { %1883 = vpow2.f32 %v1056_v12 }
 0x2fb   : > { %1885 = vpow2.f32 %v1058_v0 }
 0x2fc   : > { %1887 = vpow2.f32 %v1060_v16 }
 0x2fe   : > { %v1880_v31 = vpop.eup %1879 }
 0x2ff   : > { %1109 = vadd.xlane.f32.xlu2 %v1880_v31  ;;  %v1150_v59 = vpack.c.bf16 %v1880_v31, %v1878_v56  ;;  %v1882_v62 = vpop.eup %1881 }
 0x300   : > { %v1099_v1 = vmul.f32 %v1882_v62, %v1095_v63  ;;  %v1884_v6 = vpop.eup %1883 }
 0x301   : > { %1164 = vmatmul.bf16.gmra.mxu0 %v1150_v59  ;;  %v1100_v58 = vmul.f32 %v1884_v6, %v1096_v7  ;;  %v1886_v5 = vpop.eup %1885  ;;  %v1124_v7 = vld [vmem:[%s2224_s18 + $0x18] sm:$0xff] }
 0x302   : > { %v1101_v19 = vmul.f32 %v1886_v5, %v1097_v18  ;;  %v1888_v22 = vpop.eup %1887 }
 0x303   : > { %v1102_v24 = vmul.f32 %v1888_v22, %v1098_v23 }
 0x342   : > { %v1104_v2 = vpop.xlane.xlu2 %1103 }
 0x343   : > { %v1111_v3 = vadd.f32 %v1104_v2, %v1099_v1 }
 0x345   : > { %1116 = vst.msk [vmem:[%s2214_s16] sm:$0xff] %vm628_vm2, %v1111_v3 }
 0x34a   : > { %v1106_v60 = vpop.xlane.xlu1 %1105 }
 0x34b   : > { %v1112_v61 = vadd.f32 %v1106_v60, %v1100_v58 }
 0x34c   : > { %v1189_v8 = vld [vmem:[%s2214_s16] sm:$0xff] }
 0x34d   : > { %1117 = vst.msk [vmem:[%s2214_s16 + $0x8] sm:$0xff] %vm628_vm2, %v1112_v61  ;;  %1195 = vperm.xlu2 %1867, %v1189_v8  }
 0x354   : > { %v1190_v4 = vld [vmem:[%s2214_s16 + $0x8] sm:$0xff] }
 0x355   : > { %1127 = vperm.xlu2 %1867, %v1882_v62   ;;  %1200 = vperm.xlu1 %1869, %v1190_v4  }
 0x356   : > { %v1160_v34 = vpop.f32.mrf.mxu0 }
 0x35d   : > { %1132 = vperm.xlu2 %1867, %v1884_v6   ;;  %1137 = vperm.xlu1 %1869, %v1886_v5  }
 0x35e   : > { %v1162_v45 = vpop.f32.mrf.mxu0 }
 0x36a   : > { %v1108_v17 = vpop.xlane.xlu0 %1107 }
 0x36b   : > { %v1113_v21 = vadd.f32 %v1108_v17, %v1101_v19 }
 0x36d   : > { %1118 = vst.msk [vmem:[%s2214_s16 + $0x10] sm:$0xff] %vm628_vm2, %v1113_v21 }
 0x372   : > { %v1110_v25 = vpop.xlane.xlu2 %1109 }
 0x373   : > { %v1114_v26 = vadd.f32 %v1110_v25, %v1102_v24 }
 0x374   : > { %v1191_v27 = vld [vmem:[%s2214_s16 + $0x10] sm:$0xff] }
 0x375   : > { %1119 = vst.msk [vmem:[%s2214_s16 + $0x18] sm:$0xff] %vm628_vm2, %v1114_v26  ;;  %1205 = vperm.xlu0 %1868, %v1191_v27  }
 0x37c   : > { %v1192_v28 = vld [vmem:[%s2214_s16 + $0x18] sm:$0xff] }
 0x37d   : > { %1210 = vperm.xlu2 %1867, %v1192_v28  }
 0x37e   : > { %v1165_v20 = vpop.f32.mrf.mxu0 }
 0x385   : > { %1142 = vperm.xlu2 %1867, %v1888_v22  }
 0x386   : > { %v1167_v61 = vpop.f32.mrf.mxu0 }
 0x3a7   : > { %v1196_v30 = vpop.permute.xlu2 %1195 }
 0x3a8   : > { %1889 = vrcp.f32 %v1196_v30  ;;  %vm1218_vm4 = vweird.f32 %v1196_v30  ;;  %v1224_v50 = vand.u32 2147483648, %v1196_v30  ;;  %v1222_v53 = vand.u32 2147483647, %v1196_v30 }
 0x3aa   : > { %v1225_v57 = vor.u32 1.1754944e-38, %v1224_v50  ;;  %vm1223_vm9 = vcmp.eq.f32.partialorder %v1222_v53, 8.507059e+37 }
 0x3ae   : > { %v1890_v47 = vpop.eup %1889 }
 0x3af   : > { %v1128_v35 = vpop.permute.xlu2 %1127  ;;  %v1214_v39 = vmul.f32 %v1890_v47, %v1196_v30  ;;  %vm1219_vm3 = vweird.f32 %v1890_v47 }
 0x3b0   : > { %v1145_v36 = vmul.f32 %v1128_v35, %v1121_v29  ;;  %vm1220_vm6 = vmor %vm1218_vm4, %vm1219_vm3 }
 0x3b1   : > { %v1215_v41 = vsub.f32 1.0, %v1214_v39 }
 0x3b2   : > { %v1170_v37 = vadd.f32 %v1160_v34, %v1145_v36 }
 0x3b3   : > { %v1216_v48 = vmul.f32 %v1890_v47, %v1215_v41 }
 0x3b4   : > { %1174 = vst.msk [vmem:[%s2224_s18] sm:$0xff] %vm639_vm0, %v1170_v37 }
 0x3b5   : > { %v1217_v32 = vadd.f32 %v1890_v47, %v1216_v48 }
 0x3b7   : > { %v1133_v42 = vpop.permute.xlu2 %1132  ;;  %v1221_v55 = vsel %vm1220_vm6, %v1890_v47, %v1217_v32  ;;  %v1330_v32 = vld [vmem:[%s2056_s14 + $0x10] sm:$0xff] (%p1323_p7) }
 0x3b8   : > { %v1146_v43 = vmul.f32 %v1133_v42, %v1122_v38  ;;  %v1226_v62 = vsel %vm1223_vm9, %v1225_v57, %v1221_v55 }
 0x3ba   : > { %v1171_v46 = vadd.f32 %v1162_v45, %v1146_v43 }
 0x3bb   : > { %v1185_v59 = vld [vmem:[%s2224_s18] sm:$0xff] }
 0x3bc   : > { %1175 = vst.msk [vmem:[%s2224_s18 + $0x8] sm:$0xff] %vm639_vm0, %v1171_v46  ;;  %v1227_v3 = vmul.f32 %v1226_v62, %v1185_v59  ;;  %v1275_v46 = vld [vmem:[#allocation6 + $0x10] sm:$0xff] }
 0x3c3   : > { %v1186_v63 = vld [vmem:[%s2224_s18 + $0x8] sm:$0xff] }
 0x3c7   : > { %v1201_v40 = vpop.permute.xlu1 %1200 }
 0x3c8   : > { %1891 = vrcp.f32 %v1201_v40  ;;  %v1239_v51 = vand.u32 2147483648, %v1201_v40  ;;  %v1237_v9 = vand.u32 2147483647, %v1201_v40  ;;  %vm1233_vm7 = vweird.f32 %v1201_v40 }
 0x3ca   : > { %v1240_v31 = vor.u32 1.1754944e-38, %v1239_v51  ;;  %vm1238_vm10 = vcmp.eq.f32.partialorder %v1237_v9, 8.507059e+37  ;;  %v1897_v51 = vld [vmem:[%s2422_s9] ss:$0 sm:$0xff] (%p1323_p7)  ;;  %v1331_v9 = vld [vmem:[%s2056_s14 + $0x18] sm:$0xff] (%p1323_p7) }
 0x3ce   : > { %v1892_v11 = vpop.eup %1891 }
 0x3cf   : > { %v1229_v13 = vmul.f32 %v1892_v11, %v1201_v40  ;;  %v1138_v14 = vpop.permute.xlu1 %1137  ;;  %vm1234_vm5 = vweird.f32 %v1892_v11  ;;  %v1276_v40 = vld [vmem:[#allocation6] sm:$0xff] }
 0x3d0   : > { %v1147_v15 = vmul.f32 %v1138_v14, %v1123_v49  ;;  %vm1235_vm8 = vmor %vm1233_vm7, %vm1234_vm5  ;;  %v1277_v49 = vld [vmem:[#allocation6 + $0x18] sm:$0xff]  ;;  %v1278_v14 = vld [vmem:[#allocation6 + $0x8] sm:$0xff] }
 0x3d1   : > { %v1230_v33 = vsub.f32 1.0, %v1229_v13 }
 0x3d2   : > { %v1172_v52 = vadd.f32 %v1165_v20, %v1147_v15 }
 0x3d3   : > { %v1231_v54 = vmul.f32 %v1892_v11, %v1230_v33 }
 0x3d4   : > { %1176 = vst.msk [vmem:[%s2224_s18 + $0x10] sm:$0xff] %vm639_vm0, %v1172_v52  ;;  %v1328_v52 = vld [vmem:[%s2056_s14] sm:$0xff] (%p1323_p7) }
 0x3d5   : > { %v1232_v56 = vadd.f32 %v1892_v11, %v1231_v54 }
 0x3d7   : > { %v1236_v10 = vsel %vm1235_vm8, %v1892_v11, %v1232_v56  ;;  %v1211_v12 = vpop.permute.xlu2 %1210  ;;  %v1329_v56 = vld [vmem:[%s2056_s14 + $0x8] sm:$0xff] (%p1323_p7) }
 0x3d8   : > { %v1241_v1 = vsel %vm1238_vm10, %v1240_v31, %v1236_v10  ;;  %1893 = vrcp.f32 %v1211_v12  ;;  %vm1263_vm12 = vweird.f32 %v1211_v12  ;;  %v1269_v23 = vand.u32 2147483648, %v1211_v12 }
 0x3d9   : > { %v1242_v2 = vmul.f32 %v1241_v1, %v1186_v63  ;;  %v1267_v25 = vand.u32 2147483647, %v1211_v12 }
 0x3da   : > { %v1270_v29 = vor.u32 1.1754944e-38, %v1269_v23 }
 0x3db   : > { %v1273_v6 = vpack.c.bf16 %v1242_v2, %v1227_v3  ;;  %vm1268_vm2 = vcmp.eq.f32.partialorder %v1267_v25, 8.507059e+37  ;;  %v1187_v37 = vld [vmem:[%s2224_s18 + $0x10] sm:$0xff] }
 0x3dd   : > { %1771 = vmatmul.msk.bf16.vlgmr.msra.gmra.mxu0 %vm639_vm0, %v1273_v6 }
 0x3de   : > { %v1894_v8 = vpop.eup %1893 }
 0x3df   : > { %v1143_v58 = vpop.permute.xlu2 %1142  ;;  %v1259_v4 = vmul.f32 %v1894_v8, %v1211_v12  ;;  %vm1264_vm11 = vweird.f32 %v1894_v8 }
 0x3e0   : > { %v1148_v60 = vmul.f32 %v1143_v58, %v1124_v7  ;;  %vm1265_vm14 = vmor %vm1263_vm12, %vm1264_vm11  ;;  %v1954_v7 = vmov (%p1323_p7), 128.0  }
 0x3e1   : > { %v1260_v16 = vsub.f32 1.0, %v1259_v4 }
 0x3e2   : > { %v1173_v0 = vadd.f32 %v1167_v61, %v1148_v60 }
 0x3e3   : > { %v1261_v18 = vmul.f32 %v1894_v8, %v1260_v16 }
 0x3e4   : > { %1177 = vst.msk [vmem:[%s2224_s18 + $0x18] sm:$0xff] %vm639_vm0, %v1173_v0 }
 0x3e5   : > { %v1262_v21 = vadd.f32 %v1894_v8, %v1261_v18 }
 0x3e7   : > { %v1206_v5 = vpop.permute.xlu0 %1205  ;;  %v1266_v30 = vsel %vm1265_vm14, %v1894_v8, %v1262_v21 }
 0x3e8   : > { %1895 = vrcp.f32 %v1206_v5  ;;  %v1254_v24 = vand.u32 2147483648, %v1206_v5  ;;  %v1252_v27 = vand.u32 2147483647, %v1206_v5  ;;  %vm1248_vm15 = vweird.f32 %v1206_v5 }
 0x3e9   : > { %v1271_v42 = vsel %vm1268_vm2, %v1270_v29, %v1266_v30  ;;  %1900 = vrcp.f32 (%p1323_p7), %v1954_v7 }
 0x3ea   : > { %v1255_v34 = vor.u32 1.1754944e-38, %v1254_v24  ;;  %vm1253_vm3 = vcmp.eq.f32.partialorder %v1252_v27, 8.507059e+37 }
 0x3eb   : > { %v1188_v35 = vld [vmem:[%s2224_s18 + $0x18] sm:$0xff] }
 0x3ec   : > { %v1272_v44 = vmul.f32 %v1271_v42, %v1188_v35 }
 0x3ee   : > { %v1896_v19 = vpop.eup %1895 }
 0x3ef   : > { %v1244_v17 = vmul.f32 %v1896_v19, %v1206_v5  ;;  %vm1249_vm13 = vweird.f32 %v1896_v19  ;;  %v1901_v58 = vpop.eup (%p1323_p7), %1900 }
 0x3f0   : > { %vm1250_vm1 = vmor %vm1248_vm15, %vm1249_vm13  ;;  %v1357_v60 = vmul.f32 (%p1323_p7), 128.0, %v1901_v58 }
 0x3f1   : > { %v1245_v22 = vsub.f32 1.0, %v1244_v17 }
 0x3f2   : > { %v1358_v61 = vsub.f32 (%p1323_p7), 1.0, %v1357_v60 }
 0x3f3   : > { %v1246_v26 = vmul.f32 %v1896_v19, %v1245_v22 }
 0x3f4   : > { %v1359_v8 = vmul.f32 (%p1323_p7), %v1901_v58, %v1358_v61 }
 0x3f5   : > { %v1247_v28 = vadd.f32 %v1896_v19, %v1246_v26 }
 0x3f6   : > { %v1360_v0 = vadd.f32 (%p1323_p7), %v1901_v58, %v1359_v8 }
 0x3f7   : > { %v1251_v36 = vsel %vm1250_vm1, %v1896_v19, %v1247_v28 }
 0x3f8   : > { %v1256_v38 = vsel %vm1253_vm3, %v1255_v34, %v1251_v36 }
 0x3f9   : > { %v1257_v43 = vmul.f32 %v1256_v38, %v1187_v37 }
 0x3fb   : > { %v1274_v45 = vpack.c.bf16 %v1272_v44, %v1257_v43 }
 0x3fd   : > { %1772 = vmatmul.msk.bf16.gmra.mxu0 %vm639_vm0, %v1274_v45  ;;  %vm1361_vm0 = vweird.f32 (%p1323_p7), %v1901_v58 }
 0x3fe   : > { %v1362_v4 = vsel (%p1323_p7), %vm1361_vm0, %v1901_v58, %v1360_v0 }
 0x45a   : > { %v1305_v47 = vpop.f32.mrf.mxu0 }
 0x45b   : > { %v1315_v39 = vadd.f32 %v1305_v47, %v1275_v46 }
 0x45d   : > { %1319 = vst [vmem:[#allocation6 + $0x10] sm:$0xff] %v1315_v39 }
 0x462   : > { %v1307_v41 = vpop.f32.mrf.mxu0 }
 0x463   : > { %v1316_v48 = vadd.f32 %v1307_v41, %v1276_v40 }
 0x464   : > { %v1332_v53 = vld [vmem:[#allocation6 + $0x10] sm:$0xff] (%p1323_p7) }
 0x465   : > { %1320 = vst [vmem:[#allocation6] sm:$0xff] %v1316_v48  ;;  %v1336_v54 = vadd.f32 (%p1323_p7), %v1332_v53, %v1328_v52  ;;  %v1899_v52 = vld [vmem:[%s2424_s11] ss:$0 sm:$0xff] (%p1323_p7) }
 0x467   : > { %v2356_v59 = vadd.f32 (%p1323_p7), %v1897_v51, %v1336_v54 }
 0x469   : > { %1348 = vadd.xlane.f32.xlu0 (%p1323_p7), %v2356_v59  ;;  %v1367_v62 = vmul.f32 (%p1323_p7), %v2356_v59, %v2356_v59 }
 0x46b   : > { %1371 = vadd.xlane.f32.xlu2 (%p1323_p7), %v1367_v62 }
 0x46c   : > { %v1333_v31 = vld [vmem:[#allocation6] sm:$0xff] (%p1323_p7) }
 0x46d   : > { %v1337_v10 = vadd.f32 (%p1323_p7), %v1333_v31, %v1329_v56 }
 0x46f   : > { %v2362_v63 = vadd.f32 (%p1323_p7), %v1897_v51, %v1337_v10 }
 0x471   : > { %v1368_v2 = vmul.f32 (%p1323_p7), %v2362_v63, %v2362_v63  ;;  %1350 = vadd.xlane.f32.xlu0 (%p1323_p7), %v2362_v63 }
 0x473   : > { %1373 = vadd.xlane.f32.xlu2 (%p1323_p7), %v1368_v2 }
 0x47a   : > { %v1310_v11 = vpop.f32.mrf.mxu0 }
 0x47b   : > { %v1317_v13 = vadd.f32 %v1310_v11, %v1277_v49 }
 0x47d   : > { %1321 = vst [vmem:[#allocation6 + $0x18] sm:$0xff] %v1317_v13 }
 0x481   : > { %1327 = sbr.rel (!%p1323_p7) target bundleno = 1325 (0x52d), region = 84 }
 0x482   : > { %v1312_v15 = vpop.f32.mrf.mxu0 }
 0x483   : > { %v1318_v20 = vadd.f32 %v1312_v15, %v1278_v14 }
 0x484   : > { %v1334_v33 = vld [vmem:[#allocation6 + $0x18] sm:$0xff] (%p1323_p7) }
 0x485   : > { %1322 = vst [vmem:[#allocation6 + $0x8] sm:$0xff] %v1318_v20  ;;  %v1338_v50 = vadd.f32 (%p1323_p7), %v1334_v33, %v1330_v32  ;;  %v1898_v33 = vld [vmem:[%s2423_s10] ss:$0 sm:$0xff] (%p1323_p7) }
 0x487   : > { %v2354_v57 = vadd.f32 %v1897_v51, %v1338_v50 }
 0x489   : > { %1352 = vadd.xlane.f32.xlu1 %v2354_v57  ;;  %v1369_v6 = vmul.f32 %v2354_v57, %v2354_v57 }
 0x48b   : > { %1375 = vadd.xlane.f32.xlu0 %v1369_v6 }
 0x48c   : > { %v1335_v55 = vld [vmem:[#allocation6 + $0x8] sm:$0xff] }
 0x48d   : > { %v1339_v12 = vadd.f32 %v1335_v55, %v1331_v9 }
 0x48f   : > { %v2364_v1 = vadd.f32 %v1897_v51, %v1339_v12 }
 0x491   : > { %1354 = vadd.xlane.f32.xlu1 %v2364_v1  ;;  %v1370_v3 = vmul.f32 %v2364_v1, %v2364_v1 }
 0x499   : > { %1377 = vadd.xlane.f32.xlu1 %v1370_v3 }
 0x4dc   : > { %v1349_v16 = vpop.xlane.xlu0 %1348 }
 0x4dd   : > { %v1363_v18 = vmul.f32 %v1362_v4, %v1349_v16 }
 0x4de   : > { %v1372_v19 = vpop.xlane.xlu2 %1371 }
 0x4df   : > { %v1383_v17 = vmul.f32 %v1363_v18, %v1363_v18  ;;  %v1379_v21 = vmul.f32 %v1372_v19, %v1362_v4  ;;  %v1391_v32 = vsub.f32 %v2356_v59, %v1363_v18 }
 0x4e1   : > { %v1387_v22 = vsub.f32 %v1379_v21, %v1383_v17 }
 0x4e3   : > { %v1395_v23 = vadd.f32 1e-05, %v1387_v22 }
 0x4e4   : > { %v1351_v25 = vpop.xlane.xlu0 %1350 }
 0x4e5   : > { %1902 = vrsqrt.f32 %v1395_v23  ;;  %v1364_v26 = vmul.f32 %v1362_v4, %v1351_v25  ;;  %vm1405_vm5 = vweird.f32 %v1395_v23 }
 0x4e6   : > { %v1374_v27 = vpop.xlane.xlu2 %1373 }
 0x4e7   : > { %v1384_v28 = vmul.f32 %v1364_v26, %v1364_v26  ;;  %v1380_v30 = vmul.f32 %v1374_v27, %v1362_v4  ;;  %v1392_v6 = vsub.f32 %v2362_v63, %v1364_v26 }
 0x4e9   : > { %v1388_v35 = vsub.f32 %v1380_v30, %v1384_v28 }
 0x4eb   : > { %v1903_v36 = vpop.eup %1902  ;;  %v1396_v37 = vadd.f32 1e-05, %v1388_v35 }
 0x4ec   : > { %v1400_v42 = vmul.f32 %v1903_v36, %v1395_v23  ;;  %vm1406_vm4 = vweird.f32 %v1903_v36 }
 0x4ed   : > { %1904 = vrsqrt.f32 %v1396_v37  ;;  %vm1407_vm6 = vmor %vm1405_vm5, %vm1406_vm4  ;;  %vm1415_vm8 = vweird.f32 %v1396_v37 }
 0x4ee   : > { %v1401_v39 = vmul.f32 %v1903_v36, %v1400_v42 }
 0x4f0   : > { %v1402_v48 = vmul.f32 0.5, %v1401_v39 }
 0x4f2   : > { %v1403_v13 = vsub.f32 1.5, %v1402_v48 }
 0x4f3   : > { %v1905_v14 = vpop.eup %1904 }
 0x4f4   : > { %v1404_v15 = vmul.f32 %v1903_v36, %v1403_v13  ;;  %v1410_v20 = vmul.f32 %v1905_v14, %v1396_v37  ;;  %vm1416_vm7 = vweird.f32 %v1905_v14 }
 0x4f5   : > { %vm1417_vm9 = vmor %vm1415_vm8, %vm1416_vm7 }
 0x4f6   : > { %v1408_v50 = vsel %vm1407_vm6, %v1903_v36, %v1404_v15  ;;  %v1411_v51 = vmul.f32 %v1905_v14, %v1410_v20 }
 0x4f7   : > { %v1439_v53 = vmul.f32 %v1408_v50, %v1391_v32 }
 0x4f8   : > { %v1412_v9 = vmul.f32 0.5, %v1411_v51 }
 0x4f9   : > { %v1447_v56 = vmul.f32 %v1898_v33, %v1439_v53 }
 0x4fa   : > { %v1413_v10 = vsub.f32 1.5, %v1412_v9 }
 0x4fb   : > { %v1455_v12 = vadd.f32 %v1899_v52, %v1447_v56 }
 0x4fc   : > { %v1353_v5 = vpop.xlane.xlu1 %1352  ;;  %v1414_v2 = vmul.f32 %v1905_v14, %v1413_v10 }
 0x4fd   : > { %v2376_v34 = vmul.f32 %v1362_v4, %v1353_v5  ;;  %1459 = vst [vmem:[%s2066_s20] sm:$0xff] %v1455_v12 }
 0x4fe   : > { %v1376_v45 = vpop.xlane.xlu0 %1375  ;;  %v1418_v58 = vsel %vm1417_vm9, %v1905_v14, %v1414_v2 }
 0x4ff   : > { %v1385_v46 = vmul.f32 %v2376_v34, %v2376_v34  ;;  %v1381_v47 = vmul.f32 %v1376_v45, %v1362_v4  ;;  %v1440_v61 = vmul.f32 %v1418_v58, %v1392_v6  ;;  %v1393_v18 = vsub.f32 %v2354_v57, %v2376_v34 }
 0x501   : > { %v1389_v41 = vsub.f32 %v1381_v47, %v1385_v46 }
 0x503   : > { %v1397_v11 = vadd.f32 1e-05, %v1389_v41 }
 0x504   : > { %v1355_v24 = vpop.xlane.xlu1 %1354 }
 0x505   : > { %v2374_v29 = vmul.f32 %v1362_v4, %v1355_v24  ;;  %vm1425_vm14 = vweird.f32 %v1397_v11 }
 0x507   : > { %v1386_v43 = vmul.f32 %v2374_v29, %v2374_v29  ;;  %v1394_v16 = vsub.f32 %v2364_v1, %v2374_v29 }
 0x50c   : > { %v1378_v38 = vpop.xlane.xlu1 %1377 }
 0x50d   : > { %v1382_v44 = vmul.f32 %v1378_v38, %v1362_v4  ;;  %v1448_v4 = vmul.f32 %v1898_v33, %v1440_v61 }
 0x50f   : > { %v1390_v40 = vsub.f32 %v1382_v44, %v1386_v43  ;;  %v1456_v19 = vadd.f32 %v1899_v52, %v1448_v4 }
 0x511   : > { %v1398_v49 = vadd.f32 1e-05, %v1390_v40  ;;  %1460 = vst [vmem:[%s2066_s20 + $0x8] sm:$0xff] %v1456_v19 }
 0x513   : > { %1906 = vrsqrt.f32 %v1398_v49  ;;  %vm1435_vm12 = vweird.f32 %v1398_v49 }
 0x514   : > { %1908 = vrsqrt.f32 %v1397_v11 }
 0x519   : > { %v1907_v54 = vpop.eup %1906 }
 0x51a   : > { %v1909_v55 = vpop.eup %1908  ;;  %v1430_v31 = vmul.f32 %v1907_v54, %v1398_v49  ;;  %vm1436_vm10 = vweird.f32 %v1907_v54 }
 0x51b   : > { %v1420_v59 = vmul.f32 %v1909_v55, %v1397_v11  ;;  %vm1426_vm11 = vweird.f32 %v1909_v55  ;;  %vm1437_vm13 = vmor %vm1435_vm12, %vm1436_vm10 }
 0x51c   : > { %v1431_v62 = vmul.f32 %v1907_v54, %v1430_v31  ;;  %vm1427_vm15 = vmor %vm1425_vm14, %vm1426_vm11 }
 0x51d   : > { %v1421_v3 = vmul.f32 %v1909_v55, %v1420_v59 }
 0x51e   : > { %v1432_v7 = vmul.f32 0.5, %v1431_v62 }
 0x51f   : > { %v1422_v60 = vmul.f32 0.5, %v1421_v3 }
 0x520   : > { %v1433_v8 = vsub.f32 1.5, %v1432_v7 }
 0x521   : > { %v1423_v0 = vsub.f32 1.5, %v1422_v60 }
 0x522   : > { %v1434_v5 = vmul.f32 %v1907_v54, %v1433_v8 }
 0x523   : > { %v1424_v63 = vmul.f32 %v1909_v55, %v1423_v0 }
 0x524   : > { %v1438_v17 = vsel %vm1437_vm13, %v1907_v54, %v1434_v5 }
 0x525   : > { %v1442_v21 = vmul.f32 %v1438_v17, %v1394_v16  ;;  %v1428_v22 = vsel %vm1427_vm15, %v1909_v55, %v1424_v63 }
 0x526   : > { %v1441_v23 = vmul.f32 %v1428_v22, %v1393_v18 }
 0x527   : > { %v1450_v24 = vmul.f32 %v1898_v33, %v1442_v21 }
 0x528   : > { %v1449_v25 = vmul.f32 %v1898_v33, %v1441_v23 }
 0x529   : > { %v1458_v26 = vadd.f32 %v1899_v52, %v1450_v24 }
 0x52a   : > { %v1457_v27 = vadd.f32 %v1899_v52, %v1449_v25 }
 0x52b   : > { %1462 = vst [vmem:[%s2066_s20 + $0x18] sm:$0xff] %v1458_v26 }
 0x52c   : > { %1461 = vst [vmem:[%s2066_s20 + $0x10] sm:$0xff] %v1457_v27 }
 0x52d PF: > { %s22_s25 = sadd.s32 1, %s1948_s25   ;;  %s2426_s21 = smov %s1940_s23 }
 0x52e   : > { %p19_p8 = scmp.ge.s32.totalorder %s22_s25, 18   ;;  %s2427_s22 = smov %s1944_s24 }
 0x52f   : > { %s2428_s23 = smov %s2431_s26  ;;  %s2429_s24 = smov %s2435_s27 }
 0x530   :  { %21 = sbr.rel (!%p19_p8) target bundleno = 3 (0x3), region = 132 }

// kernel: transformer_decoder_layer_forward.5
= control target key start
LH: loop header
LB: loop body
LE: loop exit
PB: predicated region body
PF: predicated region fallthrough
CT: control target
= control target key end

     0   :  { %12 = vsyncpa [#allocation3], 0  ;;  %s1431_s0 = inlined_call_operand.vmem [shape: f32[64,128], index: 0, kind: input, shape index: {}]   ;;  %s1432_s1 = inlined_call_operand.vmem [shape: bf16[128,256], index: 1, kind: input, shape index: {}]   ;;  %s1433_s2 = inlined_call_operand.vmem [shape: f32[1,256], index: 2, kind: input, shape index: {}]   ;;  %s1434_s3 = inlined_call_operand.vmem [shape: bf16[256,128], index: 3, kind: input, shape index: {}]   ;;  %s1435_s4 = inlined_call_operand.vmem [shape: f32[1,128], index: 4, kind: input, shape index: {}]   ;;  %s1436_s5 = inlined_call_operand.vmem [shape: f32[1,128], index: 5, kind: input, shape index: {}]   ;;  %s1437_s6 = inlined_call_operand.vmem [shape: f32[1,128], index: 6, kind: input, shape index: {}]   ;;  %s1438_s7 = inlined_call_operand.hbm [shape: f32[64,128], index: 7, kind: output, shape index: {}]  }
   0x1   :  { %14 = vsyncpa [#allocation3 + $0x1], 0  ;;  %s1140_s24 = smov 0   ;;  %s1142_s25 = smov 0  }
   0x2   :  { %s1144_s26 = smov 0   ;;  %s1146_s27 = smov 0  }
   0x3 LB: > { %s1161_s28 = sadd.s32 4294967295, %s1095_s27   ;;  %s805_s29 = sadd.s32 4294967294, %s1095_s27   ;;  %s1095_s27 = sphi %s1146_s27, %s1444_s27   ;;  %s1091_s26 = sphi %s1144_s26, %s1443_s26   ;;  %s1087_s25 = sphi %s1142_s25, %s1442_s25   ;;  %s1083_s24 = sphi %s1140_s24, %s1441_s24  }
   0x4   : > { %s1165_s30 = sadd.s32 1, %s1095_s27   ;;  %s179_s8 = sadd.s32 1, %s1091_s26 }
   0x5   : > { %s176_s9 = ssub.s32 %s1095_s27, %s1165_s30  ;;  %p189_p0 = scmp.ne.s32.totalorder %s1091_s26, %s1087_s25 }
   0x6   : > { %p177_p1 = scmp.eq.s32.totalorder %s176_s9, 0  ;;  %p190_p2 = scmp.eq.s32.totalorder %s1161_s28, 1 }
   0x7   : > { %p195_p3 = scmp.ne.s32.totalorder %s1087_s25, %s1083_s24  ;;  %p196_p4 = scmp.eq.s32.totalorder %s805_s29, 1 }
   0x8   : > { %s1176_s10 = scalar_select %p177_p1, %s1091_s26, %s179_s8  }
   0x9   : > { %p1178_p5 = por %p190_p2, %p189_p0  ;;  %p1182_p6 = por %p196_p4, %p195_p3 }
   0xa   : > { %p808_p7 = scmp.ge.s32.totalorder %s1095_s27, 1  ;;  %p241_p8 = scmp.lt.s32.totalorder %s1095_s27, 3 }
   0xc   : > { %p242_p9 = pnand %p808_p7, %p241_p8 }
   0xd   : > { %s810_s17 = sshll.u32 (!%p242_p9), %s1161_s28, 2  ;;  %s977_s14 = sshll.u32 (!%p242_p9), %s1161_s28, 5 }
   0xe   : > { %245 = sbr.rel (%p242_p9) target bundleno = 513 (0x201), region = 48  ;;  %p274_p10 = scmp.lt.s32.totalorder (!%p242_p9), %s810_s17, 7 }
   0xf   : > { %s739_s18 = scalar_lea.hbm (!%p242_p9), %s1438_s7, %s977_s14 }
  0x10   : > { %s742_s22 = sshll.u32 (!%p242_p9), %s739_s18, 4  ;;  %s743_s22 = int_to_ptr.hbm [resolvable:$true] %s742_s22 }
  0x11   : > { %s1047_s23 = sshra.s32 (!%p242_p9), %s743_s22, 4  ;;  %s1048_s23 = int_to_ptr.hbm [resolvable:$true] %s1047_s23 }
  0x12   : > { %s1049_s29 = scalar_lea.hbm (!%p242_p9), %s1048_s23, 32  ;;  %p1054_p0 = scmp.lt.s32.totalorder (!%p242_p9), %s1048_s23, %s1438_s7 }
  0x13   : > { %v870_v0 = vld [vmem:[%s1432_s1 + $0x70] sm:$0xf]  ;;  %v960_v1 = vld [vmem:[%s1432_s1 + $0x74] sm:$0xf0]  ;;  %v959_v2 = vld [vmem:[%s1432_s1 + $0x74] sm:$0xf]  ;;  %p1050_p11 = scmp.ne.s32.totalorder %s1048_s23, %s1049_s29 }
  0x14   : > { %v871_v3 = vor.u32 %v960_v1, %v870_v0  ;;  %v872_v4 = vld [vmem:[%s1432_s1 + $0x78] sm:$0xf0]  ;;  %v862_v5 = vld [vmem:[%s1432_s1 + $0x60] sm:$0xf]  ;;  %v958_v6 = vld [vmem:[%s1432_s1 + $0x64] sm:$0xf0] }
  0x15   : > { %v875_v7 = vor.u32 %v959_v2, %v872_v4  ;;  %v957_v8 = vld [vmem:[%s1432_s1 + $0x64] sm:$0xf]  ;;  %v864_v9 = vld [vmem:[%s1432_s1 + $0x68] sm:$0xf0]  ;;  %v863_v10 = vor.u32 %v958_v6, %v862_v5  ;;  %v854_v12 = vld [vmem:[%s1432_s1 + $0x50] sm:$0xf]  ;;  %p1051_p12 = pnand %p1050_p11, %p1178_p5 }
  0x16   : > { %388 = vmatpush.bf16.msra.mxu0 %v871_v3  ;;  %v867_v11 = vor.u32 %v957_v8, %v864_v9  ;;  %v956_v13 = vld [vmem:[%s1432_s1 + $0x54] sm:$0xf0]  ;;  %v955_v14 = vld [vmem:[%s1432_s1 + $0x54] sm:$0xf]  ;;  %v856_v15 = vld [vmem:[%s1432_s1 + $0x58] sm:$0xf0] }
  0x17   : > { %407 = vmatpush.bf16.msra.mxu1 %v875_v7  ;;  %v855_v16 = vor.u32 %v956_v13, %v854_v12  ;;  %v859_v17 = vor.u32 %v955_v14, %v856_v15  ;;  %v846_v18 = vld [vmem:[%s1432_s1 + $0x40] sm:$0xf]  ;;  %v954_v19 = vld [vmem:[%s1432_s1 + $0x44] sm:$0xf0]  ;;  %v953_v20 = vld [vmem:[%s1432_s1 + $0x44] sm:$0xf]  ;;  %p1052_p13 = pneg %p1051_p12 }
  0x18   : > { %v848_v21 = vld [vmem:[%s1432_s1 + $0x48] sm:$0xf0]  ;;  %v847_v22 = vor.u32 %v954_v19, %v846_v18  ;;  %v838_v24 = vld [vmem:[%s1432_s1 + $0x30] sm:$0xf]  ;;  %v952_v25 = vld [vmem:[%s1432_s1 + $0x34] sm:$0xf0] }
  0x19   : > { %v851_v23 = vor.u32 %v953_v20, %v848_v21  ;;  %v951_v26 = vld [vmem:[%s1432_s1 + $0x34] sm:$0xf]  ;;  %v840_v27 = vld [vmem:[%s1432_s1 + $0x38] sm:$0xf0]  ;;  %v839_v28 = vor.u32 %v952_v25, %v838_v24  ;;  %v830_v30 = vld [vmem:[%s1432_s1 + $0x20] sm:$0xf] }
  0x1a   : > { %389 = vmatpush.bf16.msra.mxu0 %v863_v10  ;;  %v843_v29 = vor.u32 %v951_v26, %v840_v27  ;;  %v950_v31 = vld [vmem:[%s1432_s1 + $0x24] sm:$0xf0]  ;;  %v949_v32 = vld [vmem:[%s1432_s1 + $0x24] sm:$0xf]  ;;  %v832_v33 = vld [vmem:[%s1432_s1 + $0x28] sm:$0xf0] }
  0x1b   : > { %408 = vmatpush.bf16.msra.mxu1 %v867_v11  ;;  %s1446_s17 = smov (!%p274_p10, %s810_s17), 7  ;;  %v831_v34 = vor.u32 %v950_v31, %v830_v30  ;;  %v968_v35 = vld [vmem:[%s1434_s3 + $0x38] sm:$0xff]  ;;  %v835_v37 = vor.u32 %v949_v32, %v832_v33  ;;  %v822_v38 = vld [vmem:[%s1432_s1 + $0x10] sm:$0xf]  ;;  %v947_v40 = vld [vmem:[%s1432_s1 + $0x14] sm:$0xf] }
  0x1c   : > { %v976_v36 = vld [vmem:[%s1434_s3 + $0x78] sm:$0xff]  ;;  %s811_s20 = sshll.u32 %s1446_s17, 3  ;;  %570 = vmatpush.bf16.msra.mxu2 %v968_v35  ;;  %v967_v42 = vld [vmem:[%s1434_s3 + $0x30] sm:$0xff]  ;;  %v814_v46 = vld [vmem:[%s1432_s1] sm:$0xf] }
  0x1d   : > { %v948_v39 = vld [vmem:[%s1432_s1 + $0x14] sm:$0xf0]  ;;  %v824_v41 = vld [vmem:[%s1432_s1 + $0x18] sm:$0xf0]  ;;  %589 = vmatpush.bf16.msra.mxu3 %v976_v36  ;;  %v975_v43 = vld [vmem:[%s1434_s3 + $0x70] sm:$0xff]  ;;  %s277_s19 = scalar_lea.vmem %s1431_s0, %s811_s20  ;;  %s1053_s20 = scalar_lea.hbm %s1438_s7, 64 }
  0x1e   : > { %390 = vmatpush.bf16.msra.mxu0 %v855_v16  ;;  %v823_v44 = vor.u32 %v948_v39, %v822_v38  ;;  %v827_v45 = vor.u32 %v947_v40, %v824_v41  ;;  %v946_v47 = vld [vmem:[%s1432_s1 + $0x4] sm:$0xf0]  ;;  %v945_v48 = vld [vmem:[%s1432_s1 + $0x4] sm:$0xf]  ;;  %v816_v49 = vld [vmem:[%s1432_s1 + $0x8] sm:$0xf0]  ;;  %p1055_p1 = scmp.lt.s32.totalorder %s1053_s20, %s1049_s29 }
  0x1f   : > { %409 = vmatpush.bf16.msra.mxu1 %v859_v17  ;;  %v966_v50 = vld [vmem:[%s1434_s3 + $0x28] sm:$0xff]  ;;  %v815_v52 = vor.u32 %v946_v47, %v814_v46  ;;  %v1306_v53 = vld [vmem:[%s277_s19] sm:$0xff]  ;;  %v819_v55 = vor.u32 %v945_v48, %v816_v49  ;;  %v1318_v59 = vld [vmem:[%s277_s19 + $0x10] sm:$0xff] }
  0x20   : > { %571 = vmatpush.bf16.msra.mxu2 %v967_v42  ;;  %v974_v51 = vld [vmem:[%s1434_s3 + $0x68] sm:$0xff]  ;;  %v965_v56 = vld [vmem:[%s1434_s3 + $0x20] sm:$0xff]  ;;  %v1320_v60 = vld [vmem:[%s277_s19 + $0x18] sm:$0xff]  ;;  %p1056_p2 = por %p1055_p1, %p1054_p0 }
  0x21   : > { %590 = vmatpush.bf16.msra.mxu3 %v975_v43  ;;  %v1308_v54 = vld [vmem:[%s277_s19 + $0x8] sm:$0xff]  ;;  %v973_v57 = vld [vmem:[%s1434_s3 + $0x60] sm:$0xff]  ;;  %v285_v61 = vpack.c.bf16 %v1320_v60, %v1318_v59  ;;  %v964_v62 = vld [vmem:[%s1434_s3 + $0x18] sm:$0xff]  ;;  %s270_s19 = sand.u32 1, %s1087_s25  }
  0x22   : > { %391 = vmatpush.bf16.msra.mxu0 %v847_v22  ;;  %v284_v58 = vpack.c.bf16 %v1308_v54, %v1306_v53  ;;  %v972_v63 = vld [vmem:[%s1434_s3 + $0x58] sm:$0xff]  ;;  %v963_v0 = vld [vmem:[%s1434_s3 + $0x10] sm:$0xff]  ;;  %v962_v2 = vld [vmem:[%s1434_s3 + $0x8] sm:$0xff]  ;;  %s809_s13 = sshll.u32 %s270_s19, 5  ;;  %s728_s28 = scalar_lea.sflag [#allocation3], %s270_s19 }
  0x23   : > { %410 = vmatpush.bf16.msra.mxu1 %v851_v23  ;;  %v971_v1 = vld [vmem:[%s1434_s3 + $0x50] sm:$0xff]  ;;  %v970_v3 = vld [vmem:[%s1434_s3 + $0x48] sm:$0xff]  ;;  %v961_v4 = vld [vmem:[%s1434_s3] sm:$0xff]  ;;  %s1388_s17 = scalar_lea.vmem [#allocation2], %s809_s13  ;;  %p1057_p3 = pnand %p1056_p2, %p1052_p13 }
  0x24   : > { %572 = vmatpush.bf16.msra.mxu2 %v966_v50  ;;  %v969_v5 = vld [vmem:[%s1434_s3 + $0x40] sm:$0xff]  ;;  %s740_s21 = sshll.u32 %s1388_s17, 4  ;;  %s741_s21 = int_to_ptr.vmem [resolvable:$true] %s740_s21 }
  0x25   : > { %591 = vmatpush.bf16.msra.mxu3 %v974_v51  ;;  %v302_v6 = vld [vmem:[%s1433_s2] sm:$0x3] }
  0x26   : > { %392 = vmatpush.bf16.msra.mxu0 %v839_v28  ;;  %v304_v9 = vperm.slane %v302_v6, 0  ;;  %v305_v10 = vperm.slane %v302_v6, 1 }
  0x27   : > { %411 = vmatpush.bf16.msra.mxu1 %v843_v29 }
  0x28   : > { %573 = vmatpush.bf16.msra.mxu2 %v965_v56 }
  0x29   : > { %592 = vmatpush.bf16.msra.mxu3 %v973_v57 }
  0x2a   : > { %393 = vmatpush.bf16.msra.mxu0 %v831_v34 }
  0x2b   : > { %412 = vmatpush.bf16.msra.mxu1 %v835_v37  ;;  %v1020_v37 = vld [vmem:[%s1435_s4] ss:$0 sm:$0xff] }
  0x2c   : > { %574 = vmatpush.bf16.msra.mxu2 %v964_v62 }
  0x2d   : > { %593 = vmatpush.bf16.msra.mxu3 %v972_v63 }
  0x2e   : > { %394 = vmatpush.bf16.msra.mxu0 %v823_v44 }
  0x2f   : > { %413 = vmatpush.bf16.msra.mxu1 %v827_v45 }
  0x30   : > { %575 = vmatpush.bf16.msra.mxu2 %v963_v0 }
  0x31   : > { %594 = vmatpush.bf16.msra.mxu3 %v971_v1 }
  0x32   : > { %395 = vmatpush.bf16.msra.mxu0 %v815_v52 }
  0x33   : > { %414 = vmatpush.bf16.msra.mxu1 %v819_v55 }
  0x34   : > { %576 = vmatpush.bf16.msra.mxu2 %v962_v2 }
  0x35   : > { %396 = vmatmul.bf16.vlgmr.msra.gmra.mxu0 %v284_v58  ;;  %595 = vmatpush.bf16.msra.mxu3 %v970_v3 }
  0x36   : > { %415 = vmatmul.bf16.vlgmr.msra.gmra.mxu1 %v284_v58 }
  0x38   : > { %577 = vmatpush.bf16.msra.mxu2 %v961_v4 }
  0x39   : > { %596 = vmatpush.bf16.msra.mxu3 %v969_v5 }
  0x45   : > { %401 = vmatmul.bf16.gmra.mxu0 %v285_v61 }
  0x46   : > { %420 = vmatmul.bf16.gmra.mxu1 %v285_v61 }
  0xb2   : > { %v397_v7 = vpop.f32.mrf.mxu0 }
  0xb3   : > { %v416_v8 = vpop.f32.mrf.mxu1  ;;  %v398_v11 = vadd.f32 %v397_v7, %v304_v9 }
  0xb4   : > { %v417_v12 = vadd.f32 %v416_v8, %v305_v10 }
  0xb5   : > { %v426_v17 = vmax.f32 %v398_v11, 0.0 }
  0xb6   : > { %v427_v19 = vmax.f32 %v417_v12, 0.0 }
  0xba   : > { %v399_v13 = vpop.f32.mrf.mxu0 }
  0xbb   : > { %v400_v14 = vadd.f32 %v399_v13, %v304_v9  ;;  %v418_v15 = vpop.f32.mrf.mxu1 }
  0xbc   : > { %v419_v16 = vadd.f32 %v418_v15, %v305_v10 }
  0xbd   : > { %v428_v18 = vmax.f32 %v400_v14, 0.0 }
  0xbe   : > { %v429_v20 = vmax.f32 %v419_v16, 0.0 }
  0xbf   : > { %v434_v21 = vpack.c.bf16 %v428_v18, %v426_v17 }
  0xc0   : > { %v435_v22 = vpack.c.bf16 %v429_v20, %v427_v19 }
  0xc1   : > { %578 = vmatmul.bf16.vlgmr.msra.gmra.mxu2 %v434_v21 }
  0xc2   : > { %597 = vmatmul.bf16.vlgmr.msra.gmra.mxu3 %v435_v22  ;;  %v402_v23 = vpop.f32.mrf.mxu0 }
  0xc3   : > { %v421_v24 = vpop.f32.mrf.mxu1  ;;  %v403_v25 = vadd.f32 %v402_v23, %v304_v9 }
  0xc4   : > { %v422_v26 = vadd.f32 %v421_v24, %v305_v10 }
  0xc5   : > { %v430_v31 = vmax.f32 %v403_v25, 0.0 }
  0xc6   : > { %v431_v33 = vmax.f32 %v422_v26, 0.0 }
  0xca   : > { %v404_v27 = vpop.f32.mrf.mxu0 }
  0xcb   : > { %v405_v28 = vadd.f32 %v404_v27, %v304_v9  ;;  %v423_v29 = vpop.f32.mrf.mxu1 }
  0xcc   : > { %v424_v30 = vadd.f32 %v423_v29, %v305_v10 }
  0xcd   : > { %v432_v32 = vmax.f32 %v405_v28, 0.0 }
  0xce   : > { %v433_v34 = vmax.f32 %v424_v30, 0.0 }
  0xcf   : > { %v436_v35 = vpack.c.bf16 %v432_v32, %v430_v31 }
  0xd0   : > { %v437_v36 = vpack.c.bf16 %v433_v34, %v431_v33 }
  0xd1   : > { %583 = vmatmul.bf16.gmra.mxu2 %v436_v35 }
  0xd2   : > { %602 = vmatmul.bf16.gmra.mxu3 %v437_v36  ;;  %v1021_v36 = vld [vmem:[%s1436_s5] ss:$0 sm:$0xff] }
 0x144   : > { %v579_v38 = vpop.f32.mrf.mxu2 }
 0x145   : > { %v580_v39 = vadd.f32 %v1020_v37, %v579_v38  ;;  %v598_v40 = vpop.f32.mrf.mxu3 }
 0x147   : > { %v599_v41 = vadd.f32 %v598_v40, %v580_v39  ;;  %v1022_v39 = vld [vmem:[%s1437_s6] ss:$0 sm:$0xff] }
 0x149   : > { %v1355_v42 = vadd.f32 %v599_v41, %v1306_v53 }
 0x14b   : > { %612 = vadd.xlane.f32.xlu0 %v1355_v42  ;;  %v631_v43 = vmul.f32 %v1355_v42, %v1355_v42 }
 0x14c   : > { %v581_v44 = vpop.f32.mrf.mxu2 }
 0x14d   : > { %v582_v45 = vadd.f32 %v1020_v37, %v581_v44  ;;  %v600_v46 = vpop.f32.mrf.mxu3  ;;  %635 = vadd.xlane.f32.xlu2 %v631_v43 }
 0x14f   : > { %v601_v47 = vadd.f32 %v600_v46, %v582_v45 }
 0x151   : > { %v1361_v48 = vadd.f32 %v601_v47, %v1308_v54 }
 0x153   : > { %614 = vadd.xlane.f32.xlu0 %v1361_v48  ;;  %v632_v49 = vmul.f32 %v1361_v48, %v1361_v48 }
 0x154   : > { %v584_v50 = vpop.f32.mrf.mxu2 }
 0x155   : > { %v585_v51 = vadd.f32 %v1020_v37, %v584_v50  ;;  %v603_v52 = vpop.f32.mrf.mxu3  ;;  %637 = vadd.xlane.f32.xlu2 %v632_v49 }
 0x157   : > { %v604_v53 = vadd.f32 %v603_v52, %v585_v51 }
 0x159   : > { %v1367_v55 = vadd.f32 %v604_v53, %v1318_v59  ;;  %v1097_v59 = vmov 128.0  }
 0x15a   : > { %1023 = vrcp.f32 %v1097_v59 }
 0x15b   : > { %616 = vadd.xlane.f32.xlu1 %v1367_v55  ;;  %v633_v56 = vmul.f32 %v1367_v55, %v1367_v55 }
 0x15c   : > { %v586_v54 = vpop.f32.mrf.mxu2 }
 0x15d   : > { %v587_v57 = vadd.f32 %v1020_v37, %v586_v54  ;;  %639 = vadd.xlane.f32.xlu0 %v633_v56  ;;  %v605_v58 = vpop.f32.mrf.mxu3 }
 0x15f   : > { %v606_v61 = vadd.f32 %v605_v58, %v587_v57 }
 0x160   : > { %v1024_v0 = vpop.eup %1023 }
 0x161   : > { %v1373_v62 = vadd.f32 %v606_v61, %v1320_v60  ;;  %v621_v1 = vmul.f32 128.0, %v1024_v0  ;;  %vm625_vm0 = vweird.f32 %v1024_v0 }
 0x163   : > { %618 = vadd.xlane.f32.xlu1 %v1373_v62  ;;  %v634_v63 = vmul.f32 %v1373_v62, %v1373_v62  ;;  %v622_v2 = vsub.f32 1.0, %v621_v1 }
 0x165   : > { %v623_v3 = vmul.f32 %v1024_v0, %v622_v2 }
 0x167   : > { %v624_v4 = vadd.f32 %v1024_v0, %v623_v3 }
 0x169   : > { %v626_v5 = vsel %vm625_vm0, %v1024_v0, %v624_v4 }
 0x16b   : > { %641 = vadd.xlane.f32.xlu1 %v634_v63 }
 0x1be   : > { %v613_v6 = vpop.xlane.xlu0 %612 }
 0x1bf   : > { %v627_v7 = vmul.f32 %v626_v5, %v613_v6 }
 0x1c0   : > { %v636_v8 = vpop.xlane.xlu2 %635 }
 0x1c1   : > { %v647_v60 = vmul.f32 %v627_v7, %v627_v7  ;;  %v643_v9 = vmul.f32 %v636_v8, %v626_v5  ;;  %v655_v35 = vsub.f32 %v1355_v42, %v627_v7 }
 0x1c3   : > { %v651_v10 = vsub.f32 %v643_v9, %v647_v60 }
 0x1c5   : > { %v659_v11 = vadd.f32 1e-05, %v651_v10 }
 0x1c6   : > { %v615_v12 = vpop.xlane.xlu0 %614 }
 0x1c7   : > { %1025 = vrsqrt.f32 %v659_v11  ;;  %v628_v13 = vmul.f32 %v626_v5, %v615_v12  ;;  %vm669_vm2 = vweird.f32 %v659_v11 }
 0x1c8   : > { %v638_v14 = vpop.xlane.xlu2 %637 }
 0x1c9   : > { %v648_v15 = vmul.f32 %v628_v13, %v628_v13  ;;  %v644_v16 = vmul.f32 %v638_v14, %v626_v5  ;;  %v656_v51 = vsub.f32 %v1361_v48, %v628_v13 }
 0x1cb   : > { %v652_v17 = vsub.f32 %v644_v16, %v648_v15 }
 0x1cd   : > { %v1026_v18 = vpop.eup %1025  ;;  %v660_v19 = vadd.f32 1e-05, %v652_v17 }
 0x1ce   : > { %v664_v20 = vmul.f32 %v1026_v18, %v659_v11  ;;  %v617_v21 = vpop.xlane.xlu1 %616  ;;  %vm670_vm1 = vweird.f32 %v1026_v18 }
 0x1cf   : > { %1027 = vrsqrt.f32 %v660_v19  ;;  %v629_v22 = vmul.f32 %v626_v5, %v617_v21  ;;  %vm671_vm3 = vmor %vm669_vm2, %vm670_vm1  ;;  %vm679_vm5 = vweird.f32 %v660_v19 }
 0x1d0   : > { %v665_v23 = vmul.f32 %v1026_v18, %v664_v20  ;;  %v640_v24 = vpop.xlane.xlu0 %639 }
 0x1d1   : > { %v649_v25 = vmul.f32 %v629_v22, %v629_v22  ;;  %v645_v26 = vmul.f32 %v640_v24, %v626_v5  ;;  %v657_v48 = vsub.f32 %v1367_v55, %v629_v22 }
 0x1d2   : > { %v666_v27 = vmul.f32 0.5, %v665_v23 }
 0x1d3   : > { %v653_v28 = vsub.f32 %v645_v26, %v649_v25 }
 0x1d4   : > { %v667_v29 = vsub.f32 1.5, %v666_v27 }
 0x1d5   : > { %v1028_v30 = vpop.eup %1027  ;;  %v661_v31 = vadd.f32 1e-05, %v653_v28 }
 0x1d6   : > { %v668_v32 = vmul.f32 %v1026_v18, %v667_v29  ;;  %v674_v33 = vmul.f32 %v1028_v30, %v660_v19  ;;  %v619_v34 = vpop.xlane.xlu1 %618  ;;  %vm680_vm4 = vweird.f32 %v1028_v30 }
 0x1d7   : > { %1029 = vrsqrt.f32 %v661_v31  ;;  %v630_v44 = vmul.f32 %v626_v5, %v619_v34  ;;  %vm681_vm6 = vmor %vm679_vm5, %vm680_vm4  ;;  %vm689_vm8 = vweird.f32 %v661_v31 }
 0x1d8   : > { %v672_v37 = vsel %vm671_vm3, %v1026_v18, %v668_v32  ;;  %v675_v38 = vmul.f32 %v1028_v30, %v674_v33 }
 0x1d9   : > { %v703_v40 = vmul.f32 %v672_v37, %v655_v35  ;;  %v650_v52 = vmul.f32 %v630_v44, %v630_v44  ;;  %v658_v55 = vsub.f32 %v1373_v62, %v630_v44 }
 0x1da   : > { %v676_v41 = vmul.f32 0.5, %v675_v38 }
 0x1db   : > { %v711_v43 = vmul.f32 %v1021_v36, %v703_v40 }
 0x1dc   : > { %v677_v45 = vsub.f32 1.5, %v676_v41 }
 0x1dd   : > { %v1030_v42 = vpop.eup %1029  ;;  %v719_v46 = vadd.f32 %v1022_v39, %v711_v43 }
 0x1de   : > { %v678_v47 = vmul.f32 %v1028_v30, %v677_v45  ;;  %v684_v49 = vmul.f32 %v1030_v42, %v661_v31  ;;  %v642_v50 = vpop.xlane.xlu1 %641  ;;  %vm690_vm7 = vweird.f32 %v1030_v42 }
 0x1df   : > { %723 = vst [vmem:[%s1388_s17] sm:$0xff] %v719_v46  ;;  %v646_v53 = vmul.f32 %v642_v50, %v626_v5  ;;  %vm691_vm9 = vmor %vm689_vm8, %vm690_vm7 }
 0x1e0   : > { %v682_v56 = vsel %vm681_vm6, %v1028_v30, %v678_v47  ;;  %v685_v54 = vmul.f32 %v1030_v42, %v684_v49 }
 0x1e1   : > { %v704_v57 = vmul.f32 %v682_v56, %v656_v51  ;;  %v654_v58 = vsub.f32 %v646_v53, %v650_v52 }
 0x1e2   : > { %v686_v61 = vmul.f32 0.5, %v685_v54 }
 0x1e3   : > { %v712_v63 = vmul.f32 %v1021_v36, %v704_v57  ;;  %v662_v59 = vadd.f32 1e-05, %v654_v58 }
 0x1e4   : > { %v687_v0 = vsub.f32 1.5, %v686_v61 }
 0x1e5   : > { %v720_v1 = vadd.f32 %v1022_v39, %v712_v63  ;;  %1031 = vrsqrt.f32 %v662_v59  ;;  %vm699_vm11 = vweird.f32 %v662_v59 }
 0x1e6   : > { %v688_v2 = vmul.f32 %v1030_v42, %v687_v0 }
 0x1e7   : > { %724 = vst [vmem:[%s1388_s17 + $0x8] sm:$0xff] %v720_v1 }
 0x1e8   : > { %v692_v3 = vsel %vm691_vm9, %v1030_v42, %v688_v2 }
 0x1e9   : > { %v705_v4 = vmul.f32 %v692_v3, %v657_v48 }
 0x1eb   : > { %v1032_v5 = vpop.eup %1031  ;;  %v713_v6 = vmul.f32 %v1021_v36, %v705_v4 }
 0x1ec   : > { %v694_v7 = vmul.f32 %v1032_v5, %v662_v59  ;;  %vm700_vm10 = vweird.f32 %v1032_v5 }
 0x1ed   : > { %v721_v8 = vadd.f32 %v1022_v39, %v713_v6  ;;  %vm701_vm12 = vmor %vm699_vm11, %vm700_vm10 }
 0x1ee   : > { %v695_v60 = vmul.f32 %v1032_v5, %v694_v7 }
 0x1ef   : > { %725 = vst [vmem:[%s1388_s17 + $0x10] sm:$0xff] %v721_v8 }
 0x1f0   : > { %v696_v9 = vmul.f32 0.5, %v695_v60 }
 0x1f2   : > { %v697_v10 = vsub.f32 1.5, %v696_v9 }
 0x1f4   : > { %v698_v11 = vmul.f32 %v1032_v5, %v697_v10 }
 0x1f6   : > { %v702_v12 = vsel %vm701_vm12, %v1032_v5, %v698_v11 }
 0x1f7   : > { %v706_v13 = vmul.f32 %v702_v12, %v658_v55 }
 0x1f9   : > { %v714_v14 = vmul.f32 %v1021_v36, %v706_v13 }
 0x1fb   : > { %v722_v15 = vadd.f32 %v1022_v39, %v714_v14 }
 0x1fd   : > { %726 = vst [vmem:[%s1388_s17 + $0x18] sm:$0xff] %v722_v15 }
 0x1fe   : > { %1060 = shalt.err (!%p1057_p3)
}
 0x1ff   : > { %s1098_s19 = smov 128   ;;  %s1099_s17 = smov 8  }
 0x200   : > { %978 = dma.vmem_to_hbm [thread:$0]  (%p1178_p5), %s741_s21, 512, %s743_s22, %s728_s28, %s1098_s19, %s1098_s19, %s1099_s17  }
 0x201 PF: > { %p984_p4 = scmp.ge.s32.totalorder %s1095_s27, 2  ;;  %s757_s15 = sand.u32 1, %s1083_s24  }
 0x202   : > { %s758_s16 = scalar_lea.sflag [#allocation3], %s757_s15 }
 0x203   : > { %p981_p7 = pnand %p984_p4, %p1182_p6 }
 0x205   : > { %p982_p8 = pneg %p981_p7 }
 0x207   : > { %1078 = dma.done.wait (%p982_p8), %s758_s16, 512  }
 0x208   : > { %1080 = vsyncadd (%p982_p8), %s758_s16, 4294966784  ;;  %p17_p9 = scmp.ge.s32.totalorder %s1165_s30, 4   ;;  %s1441_s24 = smov %s1087_s25 }
 0x209   : > { %s1442_s25 = smov %s1091_s26  ;;  %s1443_s26 = smov %s1176_s10 }
 0x20a   : > { %s1444_s27 = smov %s1165_s30  ;;  %19 = sbr.rel (!%p17_p9) target bundleno = 3 (0x3), region = 83 }
 0x20f   :  { %764 = vsyncpa [#allocation3], 1 }
 0x210   :  { %766 = vsyncpa [#allocation3 + $0x1], 1 }

// kernel: transformer_decoder_layer_forward.3
= control target key start
LH: loop header
LB: loop body
LE: loop exit
PB: predicated region body
PF: predicated region fallthrough
CT: control target
= control target key end

     0   :  { %s1850_s21 = smov 0   ;;  %s1852_s22 = smov 0   ;;  %s2211_s0 = inlined_call_operand.vmem [shape: f32[2,32,128], index: 0, kind: input, shape index: {}, may-alias: {0,1}]   ;;  %s2212_s1 = inlined_call_operand.vmem [shape: f32[2,32,128], index: 1, kind: input, shape index: {}, may-alias: {0,1}]   ;;  %s2213_s2 = inlined_call_operand.vmem [shape: bf16[8,128,16], index: 2, kind: input, shape index: {}]   ;;  %s2214_s3 = inlined_call_operand.vmem [shape: f32[8,1,16], index: 3, kind: input, shape index: {}]   ;;  %s2215_s4 = inlined_call_operand.vmem [shape: bf16[8,128,16], index: 4, kind: input, shape index: {}]   ;;  %s2216_s5 = inlined_call_operand.vmem [shape: f32[8,1,16], index: 5, kind: input, shape index: {}]   ;;  %s2217_s6 = inlined_call_operand.vmem [shape: bf16[8,128,16], index: 6, kind: input, shape index: {}]   ;;  %s2218_s7 = inlined_call_operand.vmem [shape: f32[8,1,16], index: 7, kind: input, shape index: {}]   ;;  %s2219_s8 = inlined_call_operand.vmem [shape: bf16[8,16,128], index: 8, kind: input, shape index: {}]   ;;  %s2220_s9 = inlined_call_operand.vmem [shape: f32[1,128], index: 9, kind: input, shape index: {}]   ;;  %s2221_s10 = inlined_call_operand.vmem [shape: f32[1,128], index: 10, kind: input, shape index: {}]   ;;  %s2222_s11 = inlined_call_operand.vmem [shape: f32[1,128], index: 11, kind: input, shape index: {}]   ;;  %s2223_s12 = inlined_call_operand.vmem [shape: f32[2,32,128], index: 12, kind: output, shape index: {}]  }
   0x1   :  { %2224 = sst [smem:[#allocation7_spill]] %s2211_s0  ;;  %s1854_s23 = smov 0  }
   0x2   :  { %s1856_s24 = smov 0   ;;  %s1858_s25 = smov 0  }
   0x3 LB: > { %s37_s26 = sadd.s32 1, %s1770_s23  ;;  %s48_s27 = sadd.s32 1, %s1774_s24  ;;  %s1778_s25 = sphi %s1858_s25, %s22_s25   ;;  %s1774_s24 = sphi %s1856_s24, %s2231_s24   ;;  %s1770_s23 = sphi %s1854_s23, %s2230_s23   ;;  %s1766_s22 = sphi %s1852_s22, %s2229_s22   ;;  %s1762_s21 = sphi %s1850_s21, %s2228_s21  }
   0x4   : > { %p38_p0 = scmp.ge.s32.totalorder %s37_s26, 8  ;;  %p1475_p1 = scmp.ge.s32.totalorder %s1778_s25, 1 }
   0x5   : > { %p414_p2 = scmp.lt.s32.totalorder %s1778_s25, 17 }
   0x6   : > { %s2233_s26 = smov (%p38_p0, %s37_s26), 0  ;;  %s2235_s27 = smov (!%p38_p0, %s48_s27), %s1774_s24 }
   0x7   : > { %p415_p3 = pnand %p1475_p1, %p414_p2  ;;  %p50_p4 = scmp.ge.s32.totalorder %s2235_s27, 2 }
   0x8   : > { %p474_p5 = scmp.lt.s32.totalorder (!%p415_p3), %s1766_s22, 1  ;;  %p505_p6 = scmp.eq.s32.totalorder (!%p415_p3), %s1762_s21, 0 }
   0x9   : > { %s2237_s27 = smov (%p50_p4, %s2235_s27), 0  ;;  %418 = sbr.rel (%p415_p3) target bundleno = 1187 (0x4a3), region = 68 }
   0xa   : > { %s2225_s0 = sld [smem:[#allocation7_spill]] (!%p415_p3) }
   0xe   : > { %s2239_s22 = smov (!%p474_p5, %s1766_s22), 1  ;;  %509 = sbr.rel (!%p505_p6) target bundleno = 19 (0x13), region = 72  ;;  %v1780_v0 = vmov (%p505_p6), 0.0  }
   0xf   : > { %s1613_s28 = sshll.u32 %s2239_s22, 5  ;;  %510 = vst [vmem:[#allocation6 + $0x10] sm:$0xff] (%p505_p6), %v1780_v0 }
  0x10   : > { %s1886_s13 = scalar_lea.vmem %s2225_s0, %s1613_s28  ;;  %s1891_s16 = scalar_lea.vmem %s2212_s1, %s1613_s28  ;;  %511 = vst [vmem:[#allocation6] sm:$0xff] (%p505_p6), %v1780_v0 }
  0x11   : > { %s1896_s19 = scalar_lea.vmem %s2223_s12, %s1613_s28  ;;  %512 = vst [vmem:[#allocation6 + $0x18] sm:$0xff] (%p505_p6), %v1780_v0 }
  0x12   : > { %513 = vst [vmem:[#allocation6 + $0x8] sm:$0xff] (%p505_p6), %v1780_v0 }
  0x13 PF: > { %s1899_s20 = sshll.u32 %s1762_s21, 6  ;;  %s669_s30 = scalar_lea.vmem %s2216_s5, %s1762_s21  ;;  %v644_v16 = vld [vmem:[%s1891_s16] sm:$0xff]  ;;  %v645_v17 = vld [vmem:[%s1891_s16 + $0x8] sm:$0xff]  ;;  %v646_v23 = vld [vmem:[%s1891_s16 + $0x10] sm:$0xff]  ;;  %vm621_vm0 = vcmask 125952   ;;  %vm639_vm1 = vcmask 130048  }
  0x14   : > { %s652_s15 = scalar_lea.vmem %s2215_s4, %s1899_s20  ;;  %s1913_s0 = scalar_lea.vmem %s2213_s2, %s1899_s20  ;;  %v517_v19 = vld [vmem:[%s1886_s13] sm:$0xff]  ;;  %v518_v20 = vld [vmem:[%s1886_s13 + $0x8] sm:$0xff]  ;;  %v1927_v21 = vpack.c.bf16 %v645_v17, %v644_v16  ;;  %v647_v24 = vld [vmem:[%s1891_s16 + $0x18] sm:$0xff]  ;;  %vm890_vm2 = vcmask 261120   ;;  %vm628_vm3 = vcmask 7168  }
  0x15   : > { %v1635_v1 = vld [vmem:[%s652_s15 + $0x38] sm:$0xff]  ;;  %v1634_v3 = vld [vmem:[%s652_s15 + $0x30] sm:$0xff]  ;;  %v1633_v5 = vld [vmem:[%s652_s15 + $0x28] sm:$0xff]  ;;  %v521_v22 = vpack.c.bf16 %v518_v20, %v517_v19  ;;  %s542_s14 = scalar_lea.vmem %s2214_s3, %s1762_s21  ;;  %v1938_v27 = vpack.c.bf16 %v647_v24, %v646_v23  ;;  %s1967_s18 = scalar_lea.vmem %s2217_s6, %s1899_s20 }
  0x16   : > { %v1625_v2 = vld [vmem:[%s1913_s0 + $0x38] sm:$0xff]  ;;  %722 = vmatpush.bf16.msra.mxu1 %v1635_v1  ;;  %v1624_v4 = vld [vmem:[%s1913_s0 + $0x30] sm:$0xff]  ;;  %v1623_v6 = vld [vmem:[%s1913_s0 + $0x28] sm:$0xff]  ;;  %s1978_s20 = sshll.u32 %s1762_s21, 5  ;;  %s1648_s17 = sshll.u32 %s1762_s21, 3 }
  0x17   : > { %595 = vmatpush.bf16.msra.mxu0 %v1625_v2  ;;  %v1632_v7 = vld [vmem:[%s652_s15 + $0x20] sm:$0xff]  ;;  %v1631_v9 = vld [vmem:[%s652_s15 + $0x18] sm:$0xff]  ;;  %v1630_v11 = vld [vmem:[%s652_s15 + $0x10] sm:$0xff]  ;;  %s1987_s22 = scalar_lea.vmem [#allocation3], %s1978_s20  ;;  %s2025_s16 = scalar_lea.vmem [#allocation5], %s1978_s20 }
  0x18   : > { %v1622_v8 = vld [vmem:[%s1913_s0 + $0x20] sm:$0xff]  ;;  %v1621_v10 = vld [vmem:[%s1913_s0 + $0x18] sm:$0xff]  ;;  %v1620_v12 = vld [vmem:[%s1913_s0 + $0x10] sm:$0xff]  ;;  %p1190_p7 = scmp.eq.s32.totalorder %s1762_s21, 7 }
  0x19   : > { %v1629_v13 = vld [vmem:[%s652_s15 + $0x8] sm:$0xff]  ;;  %v1628_v15 = vld [vmem:[%s652_s15] sm:$0xff]  ;;  %v519_v25 = vld [vmem:[%s1886_s13 + $0x10] sm:$0xff] }
  0x1a   : > { %723 = vmatpush.bf16.msra.mxu1 %v1634_v3  ;;  %v1619_v14 = vld [vmem:[%s1913_s0 + $0x8] sm:$0xff]  ;;  %v1618_v18 = vld [vmem:[%s1913_s0] sm:$0xff]  ;;  %v520_v26 = vld [vmem:[%s1886_s13 + $0x18] sm:$0xff]  ;;  %s1626_s0 = sshll.u32 %s1762_s21, 4  ;;  %v1781_v3 = vmov -inf  }
  0x1b   : > { %596 = vmatpush.bf16.msra.mxu0 %v1624_v4  ;;  %v522_v28 = vpack.c.bf16 %v520_v26, %v519_v25  ;;  %v1701_v29 = vld [vmem:[%s542_s14] ss:$0 sm:$0xff]  ;;  %s1942_s28 = scalar_lea.vmem [#allocation2], %s1626_s0  ;;  %v1644_v57 = vld [vmem:[%s1967_s18 + $0x38] sm:$0xff]  ;;  %v1643_v58 = vld [vmem:[%s1967_s18 + $0x30] sm:$0xff]  ;;  %629 = vst.msk [vmem:[%s1987_s22] sm:$0xff] %vm628_vm3, %v1781_v3  ;;  %s761_s0 = scalar_lea.vmem %s2218_s7, %s1762_s21 }
  0x1c   : > { %v1700_v42 = vld [vmem:[%s669_s30] ss:$0 sm:$0xff]  ;;  %814 = vmatpush.bf16.msra.mxu2 %v1644_v57  ;;  %v1642_v60 = vld [vmem:[%s1967_s18 + $0x28] sm:$0xff]  ;;  %v1640_v0 = vld [vmem:[%s1967_s18 + $0x18] sm:$0xff]  ;;  %630 = vst.msk [vmem:[%s1987_s22 + $0x8] sm:$0xff] %vm628_vm3, %v1781_v3 }
  0x1d   : > { %v1641_v62 = vld [vmem:[%s1967_s18 + $0x20] sm:$0xff]  ;;  %v1639_v2 = vld [vmem:[%s1967_s18 + $0x10] sm:$0xff]  ;;  %631 = vst.msk [vmem:[%s1987_s22 + $0x10] sm:$0xff] %vm628_vm3, %v1781_v3 }
  0x1e   : > { %724 = vmatpush.bf16.msra.mxu1 %v1633_v5  ;;  %632 = vst.msk [vmem:[%s1987_s22 + $0x18] sm:$0xff] %vm628_vm3, %v1781_v3  ;;  %v1638_v5 = vld [vmem:[%s1967_s18 + $0x8] sm:$0xff] }
  0x1f   : > { %597 = vmatpush.bf16.msra.mxu0 %v1623_v6 }
  0x20   : > { %815 = vmatpush.bf16.msra.mxu2 %v1643_v58 }
  0x22   : > { %725 = vmatpush.bf16.msra.mxu1 %v1632_v7  ;;  %v1637_v7 = vld [vmem:[%s1967_s18] sm:$0xff] }
  0x23   : > { %598 = vmatpush.bf16.msra.mxu0 %v1622_v8  ;;  %v887_v16 = vld [vmem:[%s1987_s22 + $0x8] sm:$0xff] }
  0x24   : > { %816 = vmatpush.bf16.msra.mxu2 %v1642_v60  ;;  %v2051_v20 = vld [vmem:[%s1987_s22 + $0x10] sm:$0xff] }
  0x25   : > { %v2063_v24 = vld [vmem:[%s1987_s22 + $0x18] sm:$0xff] }
  0x26   : > { %726 = vmatpush.bf16.msra.mxu1 %v1631_v9 }
  0x27   : > { %599 = vmatpush.bf16.msra.mxu0 %v1621_v10  ;;  %v1782_v10 = vmov 0  }
  0x28   : > { %817 = vmatpush.bf16.msra.mxu2 %v1641_v62  ;;  %1697 = vset.pattern.permute.xlu2 %v1782_v10 }
  0x29   : > { %1698 = vset.pattern.permute.xlu0 %v1782_v10  ;;  %1699 = vset.pattern.permute.xlu1 %v1782_v10 }
  0x2a   : > { %727 = vmatpush.bf16.msra.mxu1 %v1630_v11  ;;  %v1783_v11 = vmov 0.0  }
  0x2b   : > { %600 = vmatpush.bf16.msra.mxu0 %v1620_v12  ;;  %640 = vst.msk [vmem:[%s2025_s16] sm:$0xff] %vm639_vm1, %v1783_v11  ;;  %v2036_v12 = vld [vmem:[%s1987_s22] sm:$0xff] }
  0x2c   : > { %818 = vmatpush.bf16.msra.mxu2 %v1640_v0  ;;  %641 = vst.msk [vmem:[%s2025_s16 + $0x8] sm:$0xff] %vm639_vm1, %v1783_v11 }
  0x2d   : > { %642 = vst.msk [vmem:[%s2025_s16 + $0x10] sm:$0xff] %vm639_vm1, %v1783_v11 }
  0x2e   : > { %728 = vmatpush.bf16.msra.mxu1 %v1629_v13  ;;  %643 = vst.msk [vmem:[%s2025_s16 + $0x18] sm:$0xff] %vm639_vm1, %v1783_v11 }
  0x2f   : > { %601 = vmatpush.bf16.msra.mxu0 %v1619_v14 }
  0x30   : > { %819 = vmatpush.bf16.msra.mxu2 %v1639_v2 }
  0x32   : > { %729 = vmatpush.bf16.msra.mxu1 %v1628_v15 }
  0x33   : > { %602 = vmatpush.bf16.msra.mxu0 %v1618_v18 }
  0x34   : > { %820 = vmatpush.bf16.msra.mxu2 %v1638_v5 }
  0x35   : > { %730 = vmatmul.bf16.vlgmr.msra.gmra.mxu1 %v1927_v21 }
  0x36   : > { %603 = vmatmul.bf16.vlgmr.msra.gmra.mxu0 %v521_v22 }
  0x38   : > { %821 = vmatpush.bf16.msra.mxu2 %v1637_v7 }
  0x3b   : > { %822 = vmatmul.bf16.vlgmr.msra.gmra.mxu2 %v1927_v21 }
  0x45   : > { %735 = vmatmul.bf16.gmra.mxu1 %v1938_v27 }
  0x46   : > { %608 = vmatmul.bf16.gmra.mxu0 %v522_v28 }
  0x4b   : > { %827 = vmatmul.bf16.gmra.mxu2 %v1938_v27 }
  0xb2   : > { %v731_v30 = vpop.f32.mrf.mxu1 }
  0xb3   : > { %v604_v31 = vpop.f32.mrf.mxu0  ;;  %v732_v52 = vadd.f32 %v1700_v42, %v731_v30 }
  0xb4   : > { %v605_v32 = vadd.f32 %v1701_v29, %v604_v31  ;;  %v1702_v31 = vld [vmem:[%s761_s0] ss:$0 sm:$0xff] }
  0xb6   : > { %v614_v33 = vpack.c.bf16 %v605_v32, %v605_v32 }
  0xb8   : > { %622 = vst.msk [vmem:[%s1942_s28] sm:$0xf] %vm621_vm0, %v614_v33 }
  0xba   : > { %v733_v34 = vpop.f32.mrf.mxu1 }
  0xbb   : > { %v606_v35 = vpop.f32.mrf.mxu0  ;;  %v734_v50 = vadd.f32 %v1700_v42, %v733_v34 }
  0xbc   : > { %v607_v36 = vadd.f32 %v1701_v29, %v606_v35 }
  0xbd   : > { %v741_v53 = vpack.c.bf16 %v734_v50, %v732_v52 }
  0xbe   : > { %v615_v37 = vpack.c.bf16 %v607_v36, %v607_v36  ;;  %v823_v28 = vpop.f32.mrf.mxu2 }
  0xbf   : > { %v860_v54 = vsel %vm639_vm1, %v741_v53, 0  ;;  %v824_v34 = vadd.f32 %v1702_v31, %v823_v28  ;;  %v982_v28 = vld [vmem:[%s2025_s16] sm:$0xff] }
  0xc0   : > { %623 = vst.msk [vmem:[%s1942_s28 + $0x4] sm:$0xf] %vm621_vm0, %v615_v37 }
  0xc2   : > { %v736_v38 = vpop.f32.mrf.mxu1 }
  0xc3   : > { %v609_v39 = vpop.f32.mrf.mxu0  ;;  %v737_v44 = vadd.f32 %v1700_v42, %v736_v38 }
  0xc4   : > { %v610_v40 = vadd.f32 %v1701_v29, %v609_v39 }
  0xc6   : > { %v616_v41 = vpack.c.bf16 %v610_v40, %v610_v40 }
  0xc7   : > { %v1646_v55 = vld [vmem:[%s1942_s28] sm:$0xff] }
  0xc8   : > { %624 = vst.msk [vmem:[%s1942_s28 + $0x8] sm:$0xf] %vm621_vm0, %v616_v41 }
  0xca   : > { %v738_v43 = vpop.f32.mrf.mxu1 }
  0xcb   : > { %v739_v45 = vadd.f32 %v1700_v42, %v738_v43  ;;  %v611_v46 = vpop.f32.mrf.mxu0 }
  0xcc   : > { %v612_v47 = vadd.f32 %v1701_v29, %v611_v46  ;;  %v825_v29 = vpop.f32.mrf.mxu2 }
  0xcd   : > { %v742_v48 = vpack.c.bf16 %v739_v45, %v737_v44  ;;  %v826_v35 = vadd.f32 %v1702_v31, %v825_v29 }
  0xce   : > { %v617_v49 = vpack.c.bf16 %v612_v47, %v612_v47 }
  0xcf   : > { %v863_v51 = vsel %vm639_vm1, %v742_v48, 0  ;;  %v833_v38 = vpack.c.bf16 %v826_v35, %v824_v34 }
  0xd0   : > { %871 = vmatpush.bf16.xpose.msra.mxu3 %v863_v51  ;;  %625 = vst.msk [vmem:[%s1942_s28 + $0xc] sm:$0xf] %vm621_vm0, %v617_v49 }
  0xd4   : > { %v828_v30 = vpop.f32.mrf.mxu2 }
  0xd5   : > { %v829_v32 = vadd.f32 %v1702_v31, %v828_v30 }
  0xd7   : > { %v1647_v56 = vld [vmem:[%s1942_s28 + $0x8] sm:$0xff]  ;;  %s2014_s28 = scalar_lea.vmem [#allocation4], %s1978_s20 }
  0xd8   : > { %872 = vmatpush.bf16.xpose.msra.mxu3 %v860_v54  ;;  %634 = vst.msk [vmem:[%s2014_s28] sm:$0xff] %vm628_vm3, %v1783_v11 }
  0xd9   : > { %635 = vst.msk [vmem:[%s2014_s28 + $0x8] sm:$0xff] %vm628_vm3, %v1783_v11 }
  0xda   : > { %636 = vst.msk [vmem:[%s2014_s28 + $0x10] sm:$0xff] %vm628_vm3, %v1783_v11 }
  0xdb   : > { %637 = vst.msk [vmem:[%s2014_s28 + $0x18] sm:$0xff] %vm628_vm3, %v1783_v11 }
  0xdc   : > { %v830_v33 = vpop.f32.mrf.mxu2 }
  0xdd   : > { %v831_v36 = vadd.f32 %v1702_v31, %v830_v33 }
  0xdf   : > { %1597 = vmatmul.msk.bf16.vlgmr.msra.gmra.mxu3 %vm639_vm1, %v1646_v55  ;;  %v834_v37 = vpack.c.bf16 %v831_v36, %v829_v32 }
  0xe0   : > { %v953_v5 = vld [vmem:[%s2014_s28 + $0x8] sm:$0xff] }
  0xe1   : > { %1024 = vmatpush.bf16.msrb.mxu3 %v834_v37 }
  0xe2   : > { %v955_v32 = vld [vmem:[%s2014_s28 + $0x18] sm:$0xff] }
  0xe5   : > { %1025 = vmatpush.bf16.msrb.mxu3 %v833_v38 }
  0xef   : > { %1598 = vmatmul.msk.bf16.gmra.mxu3 %vm639_vm1, %v1647_v56 }
 0x162   : > { %v1971_v59 = vpop.f32.mrf.mxu3 }
 0x163   : > { %v891_v61 = vsel %vm890_vm2, %v1971_v59, -inf }
 0x164   : > { %892 = vmax.xlane.f32.xlu0 %v891_v61 }
 0x16a   : > { %v1980_v63 = vpop.f32.mrf.mxu3 }
 0x16b   : > { %v894_v1 = vsel %vm890_vm2, %v1980_v63, -inf }
 0x16c   : > { %895 = vmax.xlane.f32.xlu0 %v894_v1  ;;  %v952_v1 = vld [vmem:[%s2014_s28] sm:$0xff] }
 0x172   : > { %v1997_v4 = vpop.f32.mrf.mxu3 }
 0x173   : > { %v897_v6 = vsel %vm890_vm2, %v1997_v4, -inf }
 0x174   : > { %898 = vmax.xlane.f32.xlu1 %v897_v6 }
 0x17a   : > { %v2007_v8 = vpop.f32.mrf.mxu3 }
 0x17b   : > { %v900_v9 = vsel %vm890_vm2, %v2007_v8, -inf }
 0x17c   : > { %901 = vmax.xlane.f32.xlu1 %v900_v9 }
 0x1d7   : > { %v893_v13 = vpop.xlane.xlu0 %892 }
 0x1d8   : > { %v2039_v14 = vmax.f32 %v2036_v12, %v893_v13 }
 0x1da   : > { %v907_v15 = vsub.f32 %v2036_v12, %v2039_v14  ;;  %1045 = vst.msk [vmem:[%s1987_s22] sm:$0xff] %vm628_vm3, %v2039_v14  ;;  %921 = vperm.xlu2 %1697, %v2039_v14   ;;  %v983_v14 = vld [vmem:[%s2025_s16 + $0x8] sm:$0xff] }
 0x1dc   : > { %v911_v62 = vmul.f32 1.442695, %v907_v15 }
 0x1df   : > { %v896_v17 = vpop.xlane.xlu0 %895 }
 0x1e0   : > { %v904_v18 = vmax.f32 %v887_v16, %v896_v17 }
 0x1e2   : > { %v908_v19 = vsub.f32 %v887_v16, %v904_v18  ;;  %1046 = vst.msk [vmem:[%s1987_s22 + $0x8] sm:$0xff] %vm628_vm3, %v904_v18  ;;  %926 = vperm.xlu2 %1697, %v904_v18  }
 0x1e4   : > { %v913_v50 = vmul.f32 1.442695, %v908_v19  ;;  %v954_v19 = vld [vmem:[%s2014_s28 + $0x10] sm:$0xff] }
 0x1e7   : > { %v899_v21 = vpop.xlane.xlu1 %898 }
 0x1e8   : > { %v2054_v22 = vmax.f32 %v2051_v20, %v899_v21 }
 0x1ea   : > { %v909_v23 = vsub.f32 %v2051_v20, %v2054_v22  ;;  %1047 = vst.msk [vmem:[%s1987_s22 + $0x10] sm:$0xff] %vm628_vm3, %v2054_v22  ;;  %931 = vperm.xlu0 %1698, %v2054_v22  }
 0x1ec   : > { %v915_v10 = vmul.f32 1.442695, %v909_v23 }
 0x1ef   : > { %v902_v25 = vpop.xlane.xlu1 %901 }
 0x1f0   : > { %v2066_v26 = vmax.f32 %v2063_v24, %v902_v25 }
 0x1f2   : > { %v910_v27 = vsub.f32 %v2063_v24, %v2066_v26  ;;  %1048 = vst.msk [vmem:[%s1987_s22 + $0x18] sm:$0xff] %vm628_vm3, %v2066_v26  ;;  %936 = vperm.xlu1 %1699, %v2066_v26   ;;  %s1148_s22 = scalar_lea.vmem %s2219_s8, %s1648_s17 }
 0x1f3   : > { %v1649_v26 = vld [vmem:[%s1148_s22] sm:$0xff] }
 0x1f4   : > { %v917_v25 = vmul.f32 1.442695, %v910_v27  ;;  %1170 = vmatpush.bf16.msrb.mxu0 %v1649_v26  ;;  %1651 = vmatpush.bf16.msrb.mxu1 %v1649_v26 }
 0x234   : > { %v922_v39 = vpop.permute.xlu2 %921 }
 0x235   : > { %v939_v40 = vsub.f32 %v1971_v59, %v922_v39 }
 0x237   : > { %v943_v41 = vmul.f32 1.442695, %v939_v40 }
 0x239   : > { %1703 = vpow2.f32 %v943_v41 }
 0x23c   : > { %v927_v42 = vpop.permute.xlu2 %926 }
 0x23d   : > { %v940_v43 = vsub.f32 %v1980_v63, %v927_v42 }
 0x23f   : > { %v1704_v44 = vpop.eup %1703  ;;  %v945_v45 = vmul.f32 1.442695, %v940_v43 }
 0x240   : > { %v960_v46 = vsel %vm890_vm2, %v1704_v44, 0.0 }
 0x241   : > { %1705 = vpow2.f32 %v945_v45  ;;  %961 = vadd.xlane.f32.xlu2 %v960_v46 }
 0x242   : > { %1707 = vpow2.f32 %v913_v50 }
 0x247   : > { %v1706_v47 = vpop.eup %1705 }
 0x248   : > { %v963_v48 = vsel %vm890_vm2, %v1706_v47, 0.0  ;;  %v1010_v49 = vpack.c.bf16 %v1706_v47, %v1704_v44  ;;  %v1708_v51 = vpop.eup %1707  ;;  %v984_v44 = vld [vmem:[%s2025_s16 + $0x10] sm:$0xff] }
 0x249   : > { %964 = vadd.xlane.f32.xlu1 %v963_v48  ;;  %v957_v6 = vmul.f32 %v1708_v51, %v953_v5 }
 0x24a   : > { %1600 = vmatmul.msk.bf16.vlgmr.msrb.gmra.mxu3 %vm890_vm2, %v1010_v49 }
 0x259   : > { %993 = vperm.xlu2 %1697, %v1708_v51  }
 0x25c   : > { %v932_v52 = vpop.permute.xlu0 %931 }
 0x25d   : > { %v941_v53 = vsub.f32 %v1997_v4, %v932_v52 }
 0x25f   : > { %v947_v54 = vmul.f32 1.442695, %v941_v53 }
 0x261   : > { %1709 = vpow2.f32 %v947_v54 }
 0x264   : > { %v937_v55 = vpop.permute.xlu1 %936 }
 0x265   : > { %v942_v56 = vsub.f32 %v2007_v8, %v937_v55 }
 0x267   : > { %v1710_v57 = vpop.eup %1709  ;;  %v949_v58 = vmul.f32 1.442695, %v942_v56 }
 0x268   : > { %v966_v59 = vsel %vm890_vm2, %v1710_v57, 0.0 }
 0x269   : > { %1711 = vpow2.f32 %v949_v58  ;;  %967 = vadd.xlane.f32.xlu0 %v966_v59 }
 0x26a   : > { %1713 = vpow2.f32 %v911_v62 }
 0x26b   : > { %1715 = vpow2.f32 %v915_v10  ;;  %v985_v10 = vld [vmem:[%s2025_s16 + $0x18] sm:$0xff] }
 0x26c   : > { %1717 = vpow2.f32 %v917_v25 }
 0x26f   : > { %v1712_v60 = vpop.eup %1711 }
 0x270   : > { %v1011_v61 = vpack.c.bf16 %v1712_v60, %v1710_v57  ;;  %v1714_v63 = vpop.eup %1713  ;;  %v969_v0 = vsel %vm890_vm2, %v1712_v60, 0.0 }
 0x271   : > { %v956_v2 = vmul.f32 %v1714_v63, %v952_v1  ;;  %v1716_v13 = vpop.eup %1715 }
 0x272   : > { %1601 = vmatmul.msk.bf16.gmra.mxu3 %vm890_vm2, %v1011_v61  ;;  %v958_v20 = vmul.f32 %v1716_v13, %v954_v19  ;;  %v1718_v31 = vpop.eup %1717 }
 0x273   : > { %v959_v34 = vmul.f32 %v1718_v31, %v955_v32 }
 0x27d   : > { %988 = vperm.xlu0 %1698, %v1714_v63  }
 0x282   : > { %970 = vadd.xlane.f32.xlu2 %v969_v0 }
 0x2b4   : > { %v962_v3 = vpop.xlane.xlu2 %961 }
 0x2b5   : > { %v972_v4 = vadd.f32 %v962_v3, %v956_v2 }
 0x2b7   : > { %977 = vst.msk [vmem:[%s2014_s28] sm:$0xff] %vm628_vm3, %v972_v4 }
 0x2bc   : > { %v965_v7 = vpop.xlane.xlu1 %964  ;;  %v994_v15 = vpop.permute.xlu2 %993 }
 0x2bd   : > { %v973_v8 = vadd.f32 %v965_v7, %v957_v6  ;;  %v1007_v16 = vmul.f32 %v994_v15, %v983_v14 }
 0x2be   : > { %v1056_v9 = vld [vmem:[%s2014_s28] sm:$0xff] }
 0x2bf   : > { %978 = vst.msk [vmem:[%s2014_s28 + $0x8] sm:$0xff] %vm628_vm3, %v973_v8  ;;  %1062 = vperm.xlu2 %1697, %v1056_v9  }
 0x2c6   : > { %v1057_v11 = vld [vmem:[%s2014_s28 + $0x8] sm:$0xff] }
 0x2c7   : > { %1067 = vperm.xlu1 %1699, %v1057_v11  }
 0x2cd   : > { %v1027_v12 = vpop.f32.mrf.mxu3 }
 0x2cf   : > { %998 = vperm.xlu1 %1699, %v1716_v13  }
 0x2d5   : > { %v1029_v17 = vpop.f32.mrf.mxu3 }
 0x2d6   : > { %v1038_v18 = vadd.f32 %v1029_v17, %v1007_v16 }
 0x2d8   : > { %1042 = vst.msk [vmem:[%s2025_s16 + $0x8] sm:$0xff] %vm639_vm1, %v1038_v18 }
 0x2dc   : > { %v968_v21 = vpop.xlane.xlu0 %967 }
 0x2dd   : > { %v974_v22 = vadd.f32 %v968_v21, %v958_v20 }
 0x2df   : > { %979 = vst.msk [vmem:[%s2014_s28 + $0x10] sm:$0xff] %vm628_vm3, %v974_v22  ;;  %v1053_v0 = vld [vmem:[%s2025_s16 + $0x8] sm:$0xff] }
 0x2e6   : > { %v1058_v23 = vld [vmem:[%s2014_s28 + $0x10] sm:$0xff] }
 0x2e7   : > { %1072 = vperm.xlu2 %1697, %v1058_v23  }
 0x2ef   : > { %v989_v29 = vpop.permute.xlu0 %988 }
 0x2f0   : > { %v1006_v30 = vmul.f32 %v989_v29, %v982_v28 }
 0x2f2   : > { %v1037_v33 = vadd.f32 %v1027_v12, %v1006_v30 }
 0x2f4   : > { %1041 = vst.msk [vmem:[%s2025_s16] sm:$0xff] %vm639_vm1, %v1037_v33 }
 0x2f5   : > { %v971_v35 = vpop.xlane.xlu2 %970  ;;  %v1032_v52 = vpop.f32.mrf.mxu3 }
 0x2f6   : > { %v975_v36 = vadd.f32 %v971_v35, %v959_v34 }
 0x2f8   : > { %980 = vst.msk [vmem:[%s2014_s28 + $0x18] sm:$0xff] %vm628_vm3, %v975_v36 }
 0x2fb   : > { %v1052_v63 = vld [vmem:[%s2025_s16] sm:$0xff] }
 0x2fd   : > { %v1034_v16 = vpop.f32.mrf.mxu3 }
 0x2ff   : > { %v1059_v37 = vld [vmem:[%s2014_s28 + $0x18] sm:$0xff] }
 0x300   : > { %1077 = vperm.xlu2 %1697, %v1059_v37  }
 0x308   : > { %1003 = vperm.xlu2 %1697, %v1718_v31  }
 0x319   : > { %v1063_v24 = vpop.permute.xlu2 %1062 }
 0x31a   : > { %1719 = vrcp.f32 %v1063_v24  ;;  %vm1085_vm5 = vweird.f32 %v1063_v24  ;;  %v1091_v47 = vand.u32 2147483648, %v1063_v24  ;;  %v1089_v49 = vand.u32 2147483647, %v1063_v24 }
 0x31c   : > { %v1092_v58 = vor.u32 1.1754944e-38, %v1091_v47  ;;  %vm1090_vm8 = vcmp.eq.f32.partialorder %v1089_v49, 8.507059e+37  ;;  %v1197_v49 = vld [vmem:[%s1886_s13 + $0x10] sm:$0xff] (%p1190_p7) }
 0x320   : > { %v1720_v27 = vpop.eup %1719 }
 0x321   : > { %v1081_v38 = vmul.f32 %v1720_v27, %v1063_v24  ;;  %vm1086_vm4 = vweird.f32 %v1720_v27 }
 0x322   : > { %vm2125_vm6 = vmor %vm1085_vm5, %vm1086_vm4 }
 0x323   : > { %v1082_v39 = vsub.f32 1.0, %v1081_v38 }
 0x325   : > { %v1083_v41 = vmul.f32 %v1720_v27, %v1082_v39 }
 0x327   : > { %v1084_v43 = vadd.f32 %v1720_v27, %v1083_v41 }
 0x329   : > { %v1088_v53 = vsel %vm2125_vm6, %v1720_v27, %v1084_v43  ;;  %v1142_v27 = vld [vmem:[#allocation6 + $0x10] sm:$0xff]  ;;  %v1144_v43 = vld [vmem:[#allocation6 + $0x18] sm:$0xff] }
 0x32a   : > { %v1093_v61 = vsel %vm1090_vm8, %v1092_v58, %v1088_v53  ;;  %v1195_v53 = vld [vmem:[%s1886_s13] sm:$0xff] (%p1190_p7)  ;;  %v1196_v58 = vld [vmem:[%s1886_s13 + $0x8] sm:$0xff] (%p1190_p7) }
 0x32b   : > { %v1094_v2 = vmul.f32 %v1093_v61, %v1052_v63 }
 0x339   : > { %v1068_v40 = vpop.permute.xlu1 %1067 }
 0x33a   : > { %1721 = vrcp.f32 %v1068_v40  ;;  %v1106_v54 = vand.u32 2147483648, %v1068_v40  ;;  %v1104_v56 = vand.u32 2147483647, %v1068_v40  ;;  %vm1100_vm9 = vweird.f32 %v1068_v40 }
 0x33c   : > { %v1107_v60 = vor.u32 1.1754944e-38, %v1106_v54  ;;  %vm1105_vm11 = vcmp.eq.f32.partialorder %v1104_v56, 8.507059e+37  ;;  %v1198_v56 = vld [vmem:[%s1886_s13 + $0x18] sm:$0xff] (%p1190_p7) }
 0x340   : > { %v1722_v42 = vpop.eup %1721 }
 0x341   : > { %v1096_v45 = vmul.f32 %v1722_v42, %v1068_v40  ;;  %v999_v46 = vpop.permute.xlu1 %998  ;;  %vm1101_vm7 = vweird.f32 %v1722_v42  ;;  %v1073_v4 = vpop.permute.xlu2 %1072  ;;  %v1143_v40 = vld [vmem:[#allocation6] sm:$0xff] }
 0x342   : > { %v1008_v51 = vmul.f32 %v999_v46, %v984_v44  ;;  %vm1102_vm10 = vmor %vm1100_vm9, %vm1101_vm7  ;;  %1723 = vrcp.f32 %v1073_v4  ;;  %v1121_v20 = vand.u32 2147483648, %v1073_v4  ;;  %vm1115_vm13 = vweird.f32 %v1073_v4  ;;  %v1145_v46 = vld [vmem:[#allocation6 + $0x8] sm:$0xff] }
 0x343   : > { %v1097_v50 = vsub.f32 1.0, %v1096_v45  ;;  %v1119_v22 = vand.u32 2147483647, %v1073_v4 }
 0x344   : > { %v1039_v57 = vadd.f32 %v1032_v52, %v1008_v51  ;;  %v1122_v30 = vor.u32 1.1754944e-38, %v1121_v20  ;;  %v1727_v52 = vld [vmem:[%s2220_s9] ss:$0 sm:$0xff] (%p1190_p7) }
 0x345   : > { %v1098_v55 = vmul.f32 %v1722_v42, %v1097_v50  ;;  %vm1120_vm3 = vcmp.eq.f32.partialorder %v1119_v22, 8.507059e+37 }
 0x346   : > { %1043 = vst.msk [vmem:[%s2025_s16 + $0x10] sm:$0xff] %vm639_vm1, %v1039_v57 }
 0x347   : > { %v1099_v59 = vadd.f32 %v1722_v42, %v1098_v55 }
 0x348   : > { %v1724_v6 = vpop.eup %1723 }
 0x349   : > { %v1103_v62 = vsel %vm1102_vm10, %v1722_v42, %v1099_v59  ;;  %v1111_v7 = vmul.f32 %v1724_v6, %v1073_v4  ;;  %vm1116_vm12 = vweird.f32 %v1724_v6 }
 0x34a   : > { %v1108_v1 = vsel %vm1105_vm11, %v1107_v60, %v1103_v62  ;;  %vm1117_vm15 = vmor %vm1115_vm13, %vm1116_vm12 }
 0x34b   : > { %v1109_v3 = vmul.f32 %v1108_v1, %v1053_v0  ;;  %v1112_v9 = vsub.f32 1.0, %v1111_v7 }
 0x34d   : > { %v1140_v5 = vpack.c.bf16 %v1109_v3, %v1094_v2  ;;  %v1113_v12 = vmul.f32 %v1724_v6, %v1112_v9  ;;  %v1054_v34 = vld [vmem:[%s2025_s16 + $0x10] sm:$0xff] }
 0x34f   : > { %1608 = vmatmul.msk.bf16.vlgmr.msrb.gmra.mxu0 %vm639_vm1, %v1140_v5  ;;  %v1114_v18 = vadd.f32 %v1724_v6, %v1113_v12 }
 0x351   : > { %v1118_v28 = vsel %vm1117_vm15, %v1724_v6, %v1114_v18  ;;  %v1784_v6 = vmov (%p1190_p7), 128.0  }
 0x352   : > { %v1123_v33 = vsel %vm1120_vm3, %v1122_v30, %v1118_v28 }
 0x353   : > { %v1124_v37 = vmul.f32 %v1123_v33, %v1054_v34 }
 0x35a   : > { %v1078_v8 = vpop.permute.xlu2 %1077 }
 0x35b   : > { %1725 = vrcp.f32 %v1078_v8  ;;  %v1136_v25 = vand.u32 2147483648, %v1078_v8  ;;  %vm1130_vm0 = vweird.f32 %v1078_v8  ;;  %v1134_v29 = vand.u32 2147483647, %v1078_v8 }
 0x35c   : > { %1730 = vrcp.f32 (%p1190_p7), %v1784_v6 }
 0x35d   : > { %v1137_v32 = vor.u32 1.1754944e-38, %v1136_v25  ;;  %vm1135_vm4 = vcmp.eq.f32.partialorder %v1134_v29, 8.507059e+37 }
 0x361   : > { %v1726_v11 = vpop.eup %1725 }
 0x362   : > { %v1126_v13 = vmul.f32 %v1726_v11, %v1078_v8  ;;  %v1004_v14 = vpop.permute.xlu2 %1003  ;;  %vm1131_vm14 = vweird.f32 %v1726_v11  ;;  %v1731_v7 = vpop.eup (%p1190_p7), %1730 }
 0x363   : > { %v1009_v15 = vmul.f32 %v1004_v14, %v985_v10  ;;  %vm1132_vm2 = vmor %vm1130_vm0, %vm1131_vm14  ;;  %v1224_v8 = vmul.f32 (%p1190_p7), 128.0, %v1731_v7 }
 0x364   : > { %v1127_v17 = vsub.f32 1.0, %v1126_v13 }
 0x365   : > { %v1040_v19 = vadd.f32 %v1034_v16, %v1009_v15  ;;  %v1225_v9 = vsub.f32 (%p1190_p7), 1.0, %v1224_v8 }
 0x366   : > { %v1128_v21 = vmul.f32 %v1726_v11, %v1127_v17 }
 0x367   : > { %1044 = vst.msk [vmem:[%s2025_s16 + $0x18] sm:$0xff] %vm639_vm1, %v1040_v19  ;;  %v1226_v10 = vmul.f32 (%p1190_p7), %v1731_v7, %v1225_v9 }
 0x368   : > { %v1129_v23 = vadd.f32 %v1726_v11, %v1128_v21 }
 0x36a   : > { %v1133_v31 = vsel %vm1132_vm2, %v1726_v11, %v1129_v23  ;;  %v1227_v11 = vadd.f32 (%p1190_p7), %v1731_v7, %v1226_v10 }
 0x36b   : > { %v1138_v36 = vsel %vm1135_vm4, %v1137_v32, %v1133_v31 }
 0x36e   : > { %v1055_v35 = vld [vmem:[%s2025_s16 + $0x18] sm:$0xff] }
 0x36f   : > { %v1139_v24 = vmul.f32 %v1138_v36, %v1055_v35 }
 0x371   : > { %v1141_v26 = vpack.c.bf16 %v1139_v24, %v1124_v37 }
 0x373   : > { %1609 = vmatmul.msk.bf16.vlgmr.msrb.gmra.mxu1 %vm639_vm1, %v1141_v26  ;;  %vm1228_vm1 = vweird.f32 (%p1190_p7), %v1731_v7 }
 0x374   : > { %v1229_v12 = vsel (%p1190_p7), %vm1228_vm1, %v1731_v7, %v1227_v11 }
 0x3cc   : > { %v1172_v38 = vpop.f32.mrf.mxu0 }
 0x3cd   : > { %v1182_v39 = vadd.f32 %v1172_v38, %v1142_v27 }
 0x3cf   : > { %1186 = vst [vmem:[#allocation6 + $0x10] sm:$0xff] %v1182_v39 }
 0x3d4   : > { %v1174_v41 = vpop.f32.mrf.mxu0 }
 0x3d5   : > { %v1183_v42 = vadd.f32 %v1174_v41, %v1143_v40 }
 0x3d6   : > { %v1199_v54 = vld [vmem:[#allocation6 + $0x10] sm:$0xff] (%p1190_p7) }
 0x3d7   : > { %1187 = vst [vmem:[#allocation6] sm:$0xff] %v1183_v42  ;;  %v1203_v55 = vadd.f32 (%p1190_p7), %v1199_v54, %v1195_v53  ;;  %v1729_v53 = vld [vmem:[%s2222_s11] ss:$0 sm:$0xff] (%p1190_p7) }
 0x3d9   : > { %v2154_v61 = vadd.f32 (%p1190_p7), %v1727_v52, %v1203_v55 }
 0x3db   : > { %1215 = vadd.xlane.f32.xlu0 (%p1190_p7), %v2154_v61  ;;  %v1234_v0 = vmul.f32 (%p1190_p7), %v2154_v61, %v2154_v61 }
 0x3dd   : > { %1238 = vadd.xlane.f32.xlu2 (%p1190_p7), %v1234_v0 }
 0x3de   : > { %v1200_v60 = vld [vmem:[#allocation6] sm:$0xff] (%p1190_p7) }
 0x3df   : > { %v1204_v62 = vadd.f32 (%p1190_p7), %v1200_v60, %v1196_v58 }
 0x3e1   : > { %v2160_v1 = vadd.f32 (%p1190_p7), %v1727_v52, %v1204_v62 }
 0x3e3   : > { %v1235_v3 = vmul.f32 (%p1190_p7), %v2160_v1, %v2160_v1  ;;  %1217 = vadd.xlane.f32.xlu0 (%p1190_p7), %v2160_v1 }
 0x3e5   : > { %1240 = vadd.xlane.f32.xlu2 (%p1190_p7), %v1235_v3 }
 0x3f0   : > { %v1177_v44 = vpop.f32.mrf.mxu1 }
 0x3f1   : > { %v1184_v45 = vadd.f32 %v1177_v44, %v1144_v43 }
 0x3f3   : > { %1188 = vst [vmem:[#allocation6 + $0x18] sm:$0xff] %v1184_v45 }
 0x3f7   : > { %1194 = sbr.rel (!%p1190_p7) target bundleno = 1187 (0x4a3), region = 84 }
 0x3f8   : > { %v1179_v47 = vpop.f32.mrf.mxu1 }
 0x3f9   : > { %v1185_v48 = vadd.f32 %v1179_v47, %v1145_v46 }
 0x3fa   : > { %v1201_v50 = vld [vmem:[#allocation6 + $0x18] sm:$0xff] (%p1190_p7) }
 0x3fb   : > { %1189 = vst [vmem:[#allocation6 + $0x8] sm:$0xff] %v1185_v48  ;;  %v1205_v51 = vadd.f32 (%p1190_p7), %v1201_v50, %v1197_v49  ;;  %v1728_v50 = vld [vmem:[%s2221_s10] ss:$0 sm:$0xff] (%p1190_p7) }
 0x3fd   : > { %v2152_v59 = vadd.f32 %v1727_v52, %v1205_v51 }
 0x3ff   : > { %1219 = vadd.xlane.f32.xlu1 %v2152_v59  ;;  %v1236_v5 = vmul.f32 %v2152_v59, %v2152_v59 }
 0x401   : > { %1242 = vadd.xlane.f32.xlu0 %v1236_v5 }
 0x402   : > { %v1202_v57 = vld [vmem:[#allocation6 + $0x8] sm:$0xff] }
 0x403   : > { %v1206_v63 = vadd.f32 %v1202_v57, %v1198_v56 }
 0x405   : > { %v2162_v2 = vadd.f32 %v1727_v52, %v1206_v63 }
 0x407   : > { %1221 = vadd.xlane.f32.xlu1 %v2162_v2  ;;  %v1237_v4 = vmul.f32 %v2162_v2, %v2162_v2 }
 0x40f   : > { %1244 = vadd.xlane.f32.xlu1 %v1237_v4 }
 0x44e   : > { %v1216_v14 = vpop.xlane.xlu0 %1215 }
 0x44f   : > { %v1230_v15 = vmul.f32 %v1229_v12, %v1216_v14 }
 0x450   : > { %v1239_v16 = vpop.xlane.xlu2 %1238 }
 0x451   : > { %v1250_v17 = vmul.f32 %v1230_v15, %v1230_v15  ;;  %v1246_v18 = vmul.f32 %v1239_v16, %v1229_v12  ;;  %v1258_v49 = vsub.f32 %v2154_v61, %v1230_v15 }
 0x453   : > { %v1254_v19 = vsub.f32 %v1246_v18, %v1250_v17 }
 0x455   : > { %v1262_v20 = vadd.f32 1e-05, %v1254_v19 }
 0x456   : > { %v1218_v22 = vpop.xlane.xlu0 %1217 }
 0x457   : > { %1732 = vrsqrt.f32 %v1262_v20  ;;  %v1231_v23 = vmul.f32 %v1229_v12, %v1218_v22  ;;  %vm1272_vm6 = vweird.f32 %v1262_v20 }
 0x458   : > { %v1241_v25 = vpop.xlane.xlu2 %1240 }
 0x459   : > { %v1251_v28 = vmul.f32 %v1231_v23, %v1231_v23  ;;  %v1247_v29 = vmul.f32 %v1241_v25, %v1229_v12  ;;  %v1259_v5 = vsub.f32 %v2160_v1, %v1231_v23 }
 0x45b   : > { %v1255_v32 = vsub.f32 %v1247_v29, %v1251_v28 }
 0x45d   : > { %v1733_v33 = vpop.eup %1732  ;;  %v1263_v34 = vadd.f32 1e-05, %v1255_v32 }
 0x45e   : > { %v1267_v36 = vmul.f32 %v1733_v33, %v1262_v20  ;;  %vm1273_vm5 = vweird.f32 %v1733_v33 }
 0x45f   : > { %1734 = vrsqrt.f32 %v1263_v34  ;;  %vm1274_vm7 = vmor %vm1272_vm6, %vm1273_vm5  ;;  %vm1282_vm9 = vweird.f32 %v1263_v34 }
 0x460   : > { %v1268_v39 = vmul.f32 %v1733_v33, %v1267_v36 }
 0x462   : > { %v1269_v42 = vmul.f32 0.5, %v1268_v39 }
 0x464   : > { %v1270_v45 = vsub.f32 1.5, %v1269_v42 }
 0x465   : > { %v1735_v46 = vpop.eup %1734 }
 0x466   : > { %v1271_v47 = vmul.f32 %v1733_v33, %v1270_v45  ;;  %v1277_v48 = vmul.f32 %v1735_v46, %v1263_v34  ;;  %vm1283_vm8 = vweird.f32 %v1735_v46 }
 0x467   : > { %vm1284_vm10 = vmor %vm1282_vm9, %vm1283_vm8 }
 0x468   : > { %v1275_v51 = vsel %vm1274_vm7, %v1733_v33, %v1271_v47  ;;  %v1278_v52 = vmul.f32 %v1735_v46, %v1277_v48 }
 0x469   : > { %v1306_v54 = vmul.f32 %v1275_v51, %v1258_v49 }
 0x46a   : > { %v1279_v56 = vmul.f32 0.5, %v1278_v52 }
 0x46b   : > { %v1314_v58 = vmul.f32 %v1728_v50, %v1306_v54 }
 0x46c   : > { %v1280_v62 = vsub.f32 1.5, %v1279_v56 }
 0x46d   : > { %v1322_v63 = vadd.f32 %v1729_v53, %v1314_v58 }
 0x46e   : > { %v1281_v3 = vmul.f32 %v1735_v46, %v1280_v62 }
 0x46f   : > { %1326 = vst [vmem:[%s1896_s19] sm:$0xff] %v1322_v63 }
 0x470   : > { %v1285_v7 = vsel %vm1284_vm10, %v1735_v46, %v1281_v3 }
 0x471   : > { %v1307_v9 = vmul.f32 %v1285_v7, %v1259_v5 }
 0x472   : > { %v1220_v13 = vpop.xlane.xlu1 %1219 }
 0x473   : > { %v2174_v31 = vmul.f32 %v1229_v12, %v1220_v13 }
 0x474   : > { %v1243_v26 = vpop.xlane.xlu0 %1242 }
 0x475   : > { %v1252_v27 = vmul.f32 %v2174_v31, %v2174_v31  ;;  %v1248_v38 = vmul.f32 %v1243_v26, %v1229_v12  ;;  %v1260_v15 = vsub.f32 %v2152_v59, %v2174_v31 }
 0x477   : > { %v1256_v41 = vsub.f32 %v1248_v38, %v1252_v27 }
 0x479   : > { %v1264_v44 = vadd.f32 1e-05, %v1256_v41 }
 0x47a   : > { %v1222_v21 = vpop.xlane.xlu1 %1221 }
 0x47b   : > { %v2172_v30 = vmul.f32 %v1229_v12, %v1222_v21  ;;  %vm1292_vm15 = vweird.f32 %v1264_v44 }
 0x47d   : > { %v1253_v37 = vmul.f32 %v2172_v30, %v2172_v30  ;;  %v1261_v14 = vsub.f32 %v2162_v2, %v2172_v30 }
 0x482   : > { %v1245_v35 = vpop.xlane.xlu1 %1244 }
 0x483   : > { %v1249_v24 = vmul.f32 %v1245_v35, %v1229_v12  ;;  %v1315_v12 = vmul.f32 %v1728_v50, %v1307_v9 }
 0x485   : > { %v1257_v40 = vsub.f32 %v1249_v24, %v1253_v37  ;;  %v1323_v16 = vadd.f32 %v1729_v53, %v1315_v12 }
 0x487   : > { %v1265_v43 = vadd.f32 1e-05, %v1257_v40  ;;  %1327 = vst [vmem:[%s1896_s19 + $0x8] sm:$0xff] %v1323_v16 }
 0x489   : > { %1736 = vrsqrt.f32 %v1265_v43  ;;  %vm1302_vm13 = vweird.f32 %v1265_v43 }
 0x48a   : > { %1738 = vrsqrt.f32 %v1264_v44 }
 0x48f   : > { %v1737_v55 = vpop.eup %1736 }
 0x490   : > { %v1739_v57 = vpop.eup %1738  ;;  %v1297_v60 = vmul.f32 %v1737_v55, %v1265_v43  ;;  %vm1303_vm11 = vweird.f32 %v1737_v55 }
 0x491   : > { %v1287_v61 = vmul.f32 %v1739_v57, %v1264_v44  ;;  %vm1293_vm12 = vweird.f32 %v1739_v57  ;;  %vm1304_vm14 = vmor %vm1302_vm13, %vm1303_vm11 }
 0x492   : > { %v1298_v0 = vmul.f32 %v1737_v55, %v1297_v60  ;;  %vm1294_vm0 = vmor %vm1292_vm15, %vm1293_vm12 }
 0x493   : > { %v1288_v4 = vmul.f32 %v1739_v57, %v1287_v61 }
 0x494   : > { %v1299_v6 = vmul.f32 0.5, %v1298_v0 }
 0x495   : > { %v1289_v8 = vmul.f32 0.5, %v1288_v4 }
 0x496   : > { %v1300_v10 = vsub.f32 1.5, %v1299_v6 }
 0x497   : > { %v1290_v11 = vsub.f32 1.5, %v1289_v8 }
 0x498   : > { %v1301_v13 = vmul.f32 %v1737_v55, %v1300_v10 }
 0x499   : > { %v1291_v1 = vmul.f32 %v1739_v57, %v1290_v11 }
 0x49a   : > { %v1305_v17 = vsel %vm1304_vm14, %v1737_v55, %v1301_v13 }
 0x49b   : > { %v1309_v18 = vmul.f32 %v1305_v17, %v1261_v14  ;;  %v1295_v19 = vsel %vm1294_vm0, %v1739_v57, %v1291_v1 }
 0x49c   : > { %v1308_v20 = vmul.f32 %v1295_v19, %v1260_v15 }
 0x49d   : > { %v1317_v21 = vmul.f32 %v1728_v50, %v1309_v18 }
 0x49e   : > { %v1316_v22 = vmul.f32 %v1728_v50, %v1308_v20 }
 0x49f   : > { %v1325_v23 = vadd.f32 %v1729_v53, %v1317_v21 }
 0x4a0   : > { %v1324_v25 = vadd.f32 %v1729_v53, %v1316_v22 }
 0x4a1   : > { %1329 = vst [vmem:[%s1896_s19 + $0x18] sm:$0xff] %v1325_v23 }
 0x4a2   : > { %1328 = vst [vmem:[%s1896_s19 + $0x10] sm:$0xff] %v1324_v25 }
 0x4a3 PF: > { %s22_s25 = sadd.s32 1, %s1778_s25   ;;  %s2228_s21 = smov %s1770_s23 }
 0x4a4   : > { %p19_p8 = scmp.ge.s32.totalorder %s22_s25, 18   ;;  %s2229_s22 = smov %s1774_s24 }
 0x4a5   : > { %s2230_s23 = smov %s2233_s26  ;;  %s2231_s24 = smov %s2237_s27 }
 0x4a6   :  { %21 = sbr.rel (!%p19_p8) target bundleno = 3 (0x3), region = 132 }

</bundles_post_ra>
